<compile_context>
chip_gen: v6e
topology: v6e:2x2x1
jax: 0.10.0
libtpu: 0.0.40
codegen_flags: <defaults>
</compile_context>

<pallas_src>
import functools

import jax
import jax.numpy as jnp
from jax import lax
from jax.experimental import pallas as pl
from jax.experimental.pallas import tpu as pltpu


# ----------------------------- in-kernel helpers -----------------------------

def _layernorm(x, gamma, beta, eps=1e-6):
    # x: (M, H); gamma/beta: (1, H).  torch.std => unbiased (N-1) estimator;
    # the divide goes through the EUP approximate reciprocal (idle slot).
    mean = jnp.mean(x, axis=-1, keepdims=True)
    var = jnp.sum((x - mean) ** 2, axis=-1, keepdims=True) / (x.shape[-1] - 1)
    inv = pl.reciprocal(jnp.sqrt(var) + eps, approx=True)
    return gamma * (x - mean) * inv + beta


# --------------------------------- kernel ------------------------------------

def decoder_layer_kernel(
    x_ref, enc_ref, mask_ref,
    g1_ref, be1_ref, g2_ref, be2_ref, g3_ref, be3_ref,
    wqkv1_ref, wo1_ref,
    wq2_ref, wkv2_ref, wo2_ref,
    wf1_ref, bf1_ref, wf2_ref, bf2_ref,
    out_ref,
    ctx_ref,                                   # VMEM scratch (bblk*Sq, Dv) f32
    *, num_heads, dk, dv,
):
    bblk, sq, hidden = x_ref.shape
    sk = enc_ref.shape[1]
    dh = dk // num_heads
    dvh = dv // num_heads
    neg = jnp.float32(-1e9)
    cdt = wqkv1_ref.dtype                      # MXU operand dtype (bf16 / f32)

    # Fold the batch block into the matmul M dimension for LN / proj / FFN.
    x = x_ref[...].reshape(bblk * sq, hidden)                # (M, H) f32

    # Causal additive mask built in-kernel (hoisted once, no HBM traffic) plus
    # the key-padding mask shipped as an additive (bblk, 1, Sq) block.
    row = lax.broadcasted_iota(jnp.int32, (sq, sq), 0)
    col = lax.broadcasted_iota(jnp.int32, (sq, sq), 1)
    causal = jnp.where(col > row, neg, jnp.float32(0.0))
    self_mask = causal[None, :, :] + mask_ref[...]           # (bblk, Sq, Sq)

    def attend(q, k, v, wo_ref, kv_len, mask_add):
        """q:(bblk*Sq,Dk), k:(bblk*kv_len,Dk), v:(bblk*kv_len,Dv), all f32.
        Per-head contexts are stored into lane slices of ctx_ref; the output
        projection W_O is ONE (bblk*Sq, Dv) x (Dv, H) matmul."""
        q3 = q.reshape(bblk, sq, dk)
        k3 = k.reshape(bblk, kv_len, dk)
        v3 = v.reshape(bblk, kv_len, dv)
        for h in range(num_heads):                  # small static head loop
            qh = q3[:, :, h * dh:(h + 1) * dh].astype(cdt)
            kh = k3[:, :, h * dh:(h + 1) * dh].astype(cdt)
            vh = v3[:, :, h * dvh:(h + 1) * dvh].astype(cdt)
            if bblk == 1:       # 2-D dots (path exercised by this test config)
                logits = lax.dot_general(
                    qh[0], kh[0], (((1,), (1,)), ((), ())),
                    preferred_element_type=jnp.float32)[None]
            else:               # all bblk batches in one batched dot_general
                logits = jnp.einsum('bqd,bkd->bqk', qh, kh,
                                    preferred_element_type=jnp.float32)
            if mask_add is not None:
                logits = logits + mask_add
            m = jnp.max(logits, axis=-1, keepdims=True)
            e = jnp.exp(logits - m)
            w = (e * pl.reciprocal(jnp.sum(e, axis=-1, keepdims=True),
                                   approx=True)).astype(cdt)
            if bblk == 1:
                ctx_h = jnp.dot(w[0], vh[0], preferred_element_type=jnp.float32)
            else:
                ctx_h = jnp.einsum('bqk,bkd->bqd', w, vh,
                                   preferred_element_type=jnp.float32
                                   ).reshape(bblk * sq, dvh)
            ctx_ref[:, h * dvh:(h + 1) * dvh] = ctx_h
        return jnp.dot(ctx_ref[...].astype(cdt), wo_ref[...],
                       preferred_element_type=jnp.float32)

    # ---------------- masked multi-head self-attention + residual ------------
    xn = _layernorm(x, g1_ref[...], be1_ref[...])
    qkv = jnp.dot(xn.astype(cdt), wqkv1_ref[...],
                  preferred_element_type=jnp.float32)        # (M, 2Dk+Dv)
    x = x + attend(qkv[:, :dk], qkv[:, dk:2 * dk], qkv[:, 2 * dk:],
                   wo1_ref, sq, self_mask)

    # ---------------- encoder-decoder multi-head attention + residual --------
    xn = _layernorm(x, g2_ref[...], be2_ref[...])
    q = jnp.dot(xn.astype(cdt), wq2_ref[...],
                preferred_element_type=jnp.float32)          # scale pre-folded
    enc2 = enc_ref[...].reshape(bblk * sk, hidden)           # hoisted K/V proj
    kv = jnp.dot(enc2.astype(cdt), wkv2_ref[...],
                 preferred_element_type=jnp.float32)         # (bblk*Sk, Dk+Dv)
    x = x + attend(q, kv[:, :dk], kv[:, dk:], wo2_ref, sk, None)

    # ---------------- position-wise FFN (ReLU after BOTH linears) ------------
    xn = _layernorm(x, g3_ref[...], be3_ref[...])
    h1 = jnp.maximum(jnp.dot(xn.astype(cdt), wf1_ref[...],
                             preferred_element_type=jnp.float32) + bf1_ref[...],
                     0.0)
    h2 = jnp.maximum(jnp.dot(h1.astype(cdt), wf2_ref[...],
                             preferred_element_type=jnp.float32) + bf2_ref[...],
                     0.0)
    out_ref[...] = (x + h2).reshape(bblk, sq, hidden)


# --------------------------------- wrapper -----------------------------------

def decoder_layer(x, encoder_outputs, src_mask, params, *, num_heads,
                  batch_block=8, mxu_dtype=jnp.bfloat16,
                  single_buffer_weights=True):
    """x: (B, Sq, H); encoder_outputs: (B, Sk, H); src_mask: (B, Sq) of {0,1}.
    Returns (y, encoder_outputs), mirroring the torch module."""
    B, Sq, H = x.shape
    _, Sk, _ = encoder_outputs.shape
    Dk = params["wq1"].shape[1]
    Dv = params["wv1"].shape[1]
    F = params["wf1"].shape[1]
    scale = (Dk // num_heads) ** (-0.5)

    # Batches per grid step: the largest divisor of B that still leaves >= 2
    # grid steps (so ("parallel",) shards across both v7x TensorCores and the
    # I/O DMAs pipeline against compute), capped at batch_block.
    max_b = min(batch_block, max(1, B // 2))
    bblk = max(d for d in range(1, max_b + 1) if B % d == 0)
    grid = (B // bblk,)

    # Compile-time weight transforms: fold the 1/sqrt(dh) query scale into wq,
    # fuse [wq|wk|wv] / [wk|wv] into single wide projections, cast MXU weight
    # operands to bf16 (activations are cast at the dot sites; accumulate f32).
    wqkv1 = jnp.concatenate(
        [params["wq1"] * scale, params["wk1"], params["wv1"]], axis=1
    ).astype(mxu_dtype)
    wq2 = (params["wq2"] * scale).astype(mxu_dtype)
    wkv2 = jnp.concatenate([params["wk2"], params["wv2"]],
                           axis=1).astype(mxu_dtype)
    wo1 = params["wo1"].astype(mxu_dtype)
    wo2 = params["wo2"].astype(mxu_dtype)
    wf1 = params["wf1"].astype(mxu_dtype)
    wf2 = params["wf2"].astype(mxu_dtype)

    # src_mask -> additive key mask (B, 1, Sq); causal mask is built in-kernel,
    # so no (B, Sq, Sq) tensor ever hits HBM.
    mask_add = jnp.where(src_mask[:, None, :] == 0,
                         jnp.float32(-1e9), jnp.float32(0.0))

    # VMEM budget derived from the per-step footprint (weights counted twice in
    # case single-buffering is unavailable), capped well below v7x's 64 MiB.
    esz = jnp.dtype(mxu_dtype).itemsize
    w_bytes = esz * (H * (2 * Dk + Dv) + Dv * H + H * Dk + H * (Dk + Dv)
                     + Dv * H + H * F + F * H) + 4 * (6 * H + F + H)
    io_bytes = 4 * (2 * bblk * Sq * H + bblk * Sk * H + bblk * Sq)
    vmem_limit = int(min(48 << 20,
                         max(16 << 20,
                             2 * io_bytes + 2 * w_bytes + 4 * bblk * Sq * Dv
                             + (8 << 20))))

    kernel = functools.partial(decoder_layer_kernel,
                               num_heads=num_heads, dk=Dk, dv=Dv)
    operands = (
        x, encoder_outputs, mask_add,
        params["g1"], params["be1"], params["g2"], params["be2"],
        params["g3"], params["be3"],
        wqkv1, wo1, wq2, wkv2, wo2,
        wf1, params["bf1"], wf2, params["bf2"],
    )

    def _run(single_buffer):
        def const_spec(shape):
            idx = lambda b: (0,) * len(shape)
            if single_buffer:   # grid-invariant weights: no double buffering
                return pl.BlockSpec(shape, idx, pipeline_mode=pl.Buffered(1))
            return pl.BlockSpec(shape, idx)

        in_specs = [
            pl.BlockSpec((bblk, Sq, H), lambda b: (b, 0, 0)),     # x
            pl.BlockSpec((bblk, Sk, H), lambda b: (b, 0, 0)),     # encoder outs
            pl.BlockSpec((bblk, 1, Sq), lambda b: (b, 0, 0)),     # key-pad mask
            const_spec((1, H)), const_spec((1, H)),               # LN1
            const_spec((1, H)), const_spec((1, H)),               # LN2
            const_spec((1, H)), const_spec((1, H)),               # LN3
            const_spec((H, 2 * Dk + Dv)), const_spec((Dv, H)),    # self-attn
            const_spec((H, Dk)), const_spec((H, Dk + Dv)),        # cross-attn
            const_spec((Dv, H)),
            const_spec((H, F)), const_spec((1, F)),               # FFN
            const_spec((F, H)), const_spec((1, H)),
        ]
        return pl.pallas_call(
            kernel,
            out_shape=jax.ShapeDtypeStruct((B, Sq, H), jnp.float32),
            grid_spec=pltpu.PrefetchScalarGridSpec(
                num_scalar_prefetch=0,
                grid=grid,
                in_specs=in_specs,
                out_specs=pl.BlockSpec((bblk, Sq, H), lambda b: (b, 0, 0)),
                scratch_shapes=[pltpu.VMEM((bblk * Sq, Dv), jnp.float32)],
            ),
            compiler_params=pltpu.CompilerParams(
                dimension_semantics=("parallel",),
                vmem_limit_bytes=vmem_limit,
            ),
        )(*operands)

    if single_buffer_weights:
        try:
            out = _run(True)
        except Exception:
            # Graceful fallback if this JAX build rejects pl.Buffered(1) on the
            # top-level pipeline: default double-buffered weight blocks.
            out = _run(False)
    else:
        out = _run(False)
    return out, encoder_outputs


# ----------------------------- pure-JAX reference -----------------------------

def _reference(x, enc, src_mask, params, num_heads):
    def ln(x, g, b, eps=1e-6):
        mean = x.mean(-1, keepdims=True)
        std = jnp.sqrt(jnp.sum((x - mean) ** 2, -1, keepdims=True)
                       / (x.shape[-1] - 1))
        return g * (x - mean) / (std + eps) + b

    def mha(q_in, k_in, v_in, wq, wk, wv, wo, mask):
        B, Sq, _ = q_in.shape
        Sk = k_in.shape[1]
        q = q_in @ wq; k = k_in @ wk; v = v_in @ wv
        dh = q.shape[-1] // num_heads
        dvh = v.shape[-1] // num_heads
        q = q.reshape(B, Sq, num_heads, dh).transpose(0, 2, 1, 3) * dh ** -0.5
        k = k.reshape(B, Sk, num_heads, dh).transpose(0, 2, 1, 3)
        v = v.reshape(B, Sk, num_heads, dvh).transpose(0, 2, 1, 3)
        logits = jnp.einsum("bhqd,bhkd->bhqk", q, k)
        if mask is not None:
            logits = logits + mask[:, None]
        w = jax.nn.softmax(logits, -1)
        ctx = jnp.einsum("bhqk,bhkd->bhqd", w, v)
        ctx = ctx.transpose(0, 2, 1, 3).reshape(B, Sq, -1)
        return ctx @ wo

    B, Sq, H = x.shape
    neg = jnp.float32(-1e9)
    causal = jnp.where(jnp.triu(jnp.ones((Sq, Sq), jnp.float32), 1) > 0, neg, 0.0)
    mask = causal[None] + jnp.where(src_mask[:, None, :] == 0, neg, 0.0)

    xn = ln(x, params["g1"], params["be1"])
    x = x + mha(xn, xn, xn, params["wq1"], params["wk1"], params["wv1"],
                params["wo1"], mask)
    xn = ln(x, params["g2"], params["be2"])
    x = x + mha(xn, enc, enc, params["wq2"], params["wk2"], params["wv2"],
                params["wo2"], None)
    xn = ln(x, params["g3"], params["be3"])
    h = jnp.maximum(xn @ params["wf1"] + params["bf1"], 0.0)
    h = jnp.maximum(h @ params["wf2"] + params["bf2"], 0.0)
    return x + h


# ----------------------------------- main ------------------------------------

if __name__ == "__main__":
    B, Sq, Sk = 2, 8, 10
    H, Dk, Dv, F, NH = 32, 32, 32, 64, 4

    key = jax.random.PRNGKey(0)
    ks = iter(jax.random.split(key, 32))

    def w(shape, scale):
        return jax.random.normal(next(ks), shape, jnp.float32) * scale

    params = {
        # LayerNorm parameters (gamma=1, beta=0 as in the module's __init__)
        "g1": jnp.ones((1, H), jnp.float32), "be1": jnp.zeros((1, H), jnp.float32),
        "g2": jnp.ones((1, H), jnp.float32), "be2": jnp.zeros((1, H), jnp.float32),
        "g3": jnp.ones((1, H), jnp.float32), "be3": jnp.zeros((1, H), jnp.float32),
        # self-attention projections (no bias, matching nn.Linear(bias=False))
        "wq1": w((H, Dk), H ** -0.5), "wk1": w((H, Dk), H ** -0.5),
        "wv1": w((H, Dv), H ** -0.5), "wo1": w((Dv, H), Dv ** -0.5),
        # encoder-decoder attention projections
        "wq2": w((H, Dk), H ** -0.5), "wk2": w((H, Dk), H ** -0.5),
        "wv2": w((H, Dv), H ** -0.5), "wo2": w((Dv, H), Dv ** -0.5),
        # feed-forward (with bias, matching nn.Linear defaults)
        "wf1": w((H, F), H ** -0.5), "bf1": w((1, F), 0.02),
        "wf2": w((F, H), F ** -0.5), "bf2": w((1, H), 0.02),
    }

    x = jax.random.normal(next(ks), (B, Sq, H), jnp.float32)
    enc = jax.random.normal(next(ks), (B, Sk, H), jnp.float32)
    src_mask = jnp.ones((B, Sq), jnp.int32).at[1, Sq - 1].set(0)  # one padded key

    y_ref = _reference(x, enc, src_mask, params, NH)

    # Default path: bf16 MXU operands, f32 accumulation (perf-review request).
    y, enc_out = decoder_layer(x, enc, src_mask, params, num_heads=NH)
    y = jax.block_until_ready(y)
    assert y.shape == (B, Sq, H)
    assert enc_out.shape == (B, Sk, H)
    assert bool(jnp.all(jnp.isfinite(y)))
    # tolerance covers bf16 MXU operands; tight parity is checked in f32 below
    assert jnp.allclose(y, y_ref, rtol=5e-2, atol=8e-2), "bf16 kernel mismatch"

    # f32-MXU parity run: only the EUP approximate reciprocals (LayerNorm and
    # softmax denominators) differ from the pure-JAX reference.
    y32, _ = decoder_layer(x, enc, src_mask, params, num_heads=NH,
                           mxu_dtype=jnp.float32)
    y32 = jax.block_until_ready(y32)
    assert jnp.allclose(y32, y_ref, rtol=1e-2, atol=1e-2), "f32 kernel mismatch"

    print("KERNEL_OK")
</pallas_src>

<mosaic_0001>
module attributes {stable_mosaic.version = 11 : i64} {
  func.func @decoder_layer_kernel(%arg0: i32, %arg1: memref<1x8x32xf32, #tpu.memory_space<vmem>>, %arg2: memref<1x10x32xf32, #tpu.memory_space<vmem>>, %arg3: memref<1x1x8xf32, #tpu.memory_space<vmem>>, %arg4: memref<1x32xf32, #tpu.memory_space<vmem>>, %arg5: memref<1x32xf32, #tpu.memory_space<vmem>>, %arg6: memref<1x32xf32, #tpu.memory_space<vmem>>, %arg7: memref<1x32xf32, #tpu.memory_space<vmem>>, %arg8: memref<1x32xf32, #tpu.memory_space<vmem>>, %arg9: memref<1x32xf32, #tpu.memory_space<vmem>>, %arg10: memref<32x96xbf16, #tpu.memory_space<vmem>>, %arg11: memref<32x32xbf16, #tpu.memory_space<vmem>>, %arg12: memref<32x32xbf16, #tpu.memory_space<vmem>>, %arg13: memref<32x64xbf16, #tpu.memory_space<vmem>>, %arg14: memref<32x32xbf16, #tpu.memory_space<vmem>>, %arg15: memref<32x64xbf16, #tpu.memory_space<vmem>>, %arg16: memref<1x64xf32, #tpu.memory_space<vmem>>, %arg17: memref<64x32xbf16, #tpu.memory_space<vmem>>, %arg18: memref<1x32xf32, #tpu.memory_space<vmem>>, %arg19: memref<1x8x32xf32, #tpu.memory_space<vmem>>, %arg20: memref<8x32xf32, #tpu.memory_space<vmem>>) attributes {dimension_semantics = [#tpu.dimension_semantics<parallel>], iteration_bounds = array<i64: 2>, scalar_prefetch = 0 : i64, scratch_operands = 1 : i64, tpu.core_type = #tpu.core_type<tc>, window_params = [{transform_indices = @transform_0, window_bounds = array<i64: 1, 8, 32>}, {transform_indices = @transform_1, window_bounds = array<i64: 1, 10, 32>}, {transform_indices = @transform_2, window_bounds = array<i64: 1, 1, 8>}, {pipeline_mode = #tpu.pipeline_mode<synchronous>, transform_indices = @transform_3, window_bounds = array<i64: 1, 32>}, {pipeline_mode = #tpu.pipeline_mode<synchronous>, transform_indices = @transform_4, window_bounds = array<i64: 1, 32>}, {pipeline_mode = #tpu.pipeline_mode<synchronous>, transform_indices = @transform_5, window_bounds = array<i64: 1, 32>}, {pipeline_mode = #tpu.pipeline_mode<synchronous>, transform_indices = @transform_6, window_bounds = array<i64: 1, 32>}, {pipeline_mode = #tpu.pipeline_mode<synchronous>, transform_indices = @transform_7, window_bounds = array<i64: 1, 32>}, {pipeline_mode = #tpu.pipeline_mode<synchronous>, transform_indices = @transform_8, window_bounds = array<i64: 1, 32>}, {pipeline_mode = #tpu.pipeline_mode<synchronous>, transform_indices = @transform_9, window_bounds = array<i64: 32, 96>}, {pipeline_mode = #tpu.pipeline_mode<synchronous>, transform_indices = @transform_10, window_bounds = array<i64: 32, 32>}, {pipeline_mode = #tpu.pipeline_mode<synchronous>, transform_indices = @transform_11, window_bounds = array<i64: 32, 32>}, {pipeline_mode = #tpu.pipeline_mode<synchronous>, transform_indices = @transform_12, window_bounds = array<i64: 32, 64>}, {pipeline_mode = #tpu.pipeline_mode<synchronous>, transform_indices = @transform_13, window_bounds = array<i64: 32, 32>}, {pipeline_mode = #tpu.pipeline_mode<synchronous>, transform_indices = @transform_14, window_bounds = array<i64: 32, 64>}, {pipeline_mode = #tpu.pipeline_mode<synchronous>, transform_indices = @transform_15, window_bounds = array<i64: 1, 64>}, {pipeline_mode = #tpu.pipeline_mode<synchronous>, transform_indices = @transform_16, window_bounds = array<i64: 64, 32>}, {pipeline_mode = #tpu.pipeline_mode<synchronous>, transform_indices = @transform_17, window_bounds = array<i64: 1, 32>}, {transform_indices = @transform_18, window_bounds = array<i64: 1, 8, 32>}]} {
    %c0 = arith.constant 0 : index
    %c0_0 = arith.constant 0 : index
    %c0_1 = arith.constant 0 : index
    %0 = vector.load %arg1[%c0, %c0_0, %c0_1] : memref<1x8x32xf32, #tpu.memory_space<vmem>>, vector<1x8x32xf32>
    %1 = vector.shape_cast %0 : vector<1x8x32xf32> to vector<8x32xf32>
    %2 = tpu.iota {dimensions = array<i32: 0>} : vector<8x8xi32>
    %3 = tpu.iota {dimensions = array<i32: 1>} : vector<8x8xi32>
    %4 = arith.cmpi sgt, %3, %2 : vector<8x8xi32>
    %cst = arith.constant -1.000000e+09 : f32
    %cst_2 = arith.constant 0.000000e+00 : f32
    %5 = vector.broadcast %cst : f32 to vector<8x8xf32>
    %6 = vector.broadcast %cst_2 : f32 to vector<8x8xf32>
    %7 = arith.select %4, %5, %6 : vector<8x8xi1>, vector<8x8xf32>
    %8 = vector.shape_cast %7 : vector<8x8xf32> to vector<1x8x8xf32>
    %c0_3 = arith.constant 0 : index
    %c0_4 = arith.constant 0 : index
    %c0_5 = arith.constant 0 : index
    %9 = vector.load %arg3[%c0_3, %c0_4, %c0_5] : memref<1x1x8xf32, #tpu.memory_space<vmem>>, vector<1x1x8xf32>
    %10 = vector.broadcast %9 : vector<1x1x8xf32> to vector<1x8x8xf32>
    %11 = arith.addf %8, %10 : vector<1x8x8xf32>
    %c0_6 = arith.constant 0 : index
    %c0_7 = arith.constant 0 : index
    %12 = vector.load %arg4[%c0_6, %c0_7] : memref<1x32xf32, #tpu.memory_space<vmem>>, vector<1x32xf32>
    %c0_8 = arith.constant 0 : index
    %c0_9 = arith.constant 0 : index
    %13 = vector.load %arg5[%c0_8, %c0_9] : memref<1x32xf32, #tpu.memory_space<vmem>>, vector<1x32xf32>
    %cst_10 = arith.constant dense<0.000000e+00> : vector<8xf32>
    %14 = vector.multi_reduction <add>, %1, %cst_10 [1] : vector<8x32xf32> to vector<8xf32>
    %15 = vector.shape_cast %14 : vector<8xf32> to vector<8x1xf32>
    %cst_11 = arith.constant 3.200000e+01 : f32
    %16 = vector.broadcast %cst_11 : f32 to vector<8x1xf32>
    %17 = arith.divf %15, %16 : vector<8x1xf32>
    %18 = vector.broadcast %17 : vector<8x1xf32> to vector<8x32xf32>
    %19 = arith.subf %1, %18 : vector<8x32xf32>
    %20 = arith.mulf %19, %19 : vector<8x32xf32>
    %cst_12 = arith.constant dense<0.000000e+00> : vector<8xf32>
    %21 = vector.multi_reduction <add>, %20, %cst_12 [1] : vector<8x32xf32> to vector<8xf32>
    %22 = vector.shape_cast %21 : vector<8xf32> to vector<8x1xf32>
    %cst_13 = arith.constant 3.100000e+01 : f32
    %23 = vector.broadcast %cst_13 : f32 to vector<8x1xf32>
    %24 = arith.divf %22, %23 : vector<8x1xf32>
    %25 = math.sqrt %24 : vector<8x1xf32>
    %cst_14 = arith.constant 9.99999997E-7 : f32
    %26 = vector.broadcast %cst_14 : f32 to vector<8x1xf32>
    %27 = arith.addf %25, %26 : vector<8x1xf32>
    %28 = tpu.reciprocal %27 {approx = true} : vector<8x1xf32> -> vector<8x1xf32>
    %29 = vector.broadcast %17 : vector<8x1xf32> to vector<8x32xf32>
    %30 = arith.subf %1, %29 : vector<8x32xf32>
    %31 = vector.broadcast %12 : vector<1x32xf32> to vector<8x32xf32>
    %32 = arith.mulf %31, %30 : vector<8x32xf32>
    %33 = vector.broadcast %28 : vector<8x1xf32> to vector<8x32xf32>
    %34 = arith.mulf %32, %33 : vector<8x32xf32>
    %35 = vector.broadcast %13 : vector<1x32xf32> to vector<8x32xf32>
    %36 = arith.addf %34, %35 : vector<8x32xf32>
    %37 = arith.truncf %36 : vector<8x32xf32> to vector<8x32xbf16>
    %c0_15 = arith.constant 0 : index
    %c0_16 = arith.constant 0 : index
    %38 = vector.load %arg10[%c0_15, %c0_16] : memref<32x96xbf16, #tpu.memory_space<vmem>>, vector<32x96xbf16>
    %cst_17 = arith.constant dense<0.000000e+00> : vector<8x96xf32>
    %39 = tpu.matmul %37, %38, %cst_17 {dimension_numbers = #tpu.dot_dimension_numbers<[1], [0], [0], [1], [0, 0, 1, 1], [], []>} : vector<8x32xbf16>, vector<32x96xbf16>, vector<8x96xf32> -> vector<8x96xf32>
    %40 = vector.extract_strided_slice %39 {offsets = [0, 0], sizes = [8, 32], strides = [1, 1]} : vector<8x96xf32> to vector<8x32xf32>
    %41 = vector.extract_strided_slice %39 {offsets = [0, 32], sizes = [8, 32], strides = [1, 1]} : vector<8x96xf32> to vector<8x32xf32>
    %42 = vector.extract_strided_slice %39 {offsets = [0, 64], sizes = [8, 32], strides = [1, 1]} : vector<8x96xf32> to vector<8x32xf32>
    %43 = vector.shape_cast %40 : vector<8x32xf32> to vector<1x8x32xf32>
    %44 = vector.shape_cast %41 : vector<8x32xf32> to vector<1x8x32xf32>
    %45 = vector.shape_cast %42 : vector<8x32xf32> to vector<1x8x32xf32>
    %46 = vector.extract_strided_slice %43 {offsets = [0, 0, 0], sizes = [1, 8, 8], strides = [1, 1, 1]} : vector<1x8x32xf32> to vector<1x8x8xf32>
    %47 = arith.truncf %46 : vector<1x8x8xf32> to vector<1x8x8xbf16>
    %48 = vector.extract_strided_slice %44 {offsets = [0, 0, 0], sizes = [1, 8, 8], strides = [1, 1, 1]} : vector<1x8x32xf32> to vector<1x8x8xf32>
    %49 = arith.truncf %48 : vector<1x8x8xf32> to vector<1x8x8xbf16>
    %50 = vector.extract_strided_slice %45 {offsets = [0, 0, 0], sizes = [1, 8, 8], strides = [1, 1, 1]} : vector<1x8x32xf32> to vector<1x8x8xf32>
    %51 = arith.truncf %50 : vector<1x8x8xf32> to vector<1x8x8xbf16>
    %52 = vector.shape_cast %47 : vector<1x8x8xbf16> to vector<8x8xbf16>
    %53 = vector.shape_cast %49 : vector<1x8x8xbf16> to vector<8x8xbf16>
    %cst_18 = arith.constant dense<0.000000e+00> : vector<8x8xf32>
    %54 = tpu.matmul %52, %53, %cst_18 {dimension_numbers = #tpu.dot_dimension_numbers<[1], [1], [0], [0], [0, 0, 1, 0], [], []>} : vector<8x8xbf16>, vector<8x8xbf16>, vector<8x8xf32> -> vector<8x8xf32>
    %55 = vector.shape_cast %54 : vector<8x8xf32> to vector<1x8x8xf32>
    %56 = arith.addf %55, %11 : vector<1x8x8xf32>
    %cst_19 = arith.constant dense<0xFF800000> : vector<1x8xf32>
    %57 = vector.multi_reduction <maximumf>, %56, %cst_19 [2] : vector<1x8x8xf32> to vector<1x8xf32>
    %58 = vector.shape_cast %57 : vector<1x8xf32> to vector<1x8x1xf32>
    %59 = vector.broadcast %58 : vector<1x8x1xf32> to vector<1x8x8xf32>
    %60 = arith.subf %56, %59 : vector<1x8x8xf32>
    %61 = math.exp %60 : vector<1x8x8xf32>
    %cst_20 = arith.constant dense<0.000000e+00> : vector<1x8xf32>
    %62 = vector.multi_reduction <add>, %61, %cst_20 [2] : vector<1x8x8xf32> to vector<1x8xf32>
    %63 = vector.shape_cast %62 : vector<1x8xf32> to vector<1x8x1xf32>
    %64 = tpu.reciprocal %63 {approx = true} : vector<1x8x1xf32> -> vector<1x8x1xf32>
    %65 = vector.broadcast %64 : vector<1x8x1xf32> to vector<1x8x8xf32>
    %66 = arith.mulf %61, %65 : vector<1x8x8xf32>
    %67 = arith.truncf %66 : vector<1x8x8xf32> to vector<1x8x8xbf16>
    %68 = vector.shape_cast %67 : vector<1x8x8xbf16> to vector<8x8xbf16>
    %69 = vector.shape_cast %51 : vector<1x8x8xbf16> to vector<8x8xbf16>
    %cst_21 = arith.constant dense<0.000000e+00> : vector<8x8xf32>
    %70 = tpu.matmul %68, %69, %cst_21 {dimension_numbers = #tpu.dot_dimension_numbers<[1], [0], [0], [1], [0, 0, 1, 1], [], []>} : vector<8x8xbf16>, vector<8x8xbf16>, vector<8x8xf32> -> vector<8x8xf32>
    %c0_22 = arith.constant 0 : index
    %c0_23 = arith.constant 0 : index
    %71 = vector.load %arg20[%c0_22, %c0_23] : memref<8x32xf32, #tpu.memory_space<vmem>>, vector<8x8xf32>
    tpu.vector_store %arg20[%c0_22, %c0_23], %70 {strides = array<i32>} : memref<8x32xf32, #tpu.memory_space<vmem>>, vector<8x8xf32>,
    %72 = vector.extract_strided_slice %43 {offsets = [0, 0, 8], sizes = [1, 8, 8], strides = [1, 1, 1]} : vector<1x8x32xf32> to vector<1x8x8xf32>
    %73 = arith.truncf %72 : vector<1x8x8xf32> to vector<1x8x8xbf16>
    %74 = vector.extract_strided_slice %44 {offsets = [0, 0, 8], sizes = [1, 8, 8], strides = [1, 1, 1]} : vector<1x8x32xf32> to vector<1x8x8xf32>
    %75 = arith.truncf %74 : vector<1x8x8xf32> to vector<1x8x8xbf16>
    %76 = vector.extract_strided_slice %45 {offsets = [0, 0, 8], sizes = [1, 8, 8], strides = [1, 1, 1]} : vector<1x8x32xf32> to vector<1x8x8xf32>
    %77 = arith.truncf %76 : vector<1x8x8xf32> to vector<1x8x8xbf16>
    %78 = vector.shape_cast %73 : vector<1x8x8xbf16> to vector<8x8xbf16>
    %79 = vector.shape_cast %75 : vector<1x8x8xbf16> to vector<8x8xbf16>
    %cst_24 = arith.constant dense<0.000000e+00> : vector<8x8xf32>
    %80 = tpu.matmul %78, %79, %cst_24 {dimension_numbers = #tpu.dot_dimension_numbers<[1], [1], [0], [0], [0, 0, 1, 0], [], []>} : vector<8x8xbf16>, vector<8x8xbf16>, vector<8x8xf32> -> vector<8x8xf32>
    %81 = vector.shape_cast %80 : vector<8x8xf32> to vector<1x8x8xf32>
    %82 = arith.addf %81, %11 : vector<1x8x8xf32>
    %cst_25 = arith.constant dense<0xFF800000> : vector<1x8xf32>
    %83 = vector.multi_reduction <maximumf>, %82, %cst_25 [2] : vector<1x8x8xf32> to vector<1x8xf32>
    %84 = vector.shape_cast %83 : vector<1x8xf32> to vector<1x8x1xf32>
    %85 = vector.broadcast %84 : vector<1x8x1xf32> to vector<1x8x8xf32>
    %86 = arith.subf %82, %85 : vector<1x8x8xf32>
    %87 = math.exp %86 : vector<1x8x8xf32>
    %cst_26 = arith.constant dense<0.000000e+00> : vector<1x8xf32>
    %88 = vector.multi_reduction <add>, %87, %cst_26 [2] : vector<1x8x8xf32> to vector<1x8xf32>
    %89 = vector.shape_cast %88 : vector<1x8xf32> to vector<1x8x1xf32>
    %90 = tpu.reciprocal %89 {approx = true} : vector<1x8x1xf32> -> vector<1x8x1xf32>
    %91 = vector.broadcast %90 : vector<1x8x1xf32> to vector<1x8x8xf32>
    %92 = arith.mulf %87, %91 : vector<1x8x8xf32>
    %93 = arith.truncf %92 : vector<1x8x8xf32> to vector<1x8x8xbf16>
    %94 = vector.shape_cast %93 : vector<1x8x8xbf16> to vector<8x8xbf16>
    %95 = vector.shape_cast %77 : vector<1x8x8xbf16> to vector<8x8xbf16>
    %cst_27 = arith.constant dense<0.000000e+00> : vector<8x8xf32>
    %96 = tpu.matmul %94, %95, %cst_27 {dimension_numbers = #tpu.dot_dimension_numbers<[1], [0], [0], [1], [0, 0, 1, 1], [], []>} : vector<8x8xbf16>, vector<8x8xbf16>, vector<8x8xf32> -> vector<8x8xf32>
    %c0_28 = arith.constant 0 : index
    %c8 = arith.constant 8 : index
    %97 = vector.load %arg20[%c0_28, %c8] : memref<8x32xf32, #tpu.memory_space<vmem>>, vector<8x8xf32>
    tpu.vector_store %arg20[%c0_28, %c8], %96 {strides = array<i32>} : memref<8x32xf32, #tpu.memory_space<vmem>>, vector<8x8xf32>,
    %98 = vector.extract_strided_slice %43 {offsets = [0, 0, 16], sizes = [1, 8, 8], strides = [1, 1, 1]} : vector<1x8x32xf32> to vector<1x8x8xf32>
    %99 = arith.truncf %98 : vector<1x8x8xf32> to vector<1x8x8xbf16>
    %100 = vector.extract_strided_slice %44 {offsets = [0, 0, 16], sizes = [1, 8, 8], strides = [1, 1, 1]} : vector<1x8x32xf32> to vector<1x8x8xf32>
    %101 = arith.truncf %100 : vector<1x8x8xf32> to vector<1x8x8xbf16>
    %102 = vector.extract_strided_slice %45 {offsets = [0, 0, 16], sizes = [1, 8, 8], strides = [1, 1, 1]} : vector<1x8x32xf32> to vector<1x8x8xf32>
    %103 = arith.truncf %102 : vector<1x8x8xf32> to vector<1x8x8xbf16>
    %104 = vector.shape_cast %99 : vector<1x8x8xbf16> to vector<8x8xbf16>
    %105 = vector.shape_cast %101 : vector<1x8x8xbf16> to vector<8x8xbf16>
    %cst_29 = arith.constant dense<0.000000e+00> : vector<8x8xf32>
    %106 = tpu.matmul %104, %105, %cst_29 {dimension_numbers = #tpu.dot_dimension_numbers<[1], [1], [0], [0], [0, 0, 1, 0], [], []>} : vector<8x8xbf16>, vector<8x8xbf16>, vector<8x8xf32> -> vector<8x8xf32>
    %107 = vector.shape_cast %106 : vector<8x8xf32> to vector<1x8x8xf32>
    %108 = arith.addf %107, %11 : vector<1x8x8xf32>
    %cst_30 = arith.constant dense<0xFF800000> : vector<1x8xf32>
    %109 = vector.multi_reduction <maximumf>, %108, %cst_30 [2] : vector<1x8x8xf32> to vector<1x8xf32>
    %110 = vector.shape_cast %109 : vector<1x8xf32> to vector<1x8x1xf32>
    %111 = vector.broadcast %110 : vector<1x8x1xf32> to vector<1x8x8xf32>
    %112 = arith.subf %108, %111 : vector<1x8x8xf32>
    %113 = math.exp %112 : vector<1x8x8xf32>
    %cst_31 = arith.constant dense<0.000000e+00> : vector<1x8xf32>
    %114 = vector.multi_reduction <add>, %113, %cst_31 [2] : vector<1x8x8xf32> to vector<1x8xf32>
    %115 = vector.shape_cast %114 : vector<1x8xf32> to vector<1x8x1xf32>
    %116 = tpu.reciprocal %115 {approx = true} : vector<1x8x1xf32> -> vector<1x8x1xf32>
    %117 = vector.broadcast %116 : vector<1x8x1xf32> to vector<1x8x8xf32>
    %118 = arith.mulf %113, %117 : vector<1x8x8xf32>
    %119 = arith.truncf %118 : vector<1x8x8xf32> to vector<1x8x8xbf16>
    %120 = vector.shape_cast %119 : vector<1x8x8xbf16> to vector<8x8xbf16>
    %121 = vector.shape_cast %103 : vector<1x8x8xbf16> to vector<8x8xbf16>
    %cst_32 = arith.constant dense<0.000000e+00> : vector<8x8xf32>
    %122 = tpu.matmul %120, %121, %cst_32 {dimension_numbers = #tpu.dot_dimension_numbers<[1], [0], [0], [1], [0, 0, 1, 1], [], []>} : vector<8x8xbf16>, vector<8x8xbf16>, vector<8x8xf32> -> vector<8x8xf32>
    %c0_33 = arith.constant 0 : index
    %c16 = arith.constant 16 : index
    %123 = vector.load %arg20[%c0_33, %c16] : memref<8x32xf32, #tpu.memory_space<vmem>>, vector<8x8xf32>
    tpu.vector_store %arg20[%c0_33, %c16], %122 {strides = array<i32>} : memref<8x32xf32, #tpu.memory_space<vmem>>, vector<8x8xf32>,
    %124 = vector.extract_strided_slice %43 {offsets = [0, 0, 24], sizes = [1, 8, 8], strides = [1, 1, 1]} : vector<1x8x32xf32> to vector<1x8x8xf32>
    %125 = arith.truncf %124 : vector<1x8x8xf32> to vector<1x8x8xbf16>
    %126 = vector.extract_strided_slice %44 {offsets = [0, 0, 24], sizes = [1, 8, 8], strides = [1, 1, 1]} : vector<1x8x32xf32> to vector<1x8x8xf32>
    %127 = arith.truncf %126 : vector<1x8x8xf32> to vector<1x8x8xbf16>
    %128 = vector.extract_strided_slice %45 {offsets = [0, 0, 24], sizes = [1, 8, 8], strides = [1, 1, 1]} : vector<1x8x32xf32> to vector<1x8x8xf32>
    %129 = arith.truncf %128 : vector<1x8x8xf32> to vector<1x8x8xbf16>
    %130 = vector.shape_cast %125 : vector<1x8x8xbf16> to vector<8x8xbf16>
    %131 = vector.shape_cast %127 : vector<1x8x8xbf16> to vector<8x8xbf16>
    %cst_34 = arith.constant dense<0.000000e+00> : vector<8x8xf32>
    %132 = tpu.matmul %130, %131, %cst_34 {dimension_numbers = #tpu.dot_dimension_numbers<[1], [1], [0], [0], [0, 0, 1, 0], [], []>} : vector<8x8xbf16>, vector<8x8xbf16>, vector<8x8xf32> -> vector<8x8xf32>
    %133 = vector.shape_cast %132 : vector<8x8xf32> to vector<1x8x8xf32>
    %134 = arith.addf %133, %11 : vector<1x8x8xf32>
    %cst_35 = arith.constant dense<0xFF800000> : vector<1x8xf32>
    %135 = vector.multi_reduction <maximumf>, %134, %cst_35 [2] : vector<1x8x8xf32> to vector<1x8xf32>
    %136 = vector.shape_cast %135 : vector<1x8xf32> to vector<1x8x1xf32>
    %137 = vector.broadcast %136 : vector<1x8x1xf32> to vector<1x8x8xf32>
    %138 = arith.subf %134, %137 : vector<1x8x8xf32>
    %139 = math.exp %138 : vector<1x8x8xf32>
    %cst_36 = arith.constant dense<0.000000e+00> : vector<1x8xf32>
    %140 = vector.multi_reduction <add>, %139, %cst_36 [2] : vector<1x8x8xf32> to vector<1x8xf32>
    %141 = vector.shape_cast %140 : vector<1x8xf32> to vector<1x8x1xf32>
    %142 = tpu.reciprocal %141 {approx = true} : vector<1x8x1xf32> -> vector<1x8x1xf32>
    %143 = vector.broadcast %142 : vector<1x8x1xf32> to vector<1x8x8xf32>
    %144 = arith.mulf %139, %143 : vector<1x8x8xf32>
    %145 = arith.truncf %144 : vector<1x8x8xf32> to vector<1x8x8xbf16>
    %146 = vector.shape_cast %145 : vector<1x8x8xbf16> to vector<8x8xbf16>
    %147 = vector.shape_cast %129 : vector<1x8x8xbf16> to vector<8x8xbf16>
    %cst_37 = arith.constant dense<0.000000e+00> : vector<8x8xf32>
    %148 = tpu.matmul %146, %147, %cst_37 {dimension_numbers = #tpu.dot_dimension_numbers<[1], [0], [0], [1], [0, 0, 1, 1], [], []>} : vector<8x8xbf16>, vector<8x8xbf16>, vector<8x8xf32> -> vector<8x8xf32>
    %c0_38 = arith.constant 0 : index
    %c24 = arith.constant 24 : index
    %149 = vector.load %arg20[%c0_38, %c24] : memref<8x32xf32, #tpu.memory_space<vmem>>, vector<8x8xf32>
    tpu.vector_store %arg20[%c0_38, %c24], %148 {strides = array<i32>} : memref<8x32xf32, #tpu.memory_space<vmem>>, vector<8x8xf32>,
    %c0_39 = arith.constant 0 : index
    %c0_40 = arith.constant 0 : index
    %150 = vector.load %arg20[%c0_39, %c0_40] : memref<8x32xf32, #tpu.memory_space<vmem>>, vector<8x32xf32>
    %151 = arith.truncf %150 : vector<8x32xf32> to vector<8x32xbf16>
    %c0_41 = arith.constant 0 : index
    %c0_42 = arith.constant 0 : index
    %152 = vector.load %arg11[%c0_41, %c0_42] : memref<32x32xbf16, #tpu.memory_space<vmem>>, vector<32x32xbf16>
    %cst_43 = arith.constant dense<0.000000e+00> : vector<8x32xf32>
    %153 = tpu.matmul %151, %152, %cst_43 {dimension_numbers = #tpu.dot_dimension_numbers<[1], [0], [0], [1], [0, 0, 1, 1], [], []>} : vector<8x32xbf16>, vector<32x32xbf16>, vector<8x32xf32> -> vector<8x32xf32>
    %154 = arith.addf %1, %153 : vector<8x32xf32>
    %c0_44 = arith.constant 0 : index
    %c0_45 = arith.constant 0 : index
    %155 = vector.load %arg6[%c0_44, %c0_45] : memref<1x32xf32, #tpu.memory_space<vmem>>, vector<1x32xf32>
    %c0_46 = arith.constant 0 : index
    %c0_47 = arith.constant 0 : index
    %156 = vector.load %arg7[%c0_46, %c0_47] : memref<1x32xf32, #tpu.memory_space<vmem>>, vector<1x32xf32>
    %cst_48 = arith.constant dense<0.000000e+00> : vector<8xf32>
    %157 = vector.multi_reduction <add>, %154, %cst_48 [1] : vector<8x32xf32> to vector<8xf32>
    %158 = vector.shape_cast %157 : vector<8xf32> to vector<8x1xf32>
    %cst_49 = arith.constant 3.200000e+01 : f32
    %159 = vector.broadcast %cst_49 : f32 to vector<8x1xf32>
    %160 = arith.divf %158, %159 : vector<8x1xf32>
    %161 = vector.broadcast %160 : vector<8x1xf32> to vector<8x32xf32>
    %162 = arith.subf %154, %161 : vector<8x32xf32>
    %163 = arith.mulf %162, %162 : vector<8x32xf32>
    %cst_50 = arith.constant dense<0.000000e+00> : vector<8xf32>
    %164 = vector.multi_reduction <add>, %163, %cst_50 [1] : vector<8x32xf32> to vector<8xf32>
    %165 = vector.shape_cast %164 : vector<8xf32> to vector<8x1xf32>
    %cst_51 = arith.constant 3.100000e+01 : f32
    %166 = vector.broadcast %cst_51 : f32 to vector<8x1xf32>
    %167 = arith.divf %165, %166 : vector<8x1xf32>
    %168 = math.sqrt %167 : vector<8x1xf32>
    %cst_52 = arith.constant 9.99999997E-7 : f32
    %169 = vector.broadcast %cst_52 : f32 to vector<8x1xf32>
    %170 = arith.addf %168, %169 : vector<8x1xf32>
    %171 = tpu.reciprocal %170 {approx = true} : vector<8x1xf32> -> vector<8x1xf32>
    %172 = vector.broadcast %160 : vector<8x1xf32> to vector<8x32xf32>
    %173 = arith.subf %154, %172 : vector<8x32xf32>
    %174 = vector.broadcast %155 : vector<1x32xf32> to vector<8x32xf32>
    %175 = arith.mulf %174, %173 : vector<8x32xf32>
    %176 = vector.broadcast %171 : vector<8x1xf32> to vector<8x32xf32>
    %177 = arith.mulf %175, %176 : vector<8x32xf32>
    %178 = vector.broadcast %156 : vector<1x32xf32> to vector<8x32xf32>
    %179 = arith.addf %177, %178 : vector<8x32xf32>
    %180 = arith.truncf %179 : vector<8x32xf32> to vector<8x32xbf16>
    %c0_53 = arith.constant 0 : index
    %c0_54 = arith.constant 0 : index
    %181 = vector.load %arg12[%c0_53, %c0_54] : memref<32x32xbf16, #tpu.memory_space<vmem>>, vector<32x32xbf16>
    %cst_55 = arith.constant dense<0.000000e+00> : vector<8x32xf32>
    %182 = tpu.matmul %180, %181, %cst_55 {dimension_numbers = #tpu.dot_dimension_numbers<[1], [0], [0], [1], [0, 0, 1, 1], [], []>} : vector<8x32xbf16>, vector<32x32xbf16>, vector<8x32xf32> -> vector<8x32xf32>
    %c0_56 = arith.constant 0 : index
    %c0_57 = arith.constant 0 : index
    %c0_58 = arith.constant 0 : index
    %183 = vector.load %arg2[%c0_56, %c0_57, %c0_58] : memref<1x10x32xf32, #tpu.memory_space<vmem>>, vector<1x10x32xf32>
    %184 = vector.shape_cast %183 : vector<1x10x32xf32> to vector<10x32xf32>
    %185 = arith.truncf %184 : vector<10x32xf32> to vector<10x32xbf16>
    %c0_59 = arith.constant 0 : index
    %c0_60 = arith.constant 0 : index
    %186 = vector.load %arg13[%c0_59, %c0_60] : memref<32x64xbf16, #tpu.memory_space<vmem>>, vector<32x64xbf16>
    %cst_61 = arith.constant dense<0.000000e+00> : vector<10x64xf32>
    %187 = tpu.matmul %185, %186, %cst_61 {dimension_numbers = #tpu.dot_dimension_numbers<[1], [0], [0], [1], [0, 0, 1, 1], [], []>} : vector<10x32xbf16>, vector<32x64xbf16>, vector<10x64xf32> -> vector<10x64xf32>
    %188 = vector.extract_strided_slice %187 {offsets = [0, 0], sizes = [10, 32], strides = [1, 1]} : vector<10x64xf32> to vector<10x32xf32>
    %189 = vector.extract_strided_slice %187 {offsets = [0, 32], sizes = [10, 32], strides = [1, 1]} : vector<10x64xf32> to vector<10x32xf32>
    %190 = vector.shape_cast %182 : vector<8x32xf32> to vector<1x8x32xf32>
    %191 = vector.shape_cast %188 : vector<10x32xf32> to vector<1x10x32xf32>
    %192 = vector.shape_cast %189 : vector<10x32xf32> to vector<1x10x32xf32>
    %193 = vector.extract_strided_slice %190 {offsets = [0, 0, 0], sizes = [1, 8, 8], strides = [1, 1, 1]} : vector<1x8x32xf32> to vector<1x8x8xf32>
    %194 = arith.truncf %193 : vector<1x8x8xf32> to vector<1x8x8xbf16>
    %195 = vector.extract_strided_slice %191 {offsets = [0, 0, 0], sizes = [1, 10, 8], strides = [1, 1, 1]} : vector<1x10x32xf32> to vector<1x10x8xf32>
    %196 = arith.truncf %195 : vector<1x10x8xf32> to vector<1x10x8xbf16>
    %197 = vector.extract_strided_slice %192 {offsets = [0, 0, 0], sizes = [1, 10, 8], strides = [1, 1, 1]} : vector<1x10x32xf32> to vector<1x10x8xf32>
    %198 = arith.truncf %197 : vector<1x10x8xf32> to vector<1x10x8xbf16>
    %199 = vector.shape_cast %194 : vector<1x8x8xbf16> to vector<8x8xbf16>
    %200 = vector.shape_cast %196 : vector<1x10x8xbf16> to vector<10x8xbf16>
    %cst_62 = arith.constant dense<0.000000e+00> : vector<8x10xf32>
    %201 = tpu.matmul %199, %200, %cst_62 {dimension_numbers = #tpu.dot_dimension_numbers<[1], [1], [0], [0], [0, 0, 1, 0], [], []>} : vector<8x8xbf16>, vector<10x8xbf16>, vector<8x10xf32> -> vector<8x10xf32>
    %202 = vector.shape_cast %201 : vector<8x10xf32> to vector<1x8x10xf32>
    %cst_63 = arith.constant dense<0xFF800000> : vector<1x8xf32>
    %203 = vector.multi_reduction <maximumf>, %202, %cst_63 [2] : vector<1x8x10xf32> to vector<1x8xf32>
    %204 = vector.shape_cast %203 : vector<1x8xf32> to vector<1x8x1xf32>
    %205 = vector.broadcast %204 : vector<1x8x1xf32> to vector<1x8x10xf32>
    %206 = arith.subf %202, %205 : vector<1x8x10xf32>
    %207 = math.exp %206 : vector<1x8x10xf32>
    %cst_64 = arith.constant dense<0.000000e+00> : vector<1x8xf32>
    %208 = vector.multi_reduction <add>, %207, %cst_64 [2] : vector<1x8x10xf32> to vector<1x8xf32>
    %209 = vector.shape_cast %208 : vector<1x8xf32> to vector<1x8x1xf32>
    %210 = tpu.reciprocal %209 {approx = true} : vector<1x8x1xf32> -> vector<1x8x1xf32>
    %211 = vector.broadcast %210 : vector<1x8x1xf32> to vector<1x8x10xf32>
    %212 = arith.mulf %207, %211 : vector<1x8x10xf32>
    %213 = arith.truncf %212 : vector<1x8x10xf32> to vector<1x8x10xbf16>
    %214 = vector.shape_cast %213 : vector<1x8x10xbf16> to vector<8x10xbf16>
    %215 = vector.shape_cast %198 : vector<1x10x8xbf16> to vector<10x8xbf16>
    %cst_65 = arith.constant dense<0.000000e+00> : vector<8x8xf32>
    %216 = tpu.matmul %214, %215, %cst_65 {dimension_numbers = #tpu.dot_dimension_numbers<[1], [0], [0], [1], [0, 0, 1, 1], [], []>} : vector<8x10xbf16>, vector<10x8xbf16>, vector<8x8xf32> -> vector<8x8xf32>
    %c0_66 = arith.constant 0 : index
    %c0_67 = arith.constant 0 : index
    %217 = vector.load %arg20[%c0_66, %c0_67] : memref<8x32xf32, #tpu.memory_space<vmem>>, vector<8x8xf32>
    tpu.vector_store %arg20[%c0_66, %c0_67], %216 {strides = array<i32>} : memref<8x32xf32, #tpu.memory_space<vmem>>, vector<8x8xf32>,
    %218 = vector.extract_strided_slice %190 {offsets = [0, 0, 8], sizes = [1, 8, 8], strides = [1, 1, 1]} : vector<1x8x32xf32> to vector<1x8x8xf32>
    %219 = arith.truncf %218 : vector<1x8x8xf32> to vector<1x8x8xbf16>
    %220 = vector.extract_strided_slice %191 {offsets = [0, 0, 8], sizes = [1, 10, 8], strides = [1, 1, 1]} : vector<1x10x32xf32> to vector<1x10x8xf32>
    %221 = arith.truncf %220 : vector<1x10x8xf32> to vector<1x10x8xbf16>
    %222 = vector.extract_strided_slice %192 {offsets = [0, 0, 8], sizes = [1, 10, 8], strides = [1, 1, 1]} : vector<1x10x32xf32> to vector<1x10x8xf32>
    %223 = arith.truncf %222 : vector<1x10x8xf32> to vector<1x10x8xbf16>
    %224 = vector.shape_cast %219 : vector<1x8x8xbf16> to vector<8x8xbf16>
    %225 = vector.shape_cast %221 : vector<1x10x8xbf16> to vector<10x8xbf16>
    %cst_68 = arith.constant dense<0.000000e+00> : vector<8x10xf32>
    %226 = tpu.matmul %224, %225, %cst_68 {dimension_numbers = #tpu.dot_dimension_numbers<[1], [1], [0], [0], [0, 0, 1, 0], [], []>} : vector<8x8xbf16>, vector<10x8xbf16>, vector<8x10xf32> -> vector<8x10xf32>
    %227 = vector.shape_cast %226 : vector<8x10xf32> to vector<1x8x10xf32>
    %cst_69 = arith.constant dense<0xFF800000> : vector<1x8xf32>
    %228 = vector.multi_reduction <maximumf>, %227, %cst_69 [2] : vector<1x8x10xf32> to vector<1x8xf32>
    %229 = vector.shape_cast %228 : vector<1x8xf32> to vector<1x8x1xf32>
    %230 = vector.broadcast %229 : vector<1x8x1xf32> to vector<1x8x10xf32>
    %231 = arith.subf %227, %230 : vector<1x8x10xf32>
    %232 = math.exp %231 : vector<1x8x10xf32>
    %cst_70 = arith.constant dense<0.000000e+00> : vector<1x8xf32>
    %233 = vector.multi_reduction <add>, %232, %cst_70 [2] : vector<1x8x10xf32> to vector<1x8xf32>
    %234 = vector.shape_cast %233 : vector<1x8xf32> to vector<1x8x1xf32>
    %235 = tpu.reciprocal %234 {approx = true} : vector<1x8x1xf32> -> vector<1x8x1xf32>
    %236 = vector.broadcast %235 : vector<1x8x1xf32> to vector<1x8x10xf32>
    %237 = arith.mulf %232, %236 : vector<1x8x10xf32>
    %238 = arith.truncf %237 : vector<1x8x10xf32> to vector<1x8x10xbf16>
    %239 = vector.shape_cast %238 : vector<1x8x10xbf16> to vector<8x10xbf16>
    %240 = vector.shape_cast %223 : vector<1x10x8xbf16> to vector<10x8xbf16>
    %cst_71 = arith.constant dense<0.000000e+00> : vector<8x8xf32>
    %241 = tpu.matmul %239, %240, %cst_71 {dimension_numbers = #tpu.dot_dimension_numbers<[1], [0], [0], [1], [0, 0, 1, 1], [], []>} : vector<8x10xbf16>, vector<10x8xbf16>, vector<8x8xf32> -> vector<8x8xf32>
    %c0_72 = arith.constant 0 : index
    %c8_73 = arith.constant 8 : index
    %242 = vector.load %arg20[%c0_72, %c8_73] : memref<8x32xf32, #tpu.memory_space<vmem>>, vector<8x8xf32>
    tpu.vector_store %arg20[%c0_72, %c8_73], %241 {strides = array<i32>} : memref<8x32xf32, #tpu.memory_space<vmem>>, vector<8x8xf32>,
    %243 = vector.extract_strided_slice %190 {offsets = [0, 0, 16], sizes = [1, 8, 8], strides = [1, 1, 1]} : vector<1x8x32xf32> to vector<1x8x8xf32>
    %244 = arith.truncf %243 : vector<1x8x8xf32> to vector<1x8x8xbf16>
    %245 = vector.extract_strided_slice %191 {offsets = [0, 0, 16], sizes = [1, 10, 8], strides = [1, 1, 1]} : vector<1x10x32xf32> to vector<1x10x8xf32>
    %246 = arith.truncf %245 : vector<1x10x8xf32> to vector<1x10x8xbf16>
    %247 = vector.extract_strided_slice %192 {offsets = [0, 0, 16], sizes = [1, 10, 8], strides = [1, 1, 1]} : vector<1x10x32xf32> to vector<1x10x8xf32>
    %248 = arith.truncf %247 : vector<1x10x8xf32> to vector<1x10x8xbf16>
    %249 = vector.shape_cast %244 : vector<1x8x8xbf16> to vector<8x8xbf16>
    %250 = vector.shape_cast %246 : vector<1x10x8xbf16> to vector<10x8xbf16>
    %cst_74 = arith.constant dense<0.000000e+00> : vector<8x10xf32>
    %251 = tpu.matmul %249, %250, %cst_74 {dimension_numbers = #tpu.dot_dimension_numbers<[1], [1], [0], [0], [0, 0, 1, 0], [], []>} : vector<8x8xbf16>, vector<10x8xbf16>, vector<8x10xf32> -> vector<8x10xf32>
    %252 = vector.shape_cast %251 : vector<8x10xf32> to vector<1x8x10xf32>
    %cst_75 = arith.constant dense<0xFF800000> : vector<1x8xf32>
    %253 = vector.multi_reduction <maximumf>, %252, %cst_75 [2] : vector<1x8x10xf32> to vector<1x8xf32>
    %254 = vector.shape_cast %253 : vector<1x8xf32> to vector<1x8x1xf32>
    %255 = vector.broadcast %254 : vector<1x8x1xf32> to vector<1x8x10xf32>
    %256 = arith.subf %252, %255 : vector<1x8x10xf32>
    %257 = math.exp %256 : vector<1x8x10xf32>
    %cst_76 = arith.constant dense<0.000000e+00> : vector<1x8xf32>
    %258 = vector.multi_reduction <add>, %257, %cst_76 [2] : vector<1x8x10xf32> to vector<1x8xf32>
    %259 = vector.shape_cast %258 : vector<1x8xf32> to vector<1x8x1xf32>
    %260 = tpu.reciprocal %259 {approx = true} : vector<1x8x1xf32> -> vector<1x8x1xf32>
    %261 = vector.broadcast %260 : vector<1x8x1xf32> to vector<1x8x10xf32>
    %262 = arith.mulf %257, %261 : vector<1x8x10xf32>
    %263 = arith.truncf %262 : vector<1x8x10xf32> to vector<1x8x10xbf16>
    %264 = vector.shape_cast %263 : vector<1x8x10xbf16> to vector<8x10xbf16>
    %265 = vector.shape_cast %248 : vector<1x10x8xbf16> to vector<10x8xbf16>
    %cst_77 = arith.constant dense<0.000000e+00> : vector<8x8xf32>
    %266 = tpu.matmul %264, %265, %cst_77 {dimension_numbers = #tpu.dot_dimension_numbers<[1], [0], [0], [1], [0, 0, 1, 1], [], []>} : vector<8x10xbf16>, vector<10x8xbf16>, vector<8x8xf32> -> vector<8x8xf32>
    %c0_78 = arith.constant 0 : index
    %c16_79 = arith.constant 16 : index
    %267 = vector.load %arg20[%c0_78, %c16_79] : memref<8x32xf32, #tpu.memory_space<vmem>>, vector<8x8xf32>
    tpu.vector_store %arg20[%c0_78, %c16_79], %266 {strides = array<i32>} : memref<8x32xf32, #tpu.memory_space<vmem>>, vector<8x8xf32>,
    %268 = vector.extract_strided_slice %190 {offsets = [0, 0, 24], sizes = [1, 8, 8], strides = [1, 1, 1]} : vector<1x8x32xf32> to vector<1x8x8xf32>
    %269 = arith.truncf %268 : vector<1x8x8xf32> to vector<1x8x8xbf16>
    %270 = vector.extract_strided_slice %191 {offsets = [0, 0, 24], sizes = [1, 10, 8], strides = [1, 1, 1]} : vector<1x10x32xf32> to vector<1x10x8xf32>
    %271 = arith.truncf %270 : vector<1x10x8xf32> to vector<1x10x8xbf16>
    %272 = vector.extract_strided_slice %192 {offsets = [0, 0, 24], sizes = [1, 10, 8], strides = [1, 1, 1]} : vector<1x10x32xf32> to vector<1x10x8xf32>
    %273 = arith.truncf %272 : vector<1x10x8xf32> to vector<1x10x8xbf16>
    %274 = vector.shape_cast %269 : vector<1x8x8xbf16> to vector<8x8xbf16>
    %275 = vector.shape_cast %271 : vector<1x10x8xbf16> to vector<10x8xbf16>
    %cst_80 = arith.constant dense<0.000000e+00> : vector<8x10xf32>
    %276 = tpu.matmul %274, %275, %cst_80 {dimension_numbers = #tpu.dot_dimension_numbers<[1], [1], [0], [0], [0, 0, 1, 0], [], []>} : vector<8x8xbf16>, vector<10x8xbf16>, vector<8x10xf32> -> vector<8x10xf32>
    %277 = vector.shape_cast %276 : vector<8x10xf32> to vector<1x8x10xf32>
    %cst_81 = arith.constant dense<0xFF800000> : vector<1x8xf32>
    %278 = vector.multi_reduction <maximumf>, %277, %cst_81 [2] : vector<1x8x10xf32> to vector<1x8xf32>
    %279 = vector.shape_cast %278 : vector<1x8xf32> to vector<1x8x1xf32>
    %280 = vector.broadcast %279 : vector<1x8x1xf32> to vector<1x8x10xf32>
    %281 = arith.subf %277, %280 : vector<1x8x10xf32>
    %282 = math.exp %281 : vector<1x8x10xf32>
    %cst_82 = arith.constant dense<0.000000e+00> : vector<1x8xf32>
    %283 = vector.multi_reduction <add>, %282, %cst_82 [2] : vector<1x8x10xf32> to vector<1x8xf32>
    %284 = vector.shape_cast %283 : vector<1x8xf32> to vector<1x8x1xf32>
    %285 = tpu.reciprocal %284 {approx = true} : vector<1x8x1xf32> -> vector<1x8x1xf32>
    %286 = vector.broadcast %285 : vector<1x8x1xf32> to vector<1x8x10xf32>
    %287 = arith.mulf %282, %286 : vector<1x8x10xf32>
    %288 = arith.truncf %287 : vector<1x8x10xf32> to vector<1x8x10xbf16>
    %289 = vector.shape_cast %288 : vector<1x8x10xbf16> to vector<8x10xbf16>
    %290 = vector.shape_cast %273 : vector<1x10x8xbf16> to vector<10x8xbf16>
    %cst_83 = arith.constant dense<0.000000e+00> : vector<8x8xf32>
    %291 = tpu.matmul %289, %290, %cst_83 {dimension_numbers = #tpu.dot_dimension_numbers<[1], [0], [0], [1], [0, 0, 1, 1], [], []>} : vector<8x10xbf16>, vector<10x8xbf16>, vector<8x8xf32> -> vector<8x8xf32>
    %c0_84 = arith.constant 0 : index
    %c24_85 = arith.constant 24 : index
    %292 = vector.load %arg20[%c0_84, %c24_85] : memref<8x32xf32, #tpu.memory_space<vmem>>, vector<8x8xf32>
    tpu.vector_store %arg20[%c0_84, %c24_85], %291 {strides = array<i32>} : memref<8x32xf32, #tpu.memory_space<vmem>>, vector<8x8xf32>,
    %c0_86 = arith.constant 0 : index
    %c0_87 = arith.constant 0 : index
    %293 = vector.load %arg20[%c0_86, %c0_87] : memref<8x32xf32, #tpu.memory_space<vmem>>, vector<8x32xf32>
    %294 = arith.truncf %293 : vector<8x32xf32> to vector<8x32xbf16>
    %c0_88 = arith.constant 0 : index
    %c0_89 = arith.constant 0 : index
    %295 = vector.load %arg14[%c0_88, %c0_89] : memref<32x32xbf16, #tpu.memory_space<vmem>>, vector<32x32xbf16>
    %cst_90 = arith.constant dense<0.000000e+00> : vector<8x32xf32>
    %296 = tpu.matmul %294, %295, %cst_90 {dimension_numbers = #tpu.dot_dimension_numbers<[1], [0], [0], [1], [0, 0, 1, 1], [], []>} : vector<8x32xbf16>, vector<32x32xbf16>, vector<8x32xf32> -> vector<8x32xf32>
    %297 = arith.addf %154, %296 : vector<8x32xf32>
    %c0_91 = arith.constant 0 : index
    %c0_92 = arith.constant 0 : index
    %298 = vector.load %arg8[%c0_91, %c0_92] : memref<1x32xf32, #tpu.memory_space<vmem>>, vector<1x32xf32>
    %c0_93 = arith.constant 0 : index
    %c0_94 = arith.constant 0 : index
    %299 = vector.load %arg9[%c0_93, %c0_94] : memref<1x32xf32, #tpu.memory_space<vmem>>, vector<1x32xf32>
    %cst_95 = arith.constant dense<0.000000e+00> : vector<8xf32>
    %300 = vector.multi_reduction <add>, %297, %cst_95 [1] : vector<8x32xf32> to vector<8xf32>
    %301 = vector.shape_cast %300 : vector<8xf32> to vector<8x1xf32>
    %cst_96 = arith.constant 3.200000e+01 : f32
    %302 = vector.broadcast %cst_96 : f32 to vector<8x1xf32>
    %303 = arith.divf %301, %302 : vector<8x1xf32>
    %304 = vector.broadcast %303 : vector<8x1xf32> to vector<8x32xf32>
    %305 = arith.subf %297, %304 : vector<8x32xf32>
    %306 = arith.mulf %305, %305 : vector<8x32xf32>
    %cst_97 = arith.constant dense<0.000000e+00> : vector<8xf32>
    %307 = vector.multi_reduction <add>, %306, %cst_97 [1] : vector<8x32xf32> to vector<8xf32>
    %308 = vector.shape_cast %307 : vector<8xf32> to vector<8x1xf32>
    %cst_98 = arith.constant 3.100000e+01 : f32
    %309 = vector.broadcast %cst_98 : f32 to vector<8x1xf32>
    %310 = arith.divf %308, %309 : vector<8x1xf32>
    %311 = math.sqrt %310 : vector<8x1xf32>
    %cst_99 = arith.constant 9.99999997E-7 : f32
    %312 = vector.broadcast %cst_99 : f32 to vector<8x1xf32>
    %313 = arith.addf %311, %312 : vector<8x1xf32>
    %314 = tpu.reciprocal %313 {approx = true} : vector<8x1xf32> -> vector<8x1xf32>
    %315 = vector.broadcast %303 : vector<8x1xf32> to vector<8x32xf32>
    %316 = arith.subf %297, %315 : vector<8x32xf32>
    %317 = vector.broadcast %298 : vector<1x32xf32> to vector<8x32xf32>
    %318 = arith.mulf %317, %316 : vector<8x32xf32>
    %319 = vector.broadcast %314 : vector<8x1xf32> to vector<8x32xf32>
    %320 = arith.mulf %318, %319 : vector<8x32xf32>
    %321 = vector.broadcast %299 : vector<1x32xf32> to vector<8x32xf32>
    %322 = arith.addf %320, %321 : vector<8x32xf32>
    %323 = arith.truncf %322 : vector<8x32xf32> to vector<8x32xbf16>
    %c0_100 = arith.constant 0 : index
    %c0_101 = arith.constant 0 : index
    %324 = vector.load %arg15[%c0_100, %c0_101] : memref<32x64xbf16, #tpu.memory_space<vmem>>, vector<32x64xbf16>
    %cst_102 = arith.constant dense<0.000000e+00> : vector<8x64xf32>
    %325 = tpu.matmul %323, %324, %cst_102 {dimension_numbers = #tpu.dot_dimension_numbers<[1], [0], [0], [1], [0, 0, 1, 1], [], []>} : vector<8x32xbf16>, vector<32x64xbf16>, vector<8x64xf32> -> vector<8x64xf32>
    %c0_103 = arith.constant 0 : index
    %c0_104 = arith.constant 0 : index
    %326 = vector.load %arg16[%c0_103, %c0_104] : memref<1x64xf32, #tpu.memory_space<vmem>>, vector<1x64xf32>
    %327 = vector.broadcast %326 : vector<1x64xf32> to vector<8x64xf32>
    %328 = arith.addf %325, %327 : vector<8x64xf32>
    %cst_105 = arith.constant 0.000000e+00 : f32
    %329 = vector.broadcast %cst_105 : f32 to vector<8x64xf32>
    %330 = arith.maximumf %328, %329 : vector<8x64xf32>
    %331 = arith.truncf %330 : vector<8x64xf32> to vector<8x64xbf16>
    %c0_106 = arith.constant 0 : index
    %c0_107 = arith.constant 0 : index
    %332 = vector.load %arg17[%c0_106, %c0_107] : memref<64x32xbf16, #tpu.memory_space<vmem>>, vector<64x32xbf16>
    %cst_108 = arith.constant dense<0.000000e+00> : vector<8x32xf32>
    %333 = tpu.matmul %331, %332, %cst_108 {dimension_numbers = #tpu.dot_dimension_numbers<[1], [0], [0], [1], [0, 0, 1, 1], [], []>} : vector<8x64xbf16>, vector<64x32xbf16>, vector<8x32xf32> -> vector<8x32xf32>
    %c0_109 = arith.constant 0 : index
    %c0_110 = arith.constant 0 : index
    %334 = vector.load %arg18[%c0_109, %c0_110] : memref<1x32xf32, #tpu.memory_space<vmem>>, vector<1x32xf32>
    %335 = vector.broadcast %334 : vector<1x32xf32> to vector<8x32xf32>
    %336 = arith.addf %333, %335 : vector<8x32xf32>
    %cst_111 = arith.constant 0.000000e+00 : f32
    %337 = vector.broadcast %cst_111 : f32 to vector<8x32xf32>
    %338 = arith.maximumf %336, %337 : vector<8x32xf32>
    %339 = arith.addf %297, %338 : vector<8x32xf32>
    %340 = vector.shape_cast %339 : vector<8x32xf32> to vector<1x8x32xf32>
    %c0_112 = arith.constant 0 : index
    %c0_113 = arith.constant 0 : index
    %c0_114 = arith.constant 0 : index
    %341 = vector.load %arg19[%c0_112, %c0_113, %c0_114] : memref<1x8x32xf32, #tpu.memory_space<vmem>>, vector<1x8x32xf32>
    tpu.vector_store %arg19[%c0_112, %c0_113, %c0_114], %340 {strides = array<i32>} : memref<1x8x32xf32, #tpu.memory_space<vmem>>, vector<1x8x32xf32>,
    return
  }
  func.func @transform_0(%arg0: i32) -> (i32, i32, i32) {
    %c0_i32 = arith.constant 0 : i32
    %c0_i32_0 = arith.constant 0 : i32
    %c0_i32_1 = arith.constant 0 : i32
    return %arg0, %c0_i32, %c0_i32_0 : i32, i32, i32
  }
  func.func @transform_1(%arg0: i32) -> (i32, i32, i32) {
    %c0_i32 = arith.constant 0 : i32
    %c0_i32_0 = arith.constant 0 : i32
    %c0_i32_1 = arith.constant 0 : i32
    return %arg0, %c0_i32, %c0_i32_0 : i32, i32, i32
  }
  func.func @transform_2(%arg0: i32) -> (i32, i32, i32) {
    %c0_i32 = arith.constant 0 : i32
    %c0_i32_0 = arith.constant 0 : i32
    %c0_i32_1 = arith.constant 0 : i32
    return %arg0, %c0_i32, %c0_i32_0 : i32, i32, i32
  }
  func.func @transform_3(%arg0: i32) -> (i32, i32) {
    %c0_i32 = arith.constant 0 : i32
    %c0_i32_0 = arith.constant 0 : i32
    %c0_i32_1 = arith.constant 0 : i32
    return %c0_i32, %c0_i32_0 : i32, i32
  }
  func.func @transform_4(%arg0: i32) -> (i32, i32) {
    %c0_i32 = arith.constant 0 : i32
    %c0_i32_0 = arith.constant 0 : i32
    %c0_i32_1 = arith.constant 0 : i32
    return %c0_i32, %c0_i32_0 : i32, i32
  }
  func.func @transform_5(%arg0: i32) -> (i32, i32) {
    %c0_i32 = arith.constant 0 : i32
    %c0_i32_0 = arith.constant 0 : i32
    %c0_i32_1 = arith.constant 0 : i32
    return %c0_i32, %c0_i32_0 : i32, i32
  }
  func.func @transform_6(%arg0: i32) -> (i32, i32) {
    %c0_i32 = arith.constant 0 : i32
    %c0_i32_0 = arith.constant 0 : i32
    %c0_i32_1 = arith.constant 0 : i32
    return %c0_i32, %c0_i32_0 : i32, i32
  }
  func.func @transform_7(%arg0: i32) -> (i32, i32) {
    %c0_i32 = arith.constant 0 : i32
    %c0_i32_0 = arith.constant 0 : i32
    %c0_i32_1 = arith.constant 0 : i32
    return %c0_i32, %c0_i32_0 : i32, i32
  }
  func.func @transform_8(%arg0: i32) -> (i32, i32) {
    %c0_i32 = arith.constant 0 : i32
    %c0_i32_0 = arith.constant 0 : i32
    %c0_i32_1 = arith.constant 0 : i32
    return %c0_i32, %c0_i32_0 : i32, i32
  }
  func.func @transform_9(%arg0: i32) -> (i32, i32) {
    %c0_i32 = arith.constant 0 : i32
    %c0_i32_0 = arith.constant 0 : i32
    %c0_i32_1 = arith.constant 0 : i32
    return %c0_i32, %c0_i32_0 : i32, i32
  }
  func.func @transform_10(%arg0: i32) -> (i32, i32) {
    %c0_i32 = arith.constant 0 : i32
    %c0_i32_0 = arith.constant 0 : i32
    %c0_i32_1 = arith.constant 0 : i32
    return %c0_i32, %c0_i32_0 : i32, i32
  }
  func.func @transform_11(%arg0: i32) -> (i32, i32) {
    %c0_i32 = arith.constant 0 : i32
    %c0_i32_0 = arith.constant 0 : i32
    %c0_i32_1 = arith.constant 0 : i32
    return %c0_i32, %c0_i32_0 : i32, i32
  }
  func.func @transform_12(%arg0: i32) -> (i32, i32) {
    %c0_i32 = arith.constant 0 : i32
    %c0_i32_0 = arith.constant 0 : i32
    %c0_i32_1 = arith.constant 0 : i32
    return %c0_i32, %c0_i32_0 : i32, i32
  }
  func.func @transform_13(%arg0: i32) -> (i32, i32) {
    %c0_i32 = arith.constant 0 : i32
    %c0_i32_0 = arith.constant 0 : i32
    %c0_i32_1 = arith.constant 0 : i32
    return %c0_i32, %c0_i32_0 : i32, i32
  }
  func.func @transform_14(%arg0: i32) -> (i32, i32) {
    %c0_i32 = arith.constant 0 : i32
    %c0_i32_0 = arith.constant 0 : i32
    %c0_i32_1 = arith.constant 0 : i32
    return %c0_i32, %c0_i32_0 : i32, i32
  }
  func.func @transform_15(%arg0: i32) -> (i32, i32) {
    %c0_i32 = arith.constant 0 : i32
    %c0_i32_0 = arith.constant 0 : i32
    %c0_i32_1 = arith.constant 0 : i32
    return %c0_i32, %c0_i32_0 : i32, i32
  }
  func.func @transform_16(%arg0: i32) -> (i32, i32) {
    %c0_i32 = arith.constant 0 : i32
    %c0_i32_0 = arith.constant 0 : i32
    %c0_i32_1 = arith.constant 0 : i32
    return %c0_i32, %c0_i32_0 : i32, i32
  }
  func.func @transform_17(%arg0: i32) -> (i32, i32) {
    %c0_i32 = arith.constant 0 : i32
    %c0_i32_0 = arith.constant 0 : i32
    %c0_i32_1 = arith.constant 0 : i32
    return %c0_i32, %c0_i32_0 : i32, i32
  }
  func.func @transform_18(%arg0: i32) -> (i32, i32, i32) {
    %c0_i32 = arith.constant 0 : i32
    %c0_i32_0 = arith.constant 0 : i32
    %c0_i32_1 = arith.constant 0 : i32
    return %arg0, %c0_i32, %c0_i32_0 : i32, i32, i32
  }
}

module attributes {stable_mosaic.version = 11 : i64} {
  func.func @decoder_layer_kernel(%arg0: i32, %arg1: memref<1x8x32xf32, #tpu.memory_space<vmem>>, %arg2: memref<1x10x32xf32, #tpu.memory_space<vmem>>, %arg3: memref<1x1x8xf32, #tpu.memory_space<vmem>>, %arg4: memref<1x32xf32, #tpu.memory_space<vmem>>, %arg5: memref<1x32xf32, #tpu.memory_space<vmem>>, %arg6: memref<1x32xf32, #tpu.memory_space<vmem>>, %arg7: memref<1x32xf32, #tpu.memory_space<vmem>>, %arg8: memref<1x32xf32, #tpu.memory_space<vmem>>, %arg9: memref<1x32xf32, #tpu.memory_space<vmem>>, %arg10: memref<32x96xbf16, #tpu.memory_space<vmem>>, %arg11: memref<32x32xbf16, #tpu.memory_space<vmem>>, %arg12: memref<32x32xbf16, #tpu.memory_space<vmem>>, %arg13: memref<32x64xbf16, #tpu.memory_space<vmem>>, %arg14: memref<32x32xbf16, #tpu.memory_space<vmem>>, %arg15: memref<32x64xbf16, #tpu.memory_space<vmem>>, %arg16: memref<1x64xf32, #tpu.memory_space<vmem>>, %arg17: memref<64x32xbf16, #tpu.memory_space<vmem>>, %arg18: memref<1x32xf32, #tpu.memory_space<vmem>>, %arg19: memref<1x8x32xf32, #tpu.memory_space<vmem>>, %arg20: memref<8x32xf32, #tpu.memory_space<vmem>>) attributes {dimension_semantics = [#tpu.dimension_semantics<parallel>], iteration_bounds = array<i64: 2>, scalar_prefetch = 0 : i64, scratch_operands = 1 : i64, tpu.core_type = #tpu.core_type<tc>, window_params = [{transform_indices = @transform_0, window_bounds = array<i64: 1, 8, 32>}, {transform_indices = @transform_1, window_bounds = array<i64: 1, 10, 32>}, {transform_indices = @transform_2, window_bounds = array<i64: 1, 1, 8>}, {pipeline_mode = #tpu.pipeline_mode<synchronous>, transform_indices = @transform_3, window_bounds = array<i64: 1, 32>}, {pipeline_mode = #tpu.pipeline_mode<synchronous>, transform_indices = @transform_4, window_bounds = array<i64: 1, 32>}, {pipeline_mode = #tpu.pipeline_mode<synchronous>, transform_indices = @transform_5, window_bounds = array<i64: 1, 32>}, {pipeline_mode = #tpu.pipeline_mode<synchronous>, transform_indices = @transform_6, window_bounds = array<i64: 1, 32>}, {pipeline_mode = #tpu.pipeline_mode<synchronous>, transform_indices = @transform_7, window_bounds = array<i64: 1, 32>}, {pipeline_mode = #tpu.pipeline_mode<synchronous>, transform_indices = @transform_8, window_bounds = array<i64: 1, 32>}, {pipeline_mode = #tpu.pipeline_mode<synchronous>, transform_indices = @transform_9, window_bounds = array<i64: 32, 96>}, {pipeline_mode = #tpu.pipeline_mode<synchronous>, transform_indices = @transform_10, window_bounds = array<i64: 32, 32>}, {pipeline_mode = #tpu.pipeline_mode<synchronous>, transform_indices = @transform_11, window_bounds = array<i64: 32, 32>}, {pipeline_mode = #tpu.pipeline_mode<synchronous>, transform_indices = @transform_12, window_bounds = array<i64: 32, 64>}, {pipeline_mode = #tpu.pipeline_mode<synchronous>, transform_indices = @transform_13, window_bounds = array<i64: 32, 32>}, {pipeline_mode = #tpu.pipeline_mode<synchronous>, transform_indices = @transform_14, window_bounds = array<i64: 32, 64>}, {pipeline_mode = #tpu.pipeline_mode<synchronous>, transform_indices = @transform_15, window_bounds = array<i64: 1, 64>}, {pipeline_mode = #tpu.pipeline_mode<synchronous>, transform_indices = @transform_16, window_bounds = array<i64: 64, 32>}, {pipeline_mode = #tpu.pipeline_mode<synchronous>, transform_indices = @transform_17, window_bounds = array<i64: 1, 32>}, {transform_indices = @transform_18, window_bounds = array<i64: 1, 8, 32>}]} {
    %c0 = arith.constant 0 : index
    %c0_0 = arith.constant 0 : index
    %c0_1 = arith.constant 0 : index
    %0 = vector.load %arg1[%c0, %c0_0, %c0_1] : memref<1x8x32xf32, #tpu.memory_space<vmem>>, vector<1x8x32xf32>
    %1 = vector.shape_cast %0 : vector<1x8x32xf32> to vector<8x32xf32>
    %2 = tpu.iota {dimensions = array<i32: 0>} : vector<8x8xi32>
    %3 = tpu.iota {dimensions = array<i32: 1>} : vector<8x8xi32>
    %4 = arith.cmpi sgt, %3, %2 : vector<8x8xi32>
    %cst = arith.constant -1.000000e+09 : f32
    %cst_2 = arith.constant 0.000000e+00 : f32
    %5 = vector.broadcast %cst : f32 to vector<8x8xf32>
    %6 = vector.broadcast %cst_2 : f32 to vector<8x8xf32>
    %7 = arith.select %4, %5, %6 : vector<8x8xi1>, vector<8x8xf32>
    %8 = vector.shape_cast %7 : vector<8x8xf32> to vector<1x8x8xf32>
    %c0_3 = arith.constant 0 : index
    %c0_4 = arith.constant 0 : index
    %c0_5 = arith.constant 0 : index
    %9 = vector.load %arg3[%c0_3, %c0_4, %c0_5] : memref<1x1x8xf32, #tpu.memory_space<vmem>>, vector<1x1x8xf32>
    %10 = vector.broadcast %9 : vector<1x1x8xf32> to vector<1x8x8xf32>
    %11 = arith.addf %8, %10 : vector<1x8x8xf32>
    %c0_6 = arith.constant 0 : index
    %c0_7 = arith.constant 0 : index
    %12 = vector.load %arg4[%c0_6, %c0_7] : memref<1x32xf32, #tpu.memory_space<vmem>>, vector<1x32xf32>
    %c0_8 = arith.constant 0 : index
    %c0_9 = arith.constant 0 : index
    %13 = vector.load %arg5[%c0_8, %c0_9] : memref<1x32xf32, #tpu.memory_space<vmem>>, vector<1x32xf32>
    %cst_10 = arith.constant dense<0.000000e+00> : vector<8xf32>
    %14 = vector.multi_reduction <add>, %1, %cst_10 [1] : vector<8x32xf32> to vector<8xf32>
    %15 = vector.shape_cast %14 : vector<8xf32> to vector<8x1xf32>
    %cst_11 = arith.constant 3.200000e+01 : f32
    %16 = vector.broadcast %cst_11 : f32 to vector<8x1xf32>
    %17 = arith.divf %15, %16 : vector<8x1xf32>
    %18 = vector.broadcast %17 : vector<8x1xf32> to vector<8x32xf32>
    %19 = arith.subf %1, %18 : vector<8x32xf32>
    %20 = arith.mulf %19, %19 : vector<8x32xf32>
    %cst_12 = arith.constant dense<0.000000e+00> : vector<8xf32>
    %21 = vector.multi_reduction <add>, %20, %cst_12 [1] : vector<8x32xf32> to vector<8xf32>
    %22 = vector.shape_cast %21 : vector<8xf32> to vector<8x1xf32>
    %cst_13 = arith.constant 3.100000e+01 : f32
    %23 = vector.broadcast %cst_13 : f32 to vector<8x1xf32>
    %24 = arith.divf %22, %23 : vector<8x1xf32>
    %25 = math.sqrt %24 : vector<8x1xf32>
    %cst_14 = arith.constant 9.99999997E-7 : f32
    %26 = vector.broadcast %cst_14 : f32 to vector<8x1xf32>
    %27 = arith.addf %25, %26 : vector<8x1xf32>
    %28 = tpu.reciprocal %27 {approx = true} : vector<8x1xf32> -> vector<8x1xf32>
    %29 = vector.broadcast %17 : vector<8x1xf32> to vector<8x32xf32>
    %30 = arith.subf %1, %29 : vector<8x32xf32>
    %31 = vector.broadcast %12 : vector<1x32xf32> to vector<8x32xf32>
    %32 = arith.mulf %31, %30 : vector<8x32xf32>
    %33 = vector.broadcast %28 : vector<8x1xf32> to vector<8x32xf32>
    %34 = arith.mulf %32, %33 : vector<8x32xf32>
    %35 = vector.broadcast %13 : vector<1x32xf32> to vector<8x32xf32>
    %36 = arith.addf %34, %35 : vector<8x32xf32>
    %37 = arith.truncf %36 : vector<8x32xf32> to vector<8x32xbf16>
    %c0_15 = arith.constant 0 : index
    %c0_16 = arith.constant 0 : index
    %38 = vector.load %arg10[%c0_15, %c0_16] : memref<32x96xbf16, #tpu.memory_space<vmem>>, vector<32x96xbf16>
    %cst_17 = arith.constant dense<0.000000e+00> : vector<8x96xf32>
    %39 = tpu.matmul %37, %38, %cst_17 {dimension_numbers = #tpu.dot_dimension_numbers<[1], [0], [0], [1], [0, 0, 1, 1], [], []>} : vector<8x32xbf16>, vector<32x96xbf16>, vector<8x96xf32> -> vector<8x96xf32>
    %40 = vector.extract_strided_slice %39 {offsets = [0, 0], sizes = [8, 32], strides = [1, 1]} : vector<8x96xf32> to vector<8x32xf32>
    %41 = vector.extract_strided_slice %39 {offsets = [0, 32], sizes = [8, 32], strides = [1, 1]} : vector<8x96xf32> to vector<8x32xf32>
    %42 = vector.extract_strided_slice %39 {offsets = [0, 64], sizes = [8, 32], strides = [1, 1]} : vector<8x96xf32> to vector<8x32xf32>
    %43 = vector.shape_cast %40 : vector<8x32xf32> to vector<1x8x32xf32>
    %44 = vector.shape_cast %41 : vector<8x32xf32> to vector<1x8x32xf32>
    %45 = vector.shape_cast %42 : vector<8x32xf32> to vector<1x8x32xf32>
    %46 = vector.extract_strided_slice %43 {offsets = [0, 0, 0], sizes = [1, 8, 8], strides = [1, 1, 1]} : vector<1x8x32xf32> to vector<1x8x8xf32>
    %47 = arith.truncf %46 : vector<1x8x8xf32> to vector<1x8x8xbf16>
    %48 = vector.extract_strided_slice %44 {offsets = [0, 0, 0], sizes = [1, 8, 8], strides = [1, 1, 1]} : vector<1x8x32xf32> to vector<1x8x8xf32>
    %49 = arith.truncf %48 : vector<1x8x8xf32> to vector<1x8x8xbf16>
    %50 = vector.extract_strided_slice %45 {offsets = [0, 0, 0], sizes = [1, 8, 8], strides = [1, 1, 1]} : vector<1x8x32xf32> to vector<1x8x8xf32>
    %51 = arith.truncf %50 : vector<1x8x8xf32> to vector<1x8x8xbf16>
    %52 = vector.shape_cast %47 : vector<1x8x8xbf16> to vector<8x8xbf16>
    %53 = vector.shape_cast %49 : vector<1x8x8xbf16> to vector<8x8xbf16>
    %cst_18 = arith.constant dense<0.000000e+00> : vector<8x8xf32>
    %54 = tpu.matmul %52, %53, %cst_18 {dimension_numbers = #tpu.dot_dimension_numbers<[1], [1], [0], [0], [0, 0, 1, 0], [], []>} : vector<8x8xbf16>, vector<8x8xbf16>, vector<8x8xf32> -> vector<8x8xf32>
    %55 = vector.shape_cast %54 : vector<8x8xf32> to vector<1x8x8xf32>
    %56 = arith.addf %55, %11 : vector<1x8x8xf32>
    %cst_19 = arith.constant dense<0xFF800000> : vector<1x8xf32>
    %57 = vector.multi_reduction <maximumf>, %56, %cst_19 [2] : vector<1x8x8xf32> to vector<1x8xf32>
    %58 = vector.shape_cast %57 : vector<1x8xf32> to vector<1x8x1xf32>
    %59 = vector.broadcast %58 : vector<1x8x1xf32> to vector<1x8x8xf32>
    %60 = arith.subf %56, %59 : vector<1x8x8xf32>
    %61 = math.exp %60 : vector<1x8x8xf32>
    %cst_20 = arith.constant dense<0.000000e+00> : vector<1x8xf32>
    %62 = vector.multi_reduction <add>, %61, %cst_20 [2] : vector<1x8x8xf32> to vector<1x8xf32>
    %63 = vector.shape_cast %62 : vector<1x8xf32> to vector<1x8x1xf32>
    %64 = tpu.reciprocal %63 {approx = true} : vector<1x8x1xf32> -> vector<1x8x1xf32>
    %65 = vector.broadcast %64 : vector<1x8x1xf32> to vector<1x8x8xf32>
    %66 = arith.mulf %61, %65 : vector<1x8x8xf32>
    %67 = arith.truncf %66 : vector<1x8x8xf32> to vector<1x8x8xbf16>
    %68 = vector.shape_cast %67 : vector<1x8x8xbf16> to vector<8x8xbf16>
    %69 = vector.shape_cast %51 : vector<1x8x8xbf16> to vector<8x8xbf16>
    %cst_21 = arith.constant dense<0.000000e+00> : vector<8x8xf32>
    %70 = tpu.matmul %68, %69, %cst_21 {dimension_numbers = #tpu.dot_dimension_numbers<[1], [0], [0], [1], [0, 0, 1, 1], [], []>} : vector<8x8xbf16>, vector<8x8xbf16>, vector<8x8xf32> -> vector<8x8xf32>
    %c0_22 = arith.constant 0 : index
    %c0_23 = arith.constant 0 : index
    %71 = vector.load %arg20[%c0_22, %c0_23] : memref<8x32xf32, #tpu.memory_space<vmem>>, vector<8x8xf32>
    tpu.vector_store %arg20[%c0_22, %c0_23], %70 {strides = array<i32>} : memref<8x32xf32, #tpu.memory_space<vmem>>, vector<8x8xf32>,
    %72 = vector.extract_strided_slice %43 {offsets = [0, 0, 8], sizes = [1, 8, 8], strides = [1, 1, 1]} : vector<1x8x32xf32> to vector<1x8x8xf32>
    %73 = arith.truncf %72 : vector<1x8x8xf32> to vector<1x8x8xbf16>
    %74 = vector.extract_strided_slice %44 {offsets = [0, 0, 8], sizes = [1, 8, 8], strides = [1, 1, 1]} : vector<1x8x32xf32> to vector<1x8x8xf32>
    %75 = arith.truncf %74 : vector<1x8x8xf32> to vector<1x8x8xbf16>
    %76 = vector.extract_strided_slice %45 {offsets = [0, 0, 8], sizes = [1, 8, 8], strides = [1, 1, 1]} : vector<1x8x32xf32> to vector<1x8x8xf32>
    %77 = arith.truncf %76 : vector<1x8x8xf32> to vector<1x8x8xbf16>
    %78 = vector.shape_cast %73 : vector<1x8x8xbf16> to vector<8x8xbf16>
    %79 = vector.shape_cast %75 : vector<1x8x8xbf16> to vector<8x8xbf16>
    %cst_24 = arith.constant dense<0.000000e+00> : vector<8x8xf32>
    %80 = tpu.matmul %78, %79, %cst_24 {dimension_numbers = #tpu.dot_dimension_numbers<[1], [1], [0], [0], [0, 0, 1, 0], [], []>} : vector<8x8xbf16>, vector<8x8xbf16>, vector<8x8xf32> -> vector<8x8xf32>
    %81 = vector.shape_cast %80 : vector<8x8xf32> to vector<1x8x8xf32>
    %82 = arith.addf %81, %11 : vector<1x8x8xf32>
    %cst_25 = arith.constant dense<0xFF800000> : vector<1x8xf32>
    %83 = vector.multi_reduction <maximumf>, %82, %cst_25 [2] : vector<1x8x8xf32> to vector<1x8xf32>
    %84 = vector.shape_cast %83 : vector<1x8xf32> to vector<1x8x1xf32>
    %85 = vector.broadcast %84 : vector<1x8x1xf32> to vector<1x8x8xf32>
    %86 = arith.subf %82, %85 : vector<1x8x8xf32>
    %87 = math.exp %86 : vector<1x8x8xf32>
    %cst_26 = arith.constant dense<0.000000e+00> : vector<1x8xf32>
    %88 = vector.multi_reduction <add>, %87, %cst_26 [2] : vector<1x8x8xf32> to vector<1x8xf32>
    %89 = vector.shape_cast %88 : vector<1x8xf32> to vector<1x8x1xf32>
    %90 = tpu.reciprocal %89 {approx = true} : vector<1x8x1xf32> -> vector<1x8x1xf32>
    %91 = vector.broadcast %90 : vector<1x8x1xf32> to vector<1x8x8xf32>
    %92 = arith.mulf %87, %91 : vector<1x8x8xf32>
    %93 = arith.truncf %92 : vector<1x8x8xf32> to vector<1x8x8xbf16>
    %94 = vector.shape_cast %93 : vector<1x8x8xbf16> to vector<8x8xbf16>
    %95 = vector.shape_cast %77 : vector<1x8x8xbf16> to vector<8x8xbf16>
    %cst_27 = arith.constant dense<0.000000e+00> : vector<8x8xf32>
    %96 = tpu.matmul %94, %95, %cst_27 {dimension_numbers = #tpu.dot_dimension_numbers<[1], [0], [0], [1], [0, 0, 1, 1], [], []>} : vector<8x8xbf16>, vector<8x8xbf16>, vector<8x8xf32> -> vector<8x8xf32>
    %c0_28 = arith.constant 0 : index
    %c8 = arith.constant 8 : index
    %97 = vector.load %arg20[%c0_28, %c8] : memref<8x32xf32, #tpu.memory_space<vmem>>, vector<8x8xf32>
    tpu.vector_store %arg20[%c0_28, %c8], %96 {strides = array<i32>} : memref<8x32xf32, #tpu.memory_space<vmem>>, vector<8x8xf32>,
    %98 = vector.extract_strided_slice %43 {offsets = [0, 0, 16], sizes = [1, 8, 8], strides = [1, 1, 1]} : vector<1x8x32xf32> to vector<1x8x8xf32>
    %99 = arith.truncf %98 : vector<1x8x8xf32> to vector<1x8x8xbf16>
    %100 = vector.extract_strided_slice %44 {offsets = [0, 0, 16], sizes = [1, 8, 8], strides = [1, 1, 1]} : vector<1x8x32xf32> to vector<1x8x8xf32>
    %101 = arith.truncf %100 : vector<1x8x8xf32> to vector<1x8x8xbf16>
    %102 = vector.extract_strided_slice %45 {offsets = [0, 0, 16], sizes = [1, 8, 8], strides = [1, 1, 1]} : vector<1x8x32xf32> to vector<1x8x8xf32>
    %103 = arith.truncf %102 : vector<1x8x8xf32> to vector<1x8x8xbf16>
    %104 = vector.shape_cast %99 : vector<1x8x8xbf16> to vector<8x8xbf16>
    %105 = vector.shape_cast %101 : vector<1x8x8xbf16> to vector<8x8xbf16>
    %cst_29 = arith.constant dense<0.000000e+00> : vector<8x8xf32>
    %106 = tpu.matmul %104, %105, %cst_29 {dimension_numbers = #tpu.dot_dimension_numbers<[1], [1], [0], [0], [0, 0, 1, 0], [], []>} : vector<8x8xbf16>, vector<8x8xbf16>, vector<8x8xf32> -> vector<8x8xf32>
    %107 = vector.shape_cast %106 : vector<8x8xf32> to vector<1x8x8xf32>
    %108 = arith.addf %107, %11 : vector<1x8x8xf32>
    %cst_30 = arith.constant dense<0xFF800000> : vector<1x8xf32>
    %109 = vector.multi_reduction <maximumf>, %108, %cst_30 [2] : vector<1x8x8xf32> to vector<1x8xf32>
    %110 = vector.shape_cast %109 : vector<1x8xf32> to vector<1x8x1xf32>
    %111 = vector.broadcast %110 : vector<1x8x1xf32> to vector<1x8x8xf32>
    %112 = arith.subf %108, %111 : vector<1x8x8xf32>
    %113 = math.exp %112 : vector<1x8x8xf32>
    %cst_31 = arith.constant dense<0.000000e+00> : vector<1x8xf32>
    %114 = vector.multi_reduction <add>, %113, %cst_31 [2] : vector<1x8x8xf32> to vector<1x8xf32>
    %115 = vector.shape_cast %114 : vector<1x8xf32> to vector<1x8x1xf32>
    %116 = tpu.reciprocal %115 {approx = true} : vector<1x8x1xf32> -> vector<1x8x1xf32>
    %117 = vector.broadcast %116 : vector<1x8x1xf32> to vector<1x8x8xf32>
    %118 = arith.mulf %113, %117 : vector<1x8x8xf32>
    %119 = arith.truncf %118 : vector<1x8x8xf32> to vector<1x8x8xbf16>
    %120 = vector.shape_cast %119 : vector<1x8x8xbf16> to vector<8x8xbf16>
    %121 = vector.shape_cast %103 : vector<1x8x8xbf16> to vector<8x8xbf16>
    %cst_32 = arith.constant dense<0.000000e+00> : vector<8x8xf32>
    %122 = tpu.matmul %120, %121, %cst_32 {dimension_numbers = #tpu.dot_dimension_numbers<[1], [0], [0], [1], [0, 0, 1, 1], [], []>} : vector<8x8xbf16>, vector<8x8xbf16>, vector<8x8xf32> -> vector<8x8xf32>
    %c0_33 = arith.constant 0 : index
    %c16 = arith.constant 16 : index
    %123 = vector.load %arg20[%c0_33, %c16] : memref<8x32xf32, #tpu.memory_space<vmem>>, vector<8x8xf32>
    tpu.vector_store %arg20[%c0_33, %c16], %122 {strides = array<i32>} : memref<8x32xf32, #tpu.memory_space<vmem>>, vector<8x8xf32>,
    %124 = vector.extract_strided_slice %43 {offsets = [0, 0, 24], sizes = [1, 8, 8], strides = [1, 1, 1]} : vector<1x8x32xf32> to vector<1x8x8xf32>
    %125 = arith.truncf %124 : vector<1x8x8xf32> to vector<1x8x8xbf16>
    %126 = vector.extract_strided_slice %44 {offsets = [0, 0, 24], sizes = [1, 8, 8], strides = [1, 1, 1]} : vector<1x8x32xf32> to vector<1x8x8xf32>
    %127 = arith.truncf %126 : vector<1x8x8xf32> to vector<1x8x8xbf16>
    %128 = vector.extract_strided_slice %45 {offsets = [0, 0, 24], sizes = [1, 8, 8], strides = [1, 1, 1]} : vector<1x8x32xf32> to vector<1x8x8xf32>
    %129 = arith.truncf %128 : vector<1x8x8xf32> to vector<1x8x8xbf16>
    %130 = vector.shape_cast %125 : vector<1x8x8xbf16> to vector<8x8xbf16>
    %131 = vector.shape_cast %127 : vector<1x8x8xbf16> to vector<8x8xbf16>
    %cst_34 = arith.constant dense<0.000000e+00> : vector<8x8xf32>
    %132 = tpu.matmul %130, %131, %cst_34 {dimension_numbers = #tpu.dot_dimension_numbers<[1], [1], [0], [0], [0, 0, 1, 0], [], []>} : vector<8x8xbf16>, vector<8x8xbf16>, vector<8x8xf32> -> vector<8x8xf32>
    %133 = vector.shape_cast %132 : vector<8x8xf32> to vector<1x8x8xf32>
    %134 = arith.addf %133, %11 : vector<1x8x8xf32>
    %cst_35 = arith.constant dense<0xFF800000> : vector<1x8xf32>
    %135 = vector.multi_reduction <maximumf>, %134, %cst_35 [2] : vector<1x8x8xf32> to vector<1x8xf32>
    %136 = vector.shape_cast %135 : vector<1x8xf32> to vector<1x8x1xf32>
    %137 = vector.broadcast %136 : vector<1x8x1xf32> to vector<1x8x8xf32>
    %138 = arith.subf %134, %137 : vector<1x8x8xf32>
    %139 = math.exp %138 : vector<1x8x8xf32>
    %cst_36 = arith.constant dense<0.000000e+00> : vector<1x8xf32>
    %140 = vector.multi_reduction <add>, %139, %cst_36 [2] : vector<1x8x8xf32> to vector<1x8xf32>
    %141 = vector.shape_cast %140 : vector<1x8xf32> to vector<1x8x1xf32>
    %142 = tpu.reciprocal %141 {approx = true} : vector<1x8x1xf32> -> vector<1x8x1xf32>
    %143 = vector.broadcast %142 : vector<1x8x1xf32> to vector<1x8x8xf32>
    %144 = arith.mulf %139, %143 : vector<1x8x8xf32>
    %145 = arith.truncf %144 : vector<1x8x8xf32> to vector<1x8x8xbf16>
    %146 = vector.shape_cast %145 : vector<1x8x8xbf16> to vector<8x8xbf16>
    %147 = vector.shape_cast %129 : vector<1x8x8xbf16> to vector<8x8xbf16>
    %cst_37 = arith.constant dense<0.000000e+00> : vector<8x8xf32>
    %148 = tpu.matmul %146, %147, %cst_37 {dimension_numbers = #tpu.dot_dimension_numbers<[1], [0], [0], [1], [0, 0, 1, 1], [], []>} : vector<8x8xbf16>, vector<8x8xbf16>, vector<8x8xf32> -> vector<8x8xf32>
    %c0_38 = arith.constant 0 : index
    %c24 = arith.constant 24 : index
    %149 = vector.load %arg20[%c0_38, %c24] : memref<8x32xf32, #tpu.memory_space<vmem>>, vector<8x8xf32>
    tpu.vector_store %arg20[%c0_38, %c24], %148 {strides = array<i32>} : memref<8x32xf32, #tpu.memory_space<vmem>>, vector<8x8xf32>,
    %c0_39 = arith.constant 0 : index
    %c0_40 = arith.constant 0 : index
    %150 = vector.load %arg20[%c0_39, %c0_40] : memref<8x32xf32, #tpu.memory_space<vmem>>, vector<8x32xf32>
    %151 = arith.truncf %150 : vector<8x32xf32> to vector<8x32xbf16>
    %c0_41 = arith.constant 0 : index
    %c0_42 = arith.constant 0 : index
    %152 = vector.load %arg11[%c0_41, %c0_42] : memref<32x32xbf16, #tpu.memory_space<vmem>>, vector<32x32xbf16>
    %cst_43 = arith.constant dense<0.000000e+00> : vector<8x32xf32>
    %153 = tpu.matmul %151, %152, %cst_43 {dimension_numbers = #tpu.dot_dimension_numbers<[1], [0], [0], [1], [0, 0, 1, 1], [], []>} : vector<8x32xbf16>, vector<32x32xbf16>, vector<8x32xf32> -> vector<8x32xf32>
    %154 = arith.addf %1, %153 : vector<8x32xf32>
    %c0_44 = arith.constant 0 : index
    %c0_45 = arith.constant 0 : index
    %155 = vector.load %arg6[%c0_44, %c0_45] : memref<1x32xf32, #tpu.memory_space<vmem>>, vector<1x32xf32>
    %c0_46 = arith.constant 0 : index
    %c0_47 = arith.constant 0 : index
    %156 = vector.load %arg7[%c0_46, %c0_47] : memref<1x32xf32, #tpu.memory_space<vmem>>, vector<1x32xf32>
    %cst_48 = arith.constant dense<0.000000e+00> : vector<8xf32>
    %157 = vector.multi_reduction <add>, %154, %cst_48 [1] : vector<8x32xf32> to vector<8xf32>
    %158 = vector.shape_cast %157 : vector<8xf32> to vector<8x1xf32>
    %cst_49 = arith.constant 3.200000e+01 : f32
    %159 = vector.broadcast %cst_49 : f32 to vector<8x1xf32>
    %160 = arith.divf %158, %159 : vector<8x1xf32>
    %161 = vector.broadcast %160 : vector<8x1xf32> to vector<8x32xf32>
    %162 = arith.subf %154, %161 : vector<8x32xf32>
    %163 = arith.mulf %162, %162 : vector<8x32xf32>
    %cst_50 = arith.constant dense<0.000000e+00> : vector<8xf32>
    %164 = vector.multi_reduction <add>, %163, %cst_50 [1] : vector<8x32xf32> to vector<8xf32>
    %165 = vector.shape_cast %164 : vector<8xf32> to vector<8x1xf32>
    %cst_51 = arith.constant 3.100000e+01 : f32
    %166 = vector.broadcast %cst_51 : f32 to vector<8x1xf32>
    %167 = arith.divf %165, %166 : vector<8x1xf32>
    %168 = math.sqrt %167 : vector<8x1xf32>
    %cst_52 = arith.constant 9.99999997E-7 : f32
    %169 = vector.broadcast %cst_52 : f32 to vector<8x1xf32>
    %170 = arith.addf %168, %169 : vector<8x1xf32>
    %171 = tpu.reciprocal %170 {approx = true} : vector<8x1xf32> -> vector<8x1xf32>
    %172 = vector.broadcast %160 : vector<8x1xf32> to vector<8x32xf32>
    %173 = arith.subf %154, %172 : vector<8x32xf32>
    %174 = vector.broadcast %155 : vector<1x32xf32> to vector<8x32xf32>
    %175 = arith.mulf %174, %173 : vector<8x32xf32>
    %176 = vector.broadcast %171 : vector<8x1xf32> to vector<8x32xf32>
    %177 = arith.mulf %175, %176 : vector<8x32xf32>
    %178 = vector.broadcast %156 : vector<1x32xf32> to vector<8x32xf32>
    %179 = arith.addf %177, %178 : vector<8x32xf32>
    %180 = arith.truncf %179 : vector<8x32xf32> to vector<8x32xbf16>
    %c0_53 = arith.constant 0 : index
    %c0_54 = arith.constant 0 : index
    %181 = vector.load %arg12[%c0_53, %c0_54] : memref<32x32xbf16, #tpu.memory_space<vmem>>, vector<32x32xbf16>
    %cst_55 = arith.constant dense<0.000000e+00> : vector<8x32xf32>
    %182 = tpu.matmul %180, %181, %cst_55 {dimension_numbers = #tpu.dot_dimension_numbers<[1], [0], [0], [1], [0, 0, 1, 1], [], []>} : vector<8x32xbf16>, vector<32x32xbf16>, vector<8x32xf32> -> vector<8x32xf32>
    %c0_56 = arith.constant 0 : index
    %c0_57 = arith.constant 0 : index
    %c0_58 = arith.constant 0 : index
    %183 = vector.load %arg2[%c0_56, %c0_57, %c0_58] : memref<1x10x32xf32, #tpu.memory_space<vmem>>, vector<1x10x32xf32>
    %184 = vector.shape_cast %183 : vector<1x10x32xf32> to vector<10x32xf32>
    %185 = arith.truncf %184 : vector<10x32xf32> to vector<10x32xbf16>
    %c0_59 = arith.constant 0 : index
    %c0_60 = arith.constant 0 : index
    %186 = vector.load %arg13[%c0_59, %c0_60] : memref<32x64xbf16, #tpu.memory_space<vmem>>, vector<32x64xbf16>
    %cst_61 = arith.constant dense<0.000000e+00> : vector<10x64xf32>
    %187 = tpu.matmul %185, %186, %cst_61 {dimension_numbers = #tpu.dot_dimension_numbers<[1], [0], [0], [1], [0, 0, 1, 1], [], []>} : vector<10x32xbf16>, vector<32x64xbf16>, vector<10x64xf32> -> vector<10x64xf32>
    %188 = vector.extract_strided_slice %187 {offsets = [0, 0], sizes = [10, 32], strides = [1, 1]} : vector<10x64xf32> to vector<10x32xf32>
    %189 = vector.extract_strided_slice %187 {offsets = [0, 32], sizes = [10, 32], strides = [1, 1]} : vector<10x64xf32> to vector<10x32xf32>
    %190 = vector.shape_cast %182 : vector<8x32xf32> to vector<1x8x32xf32>
    %191 = vector.shape_cast %188 : vector<10x32xf32> to vector<1x10x32xf32>
    %192 = vector.shape_cast %189 : vector<10x32xf32> to vector<1x10x32xf32>
    %193 = vector.extract_strided_slice %190 {offsets = [0, 0, 0], sizes = [1, 8, 8], strides = [1, 1, 1]} : vector<1x8x32xf32> to vector<1x8x8xf32>
    %194 = arith.truncf %193 : vector<1x8x8xf32> to vector<1x8x8xbf16>
    %195 = vector.extract_strided_slice %191 {offsets = [0, 0, 0], sizes = [1, 10, 8], strides = [1, 1, 1]} : vector<1x10x32xf32> to vector<1x10x8xf32>
    %196 = arith.truncf %195 : vector<1x10x8xf32> to vector<1x10x8xbf16>
    %197 = vector.extract_strided_slice %192 {offsets = [0, 0, 0], sizes = [1, 10, 8], strides = [1, 1, 1]} : vector<1x10x32xf32> to vector<1x10x8xf32>
    %198 = arith.truncf %197 : vector<1x10x8xf32> to vector<1x10x8xbf16>
    %199 = vector.shape_cast %194 : vector<1x8x8xbf16> to vector<8x8xbf16>
    %200 = vector.shape_cast %196 : vector<1x10x8xbf16> to vector<10x8xbf16>
    %cst_62 = arith.constant dense<0.000000e+00> : vector<8x10xf32>
    %201 = tpu.matmul %199, %200, %cst_62 {dimension_numbers = #tpu.dot_dimension_numbers<[1], [1], [0], [0], [0, 0, 1, 0], [], []>} : vector<8x8xbf16>, vector<10x8xbf16>, vector<8x10xf32> -> vector<8x10xf32>
    %202 = vector.shape_cast %201 : vector<8x10xf32> to vector<1x8x10xf32>
    %cst_63 = arith.constant dense<0xFF800000> : vector<1x8xf32>
    %203 = vector.multi_reduction <maximumf>, %202, %cst_63 [2] : vector<1x8x10xf32> to vector<1x8xf32>
    %204 = vector.shape_cast %203 : vector<1x8xf32> to vector<1x8x1xf32>
    %205 = vector.broadcast %204 : vector<1x8x1xf32> to vector<1x8x10xf32>
    %206 = arith.subf %202, %205 : vector<1x8x10xf32>
    %207 = math.exp %206 : vector<1x8x10xf32>
    %cst_64 = arith.constant dense<0.000000e+00> : vector<1x8xf32>
    %208 = vector.multi_reduction <add>, %207, %cst_64 [2] : vector<1x8x10xf32> to vector<1x8xf32>
    %209 = vector.shape_cast %208 : vector<1x8xf32> to vector<1x8x1xf32>
    %210 = tpu.reciprocal %209 {approx = true} : vector<1x8x1xf32> -> vector<1x8x1xf32>
    %211 = vector.broadcast %210 : vector<1x8x1xf32> to vector<1x8x10xf32>
    %212 = arith.mulf %207, %211 : vector<1x8x10xf32>
    %213 = arith.truncf %212 : vector<1x8x10xf32> to vector<1x8x10xbf16>
    %214 = vector.shape_cast %213 : vector<1x8x10xbf16> to vector<8x10xbf16>
    %215 = vector.shape_cast %198 : vector<1x10x8xbf16> to vector<10x8xbf16>
    %cst_65 = arith.constant dense<0.000000e+00> : vector<8x8xf32>
    %216 = tpu.matmul %214, %215, %cst_65 {dimension_numbers = #tpu.dot_dimension_numbers<[1], [0], [0], [1], [0, 0, 1, 1], [], []>} : vector<8x10xbf16>, vector<10x8xbf16>, vector<8x8xf32> -> vector<8x8xf32>
    %c0_66 = arith.constant 0 : index
    %c0_67 = arith.constant 0 : index
    %217 = vector.load %arg20[%c0_66, %c0_67] : memref<8x32xf32, #tpu.memory_space<vmem>>, vector<8x8xf32>
    tpu.vector_store %arg20[%c0_66, %c0_67], %216 {strides = array<i32>} : memref<8x32xf32, #tpu.memory_space<vmem>>, vector<8x8xf32>,
    %218 = vector.extract_strided_slice %190 {offsets = [0, 0, 8], sizes = [1, 8, 8], strides = [1, 1, 1]} : vector<1x8x32xf32> to vector<1x8x8xf32>
    %219 = arith.truncf %218 : vector<1x8x8xf32> to vector<1x8x8xbf16>
    %220 = vector.extract_strided_slice %191 {offsets = [0, 0, 8], sizes = [1, 10, 8], strides = [1, 1, 1]} : vector<1x10x32xf32> to vector<1x10x8xf32>
    %221 = arith.truncf %220 : vector<1x10x8xf32> to vector<1x10x8xbf16>
    %222 = vector.extract_strided_slice %192 {offsets = [0, 0, 8], sizes = [1, 10, 8], strides = [1, 1, 1]} : vector<1x10x32xf32> to vector<1x10x8xf32>
    %223 = arith.truncf %222 : vector<1x10x8xf32> to vector<1x10x8xbf16>
    %224 = vector.shape_cast %219 : vector<1x8x8xbf16> to vector<8x8xbf16>
    %225 = vector.shape_cast %221 : vector<1x10x8xbf16> to vector<10x8xbf16>
    %cst_68 = arith.constant dense<0.000000e+00> : vector<8x10xf32>
    %226 = tpu.matmul %224, %225, %cst_68 {dimension_numbers = #tpu.dot_dimension_numbers<[1], [1], [0], [0], [0, 0, 1, 0], [], []>} : vector<8x8xbf16>, vector<10x8xbf16>, vector<8x10xf32> -> vector<8x10xf32>
    %227 = vector.shape_cast %226 : vector<8x10xf32> to vector<1x8x10xf32>
    %cst_69 = arith.constant dense<0xFF800000> : vector<1x8xf32>
    %228 = vector.multi_reduction <maximumf>, %227, %cst_69 [2] : vector<1x8x10xf32> to vector<1x8xf32>
    %229 = vector.shape_cast %228 : vector<1x8xf32> to vector<1x8x1xf32>
    %230 = vector.broadcast %229 : vector<1x8x1xf32> to vector<1x8x10xf32>
    %231 = arith.subf %227, %230 : vector<1x8x10xf32>
    %232 = math.exp %231 : vector<1x8x10xf32>
    %cst_70 = arith.constant dense<0.000000e+00> : vector<1x8xf32>
    %233 = vector.multi_reduction <add>, %232, %cst_70 [2] : vector<1x8x10xf32> to vector<1x8xf32>
    %234 = vector.shape_cast %233 : vector<1x8xf32> to vector<1x8x1xf32>
    %235 = tpu.reciprocal %234 {approx = true} : vector<1x8x1xf32> -> vector<1x8x1xf32>
    %236 = vector.broadcast %235 : vector<1x8x1xf32> to vector<1x8x10xf32>
    %237 = arith.mulf %232, %236 : vector<1x8x10xf32>
    %238 = arith.truncf %237 : vector<1x8x10xf32> to vector<1x8x10xbf16>
    %239 = vector.shape_cast %238 : vector<1x8x10xbf16> to vector<8x10xbf16>
    %240 = vector.shape_cast %223 : vector<1x10x8xbf16> to vector<10x8xbf16>
    %cst_71 = arith.constant dense<0.000000e+00> : vector<8x8xf32>
    %241 = tpu.matmul %239, %240, %cst_71 {dimension_numbers = #tpu.dot_dimension_numbers<[1], [0], [0], [1], [0, 0, 1, 1], [], []>} : vector<8x10xbf16>, vector<10x8xbf16>, vector<8x8xf32> -> vector<8x8xf32>
    %c0_72 = arith.constant 0 : index
    %c8_73 = arith.constant 8 : index
    %242 = vector.load %arg20[%c0_72, %c8_73] : memref<8x32xf32, #tpu.memory_space<vmem>>, vector<8x8xf32>
    tpu.vector_store %arg20[%c0_72, %c8_73], %241 {strides = array<i32>} : memref<8x32xf32, #tpu.memory_space<vmem>>, vector<8x8xf32>,
    %243 = vector.extract_strided_slice %190 {offsets = [0, 0, 16], sizes = [1, 8, 8], strides = [1, 1, 1]} : vector<1x8x32xf32> to vector<1x8x8xf32>
    %244 = arith.truncf %243 : vector<1x8x8xf32> to vector<1x8x8xbf16>
    %245 = vector.extract_strided_slice %191 {offsets = [0, 0, 16], sizes = [1, 10, 8], strides = [1, 1, 1]} : vector<1x10x32xf32> to vector<1x10x8xf32>
    %246 = arith.truncf %245 : vector<1x10x8xf32> to vector<1x10x8xbf16>
    %247 = vector.extract_strided_slice %192 {offsets = [0, 0, 16], sizes = [1, 10, 8], strides = [1, 1, 1]} : vector<1x10x32xf32> to vector<1x10x8xf32>
    %248 = arith.truncf %247 : vector<1x10x8xf32> to vector<1x10x8xbf16>
    %249 = vector.shape_cast %244 : vector<1x8x8xbf16> to vector<8x8xbf16>
    %250 = vector.shape_cast %246 : vector<1x10x8xbf16> to vector<10x8xbf16>
    %cst_74 = arith.constant dense<0.000000e+00> : vector<8x10xf32>
    %251 = tpu.matmul %249, %250, %cst_74 {dimension_numbers = #tpu.dot_dimension_numbers<[1], [1], [0], [0], [0, 0, 1, 0], [], []>} : vector<8x8xbf16>, vector<10x8xbf16>, vector<8x10xf32> -> vector<8x10xf32>
    %252 = vector.shape_cast %251 : vector<8x10xf32> to vector<1x8x10xf32>
    %cst_75 = arith.constant dense<0xFF800000> : vector<1x8xf32>
    %253 = vector.multi_reduction <maximumf>, %252, %cst_75 [2] : vector<1x8x10xf32> to vector<1x8xf32>
    %254 = vector.shape_cast %253 : vector<1x8xf32> to vector<1x8x1xf32>
    %255 = vector.broadcast %254 : vector<1x8x1xf32> to vector<1x8x10xf32>
    %256 = arith.subf %252, %255 : vector<1x8x10xf32>
    %257 = math.exp %256 : vector<1x8x10xf32>
    %cst_76 = arith.constant dense<0.000000e+00> : vector<1x8xf32>
    %258 = vector.multi_reduction <add>, %257, %cst_76 [2] : vector<1x8x10xf32> to vector<1x8xf32>
    %259 = vector.shape_cast %258 : vector<1x8xf32> to vector<1x8x1xf32>
    %260 = tpu.reciprocal %259 {approx = true} : vector<1x8x1xf32> -> vector<1x8x1xf32>
    %261 = vector.broadcast %260 : vector<1x8x1xf32> to vector<1x8x10xf32>
    %262 = arith.mulf %257, %261 : vector<1x8x10xf32>
    %263 = arith.truncf %262 : vector<1x8x10xf32> to vector<1x8x10xbf16>
    %264 = vector.shape_cast %263 : vector<1x8x10xbf16> to vector<8x10xbf16>
    %265 = vector.shape_cast %248 : vector<1x10x8xbf16> to vector<10x8xbf16>
    %cst_77 = arith.constant dense<0.000000e+00> : vector<8x8xf32>
    %266 = tpu.matmul %264, %265, %cst_77 {dimension_numbers = #tpu.dot_dimension_numbers<[1], [0], [0], [1], [0, 0, 1, 1], [], []>} : vector<8x10xbf16>, vector<10x8xbf16>, vector<8x8xf32> -> vector<8x8xf32>
    %c0_78 = arith.constant 0 : index
    %c16_79 = arith.constant 16 : index
    %267 = vector.load %arg20[%c0_78, %c16_79] : memref<8x32xf32, #tpu.memory_space<vmem>>, vector<8x8xf32>
    tpu.vector_store %arg20[%c0_78, %c16_79], %266 {strides = array<i32>} : memref<8x32xf32, #tpu.memory_space<vmem>>, vector<8x8xf32>,
    %268 = vector.extract_strided_slice %190 {offsets = [0, 0, 24], sizes = [1, 8, 8], strides = [1, 1, 1]} : vector<1x8x32xf32> to vector<1x8x8xf32>
    %269 = arith.truncf %268 : vector<1x8x8xf32> to vector<1x8x8xbf16>
    %270 = vector.extract_strided_slice %191 {offsets = [0, 0, 24], sizes = [1, 10, 8], strides = [1, 1, 1]} : vector<1x10x32xf32> to vector<1x10x8xf32>
    %271 = arith.truncf %270 : vector<1x10x8xf32> to vector<1x10x8xbf16>
    %272 = vector.extract_strided_slice %192 {offsets = [0, 0, 24], sizes = [1, 10, 8], strides = [1, 1, 1]} : vector<1x10x32xf32> to vector<1x10x8xf32>
    %273 = arith.truncf %272 : vector<1x10x8xf32> to vector<1x10x8xbf16>
    %274 = vector.shape_cast %269 : vector<1x8x8xbf16> to vector<8x8xbf16>
    %275 = vector.shape_cast %271 : vector<1x10x8xbf16> to vector<10x8xbf16>
    %cst_80 = arith.constant dense<0.000000e+00> : vector<8x10xf32>
    %276 = tpu.matmul %274, %275, %cst_80 {dimension_numbers = #tpu.dot_dimension_numbers<[1], [1], [0], [0], [0, 0, 1, 0], [], []>} : vector<8x8xbf16>, vector<10x8xbf16>, vector<8x10xf32> -> vector<8x10xf32>
    %277 = vector.shape_cast %276 : vector<8x10xf32> to vector<1x8x10xf32>
    %cst_81 = arith.constant dense<0xFF800000> : vector<1x8xf32>
    %278 = vector.multi_reduction <maximumf>, %277, %cst_81 [2] : vector<1x8x10xf32> to vector<1x8xf32>
    %279 = vector.shape_cast %278 : vector<1x8xf32> to vector<1x8x1xf32>
    %280 = vector.broadcast %279 : vector<1x8x1xf32> to vector<1x8x10xf32>
    %281 = arith.subf %277, %280 : vector<1x8x10xf32>
    %282 = math.exp %281 : vector<1x8x10xf32>
    %cst_82 = arith.constant dense<0.000000e+00> : vector<1x8xf32>
    %283 = vector.multi_reduction <add>, %282, %cst_82 [2] : vector<1x8x10xf32> to vector<1x8xf32>
    %284 = vector.shape_cast %283 : vector<1x8xf32> to vector<1x8x1xf32>
    %285 = tpu.reciprocal %284 {approx = true} : vector<1x8x1xf32> -> vector<1x8x1xf32>
    %286 = vector.broadcast %285 : vector<1x8x1xf32> to vector<1x8x10xf32>
    %287 = arith.mulf %282, %286 : vector<1x8x10xf32>
    %288 = arith.truncf %287 : vector<1x8x10xf32> to vector<1x8x10xbf16>
    %289 = vector.shape_cast %288 : vector<1x8x10xbf16> to vector<8x10xbf16>
    %290 = vector.shape_cast %273 : vector<1x10x8xbf16> to vector<10x8xbf16>
    %cst_83 = arith.constant dense<0.000000e+00> : vector<8x8xf32>
    %291 = tpu.matmul %289, %290, %cst_83 {dimension_numbers = #tpu.dot_dimension_numbers<[1], [0], [0], [1], [0, 0, 1, 1], [], []>} : vector<8x10xbf16>, vector<10x8xbf16>, vector<8x8xf32> -> vector<8x8xf32>
    %c0_84 = arith.constant 0 : index
    %c24_85 = arith.constant 24 : index
    %292 = vector.load %arg20[%c0_84, %c24_85] : memref<8x32xf32, #tpu.memory_space<vmem>>, vector<8x8xf32>
    tpu.vector_store %arg20[%c0_84, %c24_85], %291 {strides = array<i32>} : memref<8x32xf32, #tpu.memory_space<vmem>>, vector<8x8xf32>,
    %c0_86 = arith.constant 0 : index
    %c0_87 = arith.constant 0 : index
    %293 = vector.load %arg20[%c0_86, %c0_87] : memref<8x32xf32, #tpu.memory_space<vmem>>, vector<8x32xf32>
    %294 = arith.truncf %293 : vector<8x32xf32> to vector<8x32xbf16>
    %c0_88 = arith.constant 0 : index
    %c0_89 = arith.constant 0 : index
    %295 = vector.load %arg14[%c0_88, %c0_89] : memref<32x32xbf16, #tpu.memory_space<vmem>>, vector<32x32xbf16>
    %cst_90 = arith.constant dense<0.000000e+00> : vector<8x32xf32>
    %296 = tpu.matmul %294, %295, %cst_90 {dimension_numbers = #tpu.dot_dimension_numbers<[1], [0], [0], [1], [0, 0, 1, 1], [], []>} : vector<8x32xbf16>, vector<32x32xbf16>, vector<8x32xf32> -> vector<8x32xf32>
    %297 = arith.addf %154, %296 : vector<8x32xf32>
    %c0_91 = arith.constant 0 : index
    %c0_92 = arith.constant 0 : index
    %298 = vector.load %arg8[%c0_91, %c0_92] : memref<1x32xf32, #tpu.memory_space<vmem>>, vector<1x32xf32>
    %c0_93 = arith.constant 0 : index
    %c0_94 = arith.constant 0 : index
    %299 = vector.load %arg9[%c0_93, %c0_94] : memref<1x32xf32, #tpu.memory_space<vmem>>, vector<1x32xf32>
    %cst_95 = arith.constant dense<0.000000e+00> : vector<8xf32>
    %300 = vector.multi_reduction <add>, %297, %cst_95 [1] : vector<8x32xf32> to vector<8xf32>
    %301 = vector.shape_cast %300 : vector<8xf32> to vector<8x1xf32>
    %cst_96 = arith.constant 3.200000e+01 : f32
    %302 = vector.broadcast %cst_96 : f32 to vector<8x1xf32>
    %303 = arith.divf %301, %302 : vector<8x1xf32>
    %304 = vector.broadcast %303 : vector<8x1xf32> to vector<8x32xf32>
    %305 = arith.subf %297, %304 : vector<8x32xf32>
    %306 = arith.mulf %305, %305 : vector<8x32xf32>
    %cst_97 = arith.constant dense<0.000000e+00> : vector<8xf32>
    %307 = vector.multi_reduction <add>, %306, %cst_97 [1] : vector<8x32xf32> to vector<8xf32>
    %308 = vector.shape_cast %307 : vector<8xf32> to vector<8x1xf32>
    %cst_98 = arith.constant 3.100000e+01 : f32
    %309 = vector.broadcast %cst_98 : f32 to vector<8x1xf32>
    %310 = arith.divf %308, %309 : vector<8x1xf32>
    %311 = math.sqrt %310 : vector<8x1xf32>
    %cst_99 = arith.constant 9.99999997E-7 : f32
    %312 = vector.broadcast %cst_99 : f32 to vector<8x1xf32>
    %313 = arith.addf %311, %312 : vector<8x1xf32>
    %314 = tpu.reciprocal %313 {approx = true} : vector<8x1xf32> -> vector<8x1xf32>
    %315 = vector.broadcast %303 : vector<8x1xf32> to vector<8x32xf32>
    %316 = arith.subf %297, %315 : vector<8x32xf32>
    %317 = vector.broadcast %298 : vector<1x32xf32> to vector<8x32xf32>
    %318 = arith.mulf %317, %316 : vector<8x32xf32>
    %319 = vector.broadcast %314 : vector<8x1xf32> to vector<8x32xf32>
    %320 = arith.mulf %318, %319 : vector<8x32xf32>
    %321 = vector.broadcast %299 : vector<1x32xf32> to vector<8x32xf32>
    %322 = arith.addf %320, %321 : vector<8x32xf32>
    %323 = arith.truncf %322 : vector<8x32xf32> to vector<8x32xbf16>
    %c0_100 = arith.constant 0 : index
    %c0_101 = arith.constant 0 : index
    %324 = vector.load %arg15[%c0_100, %c0_101] : memref<32x64xbf16, #tpu.memory_space<vmem>>, vector<32x64xbf16>
    %cst_102 = arith.constant dense<0.000000e+00> : vector<8x64xf32>
    %325 = tpu.matmul %323, %324, %cst_102 {dimension_numbers = #tpu.dot_dimension_numbers<[1], [0], [0], [1], [0, 0, 1, 1], [], []>} : vector<8x32xbf16>, vector<32x64xbf16>, vector<8x64xf32> -> vector<8x64xf32>
    %c0_103 = arith.constant 0 : index
    %c0_104 = arith.constant 0 : index
    %326 = vector.load %arg16[%c0_103, %c0_104] : memref<1x64xf32, #tpu.memory_space<vmem>>, vector<1x64xf32>
    %327 = vector.broadcast %326 : vector<1x64xf32> to vector<8x64xf32>
    %328 = arith.addf %325, %327 : vector<8x64xf32>
    %cst_105 = arith.constant 0.000000e+00 : f32
    %329 = vector.broadcast %cst_105 : f32 to vector<8x64xf32>
    %330 = arith.maximumf %328, %329 : vector<8x64xf32>
    %331 = arith.truncf %330 : vector<8x64xf32> to vector<8x64xbf16>
    %c0_106 = arith.constant 0 : index
    %c0_107 = arith.constant 0 : index
    %332 = vector.load %arg17[%c0_106, %c0_107] : memref<64x32xbf16, #tpu.memory_space<vmem>>, vector<64x32xbf16>
    %cst_108 = arith.constant dense<0.000000e+00> : vector<8x32xf32>
    %333 = tpu.matmul %331, %332, %cst_108 {dimension_numbers = #tpu.dot_dimension_numbers<[1], [0], [0], [1], [0, 0, 1, 1], [], []>} : vector<8x64xbf16>, vector<64x32xbf16>, vector<8x32xf32> -> vector<8x32xf32>
    %c0_109 = arith.constant 0 : index
    %c0_110 = arith.constant 0 : index
    %334 = vector.load %arg18[%c0_109, %c0_110] : memref<1x32xf32, #tpu.memory_space<vmem>>, vector<1x32xf32>
    %335 = vector.broadcast %334 : vector<1x32xf32> to vector<8x32xf32>
    %336 = arith.addf %333, %335 : vector<8x32xf32>
    %cst_111 = arith.constant 0.000000e+00 : f32
    %337 = vector.broadcast %cst_111 : f32 to vector<8x32xf32>
    %338 = arith.maximumf %336, %337 : vector<8x32xf32>
    %339 = arith.addf %297, %338 : vector<8x32xf32>
    %340 = vector.shape_cast %339 : vector<8x32xf32> to vector<1x8x32xf32>
    %c0_112 = arith.constant 0 : index
    %c0_113 = arith.constant 0 : index
    %c0_114 = arith.constant 0 : index
    %341 = vector.load %arg19[%c0_112, %c0_113, %c0_114] : memref<1x8x32xf32, #tpu.memory_space<vmem>>, vector<1x8x32xf32>
    tpu.vector_store %arg19[%c0_112, %c0_113, %c0_114], %340 {strides = array<i32>} : memref<1x8x32xf32, #tpu.memory_space<vmem>>, vector<1x8x32xf32>,
    return
  }
  func.func @transform_0(%arg0: i32) -> (i32, i32, i32) {
    %c0_i32 = arith.constant 0 : i32
    %c0_i32_0 = arith.constant 0 : i32
    %c0_i32_1 = arith.constant 0 : i32
    return %arg0, %c0_i32, %c0_i32_0 : i32, i32, i32
  }
  func.func @transform_1(%arg0: i32) -> (i32, i32, i32) {
    %c0_i32 = arith.constant 0 : i32
    %c0_i32_0 = arith.constant 0 : i32
    %c0_i32_1 = arith.constant 0 : i32
    return %arg0, %c0_i32, %c0_i32_0 : i32, i32, i32
  }
  func.func @transform_2(%arg0: i32) -> (i32, i32, i32) {
    %c0_i32 = arith.constant 0 : i32
    %c0_i32_0 = arith.constant 0 : i32
    %c0_i32_1 = arith.constant 0 : i32
    return %arg0, %c0_i32, %c0_i32_0 : i32, i32, i32
  }
  func.func @transform_3(%arg0: i32) -> (i32, i32) {
    %c0_i32 = arith.constant 0 : i32
    %c0_i32_0 = arith.constant 0 : i32
    %c0_i32_1 = arith.constant 0 : i32
    return %c0_i32, %c0_i32_0 : i32, i32
  }
  func.func @transform_4(%arg0: i32) -> (i32, i32) {
    %c0_i32 = arith.constant 0 : i32
    %c0_i32_0 = arith.constant 0 : i32
    %c0_i32_1 = arith.constant 0 : i32
    return %c0_i32, %c0_i32_0 : i32, i32
  }
  func.func @transform_5(%arg0: i32) -> (i32, i32) {
    %c0_i32 = arith.constant 0 : i32
    %c0_i32_0 = arith.constant 0 : i32
    %c0_i32_1 = arith.constant 0 : i32
    return %c0_i32, %c0_i32_0 : i32, i32
  }
  func.func @transform_6(%arg0: i32) -> (i32, i32) {
    %c0_i32 = arith.constant 0 : i32
    %c0_i32_0 = arith.constant 0 : i32
    %c0_i32_1 = arith.constant 0 : i32
    return %c0_i32, %c0_i32_0 : i32, i32
  }
  func.func @transform_7(%arg0: i32) -> (i32, i32) {
    %c0_i32 = arith.constant 0 : i32
    %c0_i32_0 = arith.constant 0 : i32
    %c0_i32_1 = arith.constant 0 : i32
    return %c0_i32, %c0_i32_0 : i32, i32
  }
  func.func @transform_8(%arg0: i32) -> (i32, i32) {
    %c0_i32 = arith.constant 0 : i32
    %c0_i32_0 = arith.constant 0 : i32
    %c0_i32_1 = arith.constant 0 : i32
    return %c0_i32, %c0_i32_0 : i32, i32
  }
  func.func @transform_9(%arg0: i32) -> (i32, i32) {
    %c0_i32 = arith.constant 0 : i32
    %c0_i32_0 = arith.constant 0 : i32
    %c0_i32_1 = arith.constant 0 : i32
    return %c0_i32, %c0_i32_0 : i32, i32
  }
  func.func @transform_10(%arg0: i32) -> (i32, i32) {
    %c0_i32 = arith.constant 0 : i32
    %c0_i32_0 = arith.constant 0 : i32
    %c0_i32_1 = arith.constant 0 : i32
    return %c0_i32, %c0_i32_0 : i32, i32
  }
  func.func @transform_11(%arg0: i32) -> (i32, i32) {
    %c0_i32 = arith.constant 0 : i32
    %c0_i32_0 = arith.constant 0 : i32
    %c0_i32_1 = arith.constant 0 : i32
    return %c0_i32, %c0_i32_0 : i32, i32
  }
  func.func @transform_12(%arg0: i32) -> (i32, i32) {
    %c0_i32 = arith.constant 0 : i32
    %c0_i32_0 = arith.constant 0 : i32
    %c0_i32_1 = arith.constant 0 : i32
    return %c0_i32, %c0_i32_0 : i32, i32
  }
  func.func @transform_13(%arg0: i32) -> (i32, i32) {
    %c0_i32 = arith.constant 0 : i32
    %c0_i32_0 = arith.constant 0 : i32
    %c0_i32_1 = arith.constant 0 : i32
    return %c0_i32, %c0_i32_0 : i32, i32
  }
  func.func @transform_14(%arg0: i32) -> (i32, i32) {
    %c0_i32 = arith.constant 0 : i32
    %c0_i32_0 = arith.constant 0 : i32
    %c0_i32_1 = arith.constant 0 : i32
    return %c0_i32, %c0_i32_0 : i32, i32
  }
  func.func @transform_15(%arg0: i32) -> (i32, i32) {
    %c0_i32 = arith.constant 0 : i32
    %c0_i32_0 = arith.constant 0 : i32
    %c0_i32_1 = arith.constant 0 : i32
    return %c0_i32, %c0_i32_0 : i32, i32
  }
  func.func @transform_16(%arg0: i32) -> (i32, i32) {
    %c0_i32 = arith.constant 0 : i32
    %c0_i32_0 = arith.constant 0 : i32
    %c0_i32_1 = arith.constant 0 : i32
    return %c0_i32, %c0_i32_0 : i32, i32
  }
  func.func @transform_17(%arg0: i32) -> (i32, i32) {
    %c0_i32 = arith.constant 0 : i32
    %c0_i32_0 = arith.constant 0 : i32
    %c0_i32_1 = arith.constant 0 : i32
    return %c0_i32, %c0_i32_0 : i32, i32
  }
  func.func @transform_18(%arg0: i32) -> (i32, i32, i32) {
    %c0_i32 = arith.constant 0 : i32
    %c0_i32_0 = arith.constant 0 : i32
    %c0_i32_1 = arith.constant 0 : i32
    return %arg0, %c0_i32, %c0_i32_0 : i32, i32, i32
  }
}

</mosaic_0001>

<bundles_post_ra>
// kernel: tpu_custom_call.1
= control target key start
LH: loop header
LB: loop body
LE: loop exit
PB: predicated region body
PF: predicated region fallthrough
CT: control target
= control target key end

     0   :  { %s3737_s0 = inlined_call_operand.vmem [shape: f32[2,8,32], index: 0, kind: input, shape index: {}]   ;;  %s3738_s1 = inlined_call_operand.vmem [shape: f32[2,10,32], index: 1, kind: input, shape index: {}]   ;;  %s3739_s2 = inlined_call_operand.hbm [shape: f32[2,1,8], index: 2, kind: input, shape index: {}]   ;;  %s3740_s3 = inlined_call_operand.hbm [shape: f32[1,32], index: 3, kind: input, shape index: {}]   ;;  %s3741_s4 = inlined_call_operand.hbm [shape: f32[1,32], index: 4, kind: input, shape index: {}]   ;;  %s3742_s5 = inlined_call_operand.hbm [shape: f32[1,32], index: 5, kind: input, shape index: {}]   ;;  %s3743_s6 = inlined_call_operand.hbm [shape: f32[1,32], index: 6, kind: input, shape index: {}]   ;;  %s3744_s7 = inlined_call_operand.hbm [shape: f32[1,32], index: 7, kind: input, shape index: {}]   ;;  %s3745_s8 = inlined_call_operand.vmem [shape: f32[1,32], index: 8, kind: input, shape index: {}]   ;;  %s3746_s9 = inlined_call_operand.vmem [shape: bf16[32,96], index: 9, kind: input, shape index: {}]   ;;  %s3747_s10 = inlined_call_operand.vmem [shape: bf16[32,32], index: 10, kind: input, shape index: {}]   ;;  %s3748_s11 = inlined_call_operand.vmem [shape: bf16[32,32], index: 11, kind: input, shape index: {}]   ;;  %s3749_s12 = inlined_call_operand.vmem [shape: bf16[32,64], index: 12, kind: input, shape index: {}]   ;;  %s3750_s13 = inlined_call_operand.vmem [shape: bf16[32,32], index: 13, kind: input, shape index: {}]   ;;  %s3751_s14 = inlined_call_operand.hbm [shape: bf16[32,64], index: 14, kind: input, shape index: {}]   ;;  %s3752_s15 = inlined_call_operand.vmem [shape: f32[1,64], index: 15, kind: input, shape index: {}]   ;;  %s3753_s16 = inlined_call_operand.vmem [shape: bf16[64,32], index: 16, kind: input, shape index: {}]   ;;  %s3754_s17 = inlined_call_operand.vmem [shape: f32[1,32], index: 17, kind: input, shape index: {}]   ;;  %s3755_s18 = inlined_call_operand.hbm [shape: f32[2,8,32], index: 18, kind: output, shape index: {}]  }
   0x1   :  { %3771 = sst [smem:[#allocation24_spill]] %s3737_s0 }
   0x2   :  { %3772 = sst [smem:[#allocation25_spill]] %s3738_s1 }
   0x3   :  { %3773 = sst [smem:[#allocation26_spill]] %s3739_s2 }
   0x4   :  { %3774 = sst [smem:[#allocation27_spill]] %s3740_s3 }
   0x5   :  { %3775 = sst [smem:[#allocation28_spill]] %s3741_s4 }
   0x6   :  { %3776 = sst [smem:[#allocation29_spill]] %s3742_s5 }
   0x7   :  { %3777 = sst [smem:[#allocation30_spill]] %s3743_s6 }
   0x8   :  { %3778 = sst [smem:[#allocation31_spill]] %s3744_s7 }
   0x9   :  { %3779 = sst [smem:[#allocation32_spill]] %s3751_s14 }
   0xa   :  { %3780 = sst [smem:[#allocation33_spill]] %s3754_s17 }
   0xb   :  { %3781 = sst [smem:[#allocation34_spill]] %s3755_s18 }
   0xc   :  { %23 = vsyncpa [#allocation4], 0 }
   0xd   :  { %25 = vsyncpa [#allocation4 + $0x1], 0 }
   0xe   :  { %26 = vsyncpa [#allocation7], 0 }
   0xf   :  { %27 = vsyncpa [#allocation10], 0 }
  0x10   :  { %28 = vsyncpa [#allocation13], 0 }
  0x11   :  { %29 = vsyncpa [#allocation5], 0 }
  0x12   :  { %31 = vsyncpa [#allocation5 + $0x1], 0  ;;  %s3229_s27 = smov 0   ;;  %s3231_s28 = smov 0  }
  0x13   :  { %s3233_s29 = smov 0   ;;  %s3235_s30 = smov 0  }
  0x14 LB: > { %3782 = sst [smem:[#allocation21_spill]] %s3102_s29  ;;  %s3108_s0 = smov [#allocation6]   ;;  %s3106_s30 = sphi %s3235_s30, %s3822_s30   ;;  %s3102_s29 = sphi %s3233_s29, %s3824_s29   ;;  %s3098_s28 = sphi %s3231_s28, %s3826_s28   ;;  %s3094_s27 = sphi %s3229_s27, %s3825_s27  }
  0x15   : > { %s474_s19 = sshll.u32 %s3108_s0, 4  ;;  %s3250_s1 = sadd.s32 4294967295, %s3106_s30   ;;  %s475_s19 = int_to_ptr.vmem [resolvable:$true] %s474_s19 }
  0x16   : > { %p2377_p0 = scmp.ge.s32.totalorder %s3106_s30, 1  ;;  %p3758_p1 = scmp.eq.s32.totalorder %s3250_s1, 0 }
  0x17   : > { %p461_p2 = scmp.lt.s32.totalorder %s3106_s30, 3  ;;  %s3109_s21 = smov [#allocation9]  }
  0x18   : > { %s496_s22 = sshll.u32 %s3109_s21, 4  ;;  %s3110_s2 = smov [#allocation12]   ;;  %s3262_s22 = int_to_ptr.vmem [resolvable:$true] %s496_s22 }
  0x19   : > { %p3255_p3 = pnand %p2377_p0, %p461_p2  ;;  %s518_s23 = sshll.u32 %s3110_s2, 4  ;;  %s3270_s23 = int_to_ptr.vmem [resolvable:$true] %s518_s23 }
  0x1a   : > { %s3111_s25 = smov [#allocation8]   ;;  %s2857_s21 = scalar_lea.vmem %s475_s19, 16 }
  0x1b   : > { %s3783_s20 = scalar_select %p3255_p3, 1, 0 }
  0x1c   : > { %p2689_p5 = pneg %p3255_p3  ;;  %s3272_s26 = sshll.u32 %s3111_s25, 4  ;;  %s486_s26 = int_to_ptr.vmem [resolvable:$true] %s3272_s26 }
  0x1d   : > { %p2858_p8 = scmp.ne.s32.totalorder %s475_s19, %s2857_s21  ;;  %s2864_s2 = scalar_lea.vmem %s475_s19, 32 }
  0x1e   : > { %p3266_p6 = pnand %p2689_p5, %p3758_p1  ;;  %p2865_p11 = scmp.lt.s32.totalorder %s475_s19, %s475_s19 }
  0x1f   : > { %p2866_p12 = scmp.lt.s32.totalorder %s2864_s2, %s2857_s21 }
  0x20   : > { %p3276_p7 = pneg %p3266_p6 }
  0x21   : > { %p2867_p13 = por %p2866_p12, %p2865_p11 }
  0x22   : > { %p2860_p9 = pnand %p2858_p8, %p3276_p7 }
  0x24   : > { %p2861_p10 = pneg %p2860_p9 }
  0x26   : > { %p2868_p0 = pnand %p2867_p13, %p2861_p10 }
  0x28   : > { %2871 = shalt.err (!%p2868_p0)
}
  0x29   : > { %s3786_s3 = sld [smem:[#allocation27_spill]]  ;;  %s2883_s17 = scalar_lea.vmem %s3262_s22, 16 }
  0x2a   : > { %p2884_p2 = scmp.ne.s32.totalorder %s3262_s22, %s2883_s17  ;;  %s2890_s21 = scalar_lea.vmem %s3262_s22, 32 }
  0x2b   : > { %p2891_p9 = scmp.lt.s32.totalorder %s3262_s22, %s3262_s22  ;;  %p2892_p10 = scmp.lt.s32.totalorder %s2890_s21, %s2883_s17 }
  0x2c   : > { %p2886_p5 = pnand %p2884_p2, %p3276_p7 }
  0x2d   : > { %p2893_p11 = por %p2892_p10, %p2891_p9 }
  0x2e   : > { %p2887_p8 = pneg %p2886_p5 }
  0x2f   : > { %2692 = dma.hbm_to_vmem [thread:$0]  (!%p3266_p6), %s3786_s3, 16, %s475_s19, [#allocation7]  }
  0x30   : > { %p2894_p12 = pnand %p2893_p11, %p2887_p8 }
  0x32   : > { %2897 = shalt.err (!%p2894_p12)
}
  0x33   : > { %s3787_s5 = sld [smem:[#allocation29_spill]]  ;;  %s2909_s19 = scalar_lea.vmem %s3270_s23, 16 }
  0x34   : > { %p2910_p13 = scmp.ne.s32.totalorder %s3270_s23, %s2909_s19  ;;  %s2916_s17 = scalar_lea.vmem %s3270_s23, 32 }
  0x35   : > { %p2917_p5 = scmp.lt.s32.totalorder %s3270_s23, %s3270_s23  ;;  %p2918_p8 = scmp.lt.s32.totalorder %s2916_s17, %s2909_s19 }
  0x36   : > { %p2912_p0 = pnand %p2910_p13, %p3276_p7 }
  0x37   : > { %p2919_p9 = por %p2918_p8, %p2917_p5 }
  0x38   : > { %p2913_p2 = pneg %p2912_p0 }
  0x39   : > { %2698 = dma.hbm_to_vmem [thread:$0]  (!%p3266_p6), %s3787_s5, 16, %s3262_s22, [#allocation10]  }
  0x3a   : > { %p2920_p10 = pnand %p2919_p9, %p2913_p2 }
  0x3c   : > { %2923 = shalt.err (!%p2920_p10)
}
  0x3d   : > { %s3788_s7 = sld [smem:[#allocation31_spill]]  ;;  %s3112_s22 = smov [#allocation11]  }
  0x3e   : > { %s507_s18 = sshll.u32 %s3112_s22, 4  ;;  %s2935_s2 = scalar_lea.vmem %s486_s26, 16  ;;  %s508_s18 = int_to_ptr.vmem [resolvable:$true] %s507_s18 }
  0x3f   : > { %p2936_p11 = scmp.ne.s32.totalorder %s486_s26, %s2935_s2  ;;  %s2942_s19 = scalar_lea.vmem %s486_s26, 32 }
  0x40   : > { %p2943_p0 = scmp.lt.s32.totalorder %s486_s26, %s486_s26  ;;  %p2944_p2 = scmp.lt.s32.totalorder %s2942_s19, %s2935_s2 }
  0x41   : > { %p2938_p12 = pnand %p2936_p11, %p3276_p7 }
  0x42   : > { %p2945_p5 = por %p2944_p2, %p2943_p0 }
  0x43   : > { %2704 = dma.hbm_to_vmem [thread:$0]  (!%p3266_p6), %s3788_s7, 16, %s3270_s23, [#allocation13]  }
  0x44   : > { %p2939_p13 = pneg %p2938_p12 }
  0x46   : > { %p2946_p8 = pnand %p2945_p5, %p2939_p13 }
  0x48   : > { %2949 = shalt.err (!%p2946_p8)
}
  0x49   : > { %s3789_s4 = sld [smem:[#allocation28_spill]]  ;;  %s2961_s23 = scalar_lea.vmem %s508_s18, 16 }
  0x4a   : > { %p2962_p9 = scmp.ne.s32.totalorder %s508_s18, %s2961_s23  ;;  %s2968_s21 = scalar_lea.vmem %s508_s18, 32 }
  0x4b   : > { %p2969_p12 = scmp.lt.s32.totalorder %s508_s18, %s508_s18  ;;  %p2970_p4 = scmp.lt.s32.totalorder %s2968_s21, %s2961_s23 }
  0x4c   : > { %p2964_p10 = pnand %p2962_p9, %p3276_p7 }
  0x4d   : > { %p2971_p1 = por %p2970_p4, %p2969_p12 }
  0x4e   : > { %p2965_p11 = pneg %p2964_p10 }
  0x4f   : > { %2695 = dma.hbm_to_vmem [thread:$0]  (!%p3266_p6), %s3789_s4, 16, %s486_s26, [#allocation7]  }
  0x50   : > { %p2972_p0 = pnand %p2971_p1, %p2965_p11 }
  0x52   : > { %2975 = shalt.err (!%p2972_p0)
}
  0x53   : > { %s3790_s6 = sld [smem:[#allocation30_spill]]  ;;  %s3113_s26 = smov [#allocation14]  }
  0x54   : > { %s546_s19 = sshll.u32 %s3113_s26, 4  ;;  %s547_s19 = int_to_ptr.vmem [resolvable:$true] %s546_s19 }
  0x55   : > { %s2987_s17 = scalar_lea.vmem %s547_s19, 256  ;;  %p2995_p8 = scmp.lt.s32.totalorder %s547_s19, %s547_s19 }
  0x56   : > { %p2988_p13 = scmp.ne.s32.totalorder %s547_s19, %s2987_s17  ;;  %p2996_p9 = scmp.lt.s32.totalorder %s2987_s17, %s2987_s17 }
  0x58   : > { %p2990_p2 = pnand %p2988_p13, %p3276_p7  ;;  %p2997_p4 = por %p2996_p9, %p2995_p8 }
  0x59   : > { %2701 = dma.hbm_to_vmem [thread:$0]  (!%p3266_p6), %s3790_s6, 16, %s508_s18, [#allocation10]  }
  0x5a   : > { %p2991_p5 = pneg %p2990_p2 }
  0x5c   : > { %p2998_p1 = pnand %p2997_p4, %p2991_p5 }
  0x5e   : > { %3001 = shalt.err (!%p2998_p1)
}
  0x5f   : > { %s3114_s25 = smov 64   ;;  %s3115_s0 = smov 4  }
  0x60   : > { %s3791_s14 = sld [smem:[#allocation32_spill]]  ;;  %s2376_s21 = sadd.s32 4294967294, %s3106_s30  }
  0x61   : > { %s3337_s22 = sadd.s32 1, %s3106_s30   ;;  %s96_s26 = sadd.s32 1, %s3102_s29 }
  0x62   : > { %3792 = sst [smem:[#allocation22_spill]] %s3337_s22  ;;  %s93_s2 = ssub.s32 %s3106_s30, %s3337_s22 }
  0x63   : > { %p94_p7 = scmp.eq.s32.totalorder %s93_s2, 0  ;;  %p103_p10 = scmp.ne.s32.totalorder %s3102_s29, %s3098_s28 }
  0x64   : > { %p104_p11 = scmp.eq.s32.totalorder %s3106_s30, 0  ;;  %p109_p12 = scmp.ne.s32.totalorder %s3098_s28, %s3094_s27 }
  0x65   : > { %s3348_s17 = scalar_select %p94_p7, %s3102_s29, %s96_s26  }
  0x66   : > { %2707 = dma.hbm_to_vmem [thread:$0]  (!%p3266_p6), %s3791_s14, 256, %s547_s19, [#allocation13], %s3114_s25, %s3114_s25, %s3115_s0  }
  0x67   : > { %3793 = sst [smem:[#allocation23_spill]] %s3348_s17  ;;  %p3350_p0 = por %p104_p11, %p103_p10 }
  0x68   : > { %p3795_p13 = scmp.eq.s32.totalorder %s3250_s1, 0  ;;  %p448_p2 = scmp.eq.s32.totalorder %s3250_s1, 1 }
  0x69   : > { %p454_p5 = scmp.eq.s32.totalorder %s2376_s21, 1  ;;  %p2722_p8 = scmp.lt.s32.totalorder %s3106_s30, 2 }
  0x6a   : > { %p3356_p6 = por %p3795_p13, %p109_p12  ;;  %s584_s25 = sand.u32 1, %s3102_s29  }
  0x6b   : > { %p3363_p9 = por %p448_p2, %p103_p10  ;;  %p3367_p4 = por %p454_p5, %p109_p12 }
  0x6c   : > { %s3796_s19 = scalar_select %p3356_p6, 1, 0 }
  0x6d   : > { %s3797_s0 = scalar_select %p3363_p9, 1, 0 }
  0x6e   : > { %s3798_s18 = scalar_select %p3367_p4, 1, 0 }
  0x6f   : > { %s2385_s23 = sshll.u32 %s3106_s30, 4  ;;  %s587_s2 = scalar_lea.vmem [#allocation3], %s584_s25 }
  0x70   : > { %s594_s26 = sshll.u32 %s587_s2, 4  ;;  %s3799_s5 = sld [smem:[#allocation26_spill]]  ;;  %s595_s26 = int_to_ptr.vmem [resolvable:$true] %s594_s26 }
  0x71   : > { %p3379_p1 = pnand %p2722_p8, %p3350_p0  ;;  %s585_s7 = scalar_lea.sflag [#allocation4], %s584_s25 }
  0x73   : > { %p3004_p10 = pneg %p3379_p1 }
  0x76   : > { %s3375_s6 = scalar_lea.hbm %s3799_s5, %s2385_s23  ;;  %s3007_s23 = scalar_lea.hbm %s3799_s5, 32 }
  0x77   : > { %s3002_s14 = scalar_lea.hbm %s3375_s6, 16  ;;  %p3008_p13 = scmp.lt.s32.totalorder %s3375_s6, %s3799_s5 }
  0x78   : > { %p3003_p7 = scmp.ne.s32.totalorder %s3375_s6, %s3002_s14  ;;  %p3009_p0 = scmp.lt.s32.totalorder %s3007_s23, %s3002_s14 }
  0x7a   : > { %p3005_p11 = pnand %p3004_p10, %p3003_p7  ;;  %p3010_p2 = por %p3009_p0, %p3008_p13 }
  0x7c   : > { %p3006_p12 = pneg %p3005_p11 }
  0x7e   : > { %p3011_p5 = pnand %p3010_p2, %p3006_p12 }
  0x80   : > { %3014 = shalt.err (!%p3011_p5)
}
  0x81   : > { %s3015_s24 = scalar_lea.vmem %s595_s26, 16  ;;  %s3116_s25 = smov [#allocation3]  }
  0x82   : > { %p3016_p8 = scmp.ne.s32.totalorder %s595_s26, %s3015_s24  ;;  %s3020_s29 = sshll.u32 %s3116_s25, 4  ;;  %s3021_s29 = int_to_ptr.vmem [resolvable:$false] %s3020_s29 }
  0x83   : > { %s3022_s22 = scalar_lea.vmem %s3021_s29, 32  ;;  %p3023_p7 = scmp.lt.s32.totalorder %s595_s26, %s3021_s29 }
  0x84   : > { %p3018_p4 = pnand %p3016_p8, %p3004_p10  ;;  %p3024_p11 = scmp.lt.s32.totalorder %s3022_s22, %s3015_s24 }
  0x86   : > { %p3019_p9 = pneg %p3018_p4  ;;  %p3025_p6 = por %p3024_p11, %p3023_p7 }
  0x88   : > { %p3026_p3 = pnand %p3025_p6, %p3019_p9 }
  0x8a   : > { %3029 = shalt.err (!%p3026_p3)
}
  0x8b   : > { %2711 = dma.hbm_to_vmem [thread:$0]  (!%p3379_p1), %s3375_s6, 16, %s595_s26, %s585_s7  }
  0x8c   : > { %p3801_p12 = scmp.ne.s32.totalorder %s3783_s20, 0 }
  0x8d   : > { %s3400_s14 = sand.u32 (!%p3801_p12), 1, %s3098_s28   ;;  %p3802_p4 = scmp.ne.s32.totalorder (!%p3801_p12), %s3796_s19, 0 }
  0x8e   : > { %603 = sbr.rel (%p3801_p12) target bundleno = 4339 (0x10f3), region = 92  ;;  %s606_s17 = scalar_lea.sflag (!%p3801_p12), [#allocation4], %s3400_s14 }
  0x8f   : > { %s608_s3 = scalar_lea.vmem (!%p3801_p12), [#allocation3], %s3400_s14 }
  0x93   : > { %3073 = dma.done.wait (%p3802_p4), %s606_s17, 16  }
  0x94   : > { %3075 = vsyncadd (%p3802_p4), %s606_s17, 4294967280  ;;  %p3803_p3 = scmp.eq.s32.totalorder %s3250_s1, 0 }
  0x96   : > { %3077 = dma.done.wait (%p3803_p3), [#allocation7], 32   ;;  %p3804_p6 = pmov %p3803_p3 }
  0x97   : > { %p3805_p9 = pmov %p3803_p3 }
  0x98   : > { %3079 = vsyncadd (%p3804_p6), [#allocation7], 4294967264 }
  0x99   : > { %3081 = dma.done.wait (%p3805_p9), [#allocation10], 32   ;;  %p3806_p1 = pmov %p3803_p3 }
  0x9b   : > { %3083 = vsyncadd (%p3806_p1), [#allocation10], 4294967264  ;;  %p3807_p10 = pmov %p3806_p1 }
  0x9c   : > { %p3808_p13 = pmov %p3806_p1 }
  0x9d   : > { %3085 = dma.done.wait (%p3807_p10), [#allocation13], 272  }
  0x9e   : > { %3087 = vsyncadd (%p3808_p13), [#allocation13], 4294967024  ;;  %p693_p0 = scmp.lt.s32.totalorder %s3250_s1, 1  ;;  %s3809_s22 = sld [smem:[#allocation24_spill]]  ;;  %vm720_vm0 = vcmask 261120   ;;  %v2786_v7 = vld [vmem:[%s3746_s9 + $0x8] sm:$0xff]   ;;  %v704_v41 = vlaneseq }
  0x9f   : > { %v3117_v8 = vmov 0.0   ;;  %vm3118_vm1 = vmmov 0   ;;  %v2787_v9 = vld [vmem:[%s3746_s9] sm:$0xff]   ;;  %v2398_v18 = vld [vmem:[#allocation6] ss:$0 sm:$0xff]  ;;  %s3119_s2 = smov 120  }
  0xa0   : > { %s3422_s6 = scalar_select %p693_p0, %s3250_s1, 1  ;;  %2505 = vmatprep.subr.bf16.mxu1 %v3117_v8  ;;  %2509 = vmatprep.mubr.msk.bf16.mxu1 %vm3118_vm1, %v3117_v8  ;;  %v2399_v21 = vld [vmem:[#allocation8] ss:$0 sm:$0xff]  ;;  %vm821_vm4 = vcmask 64512   ;;  %v705_v42 = vshrl.u32 %v704_v41, 7  ;;  %v707_v43 = vand.u32 127, %v704_v41 }
  0xa1   : > { %2506 = vmatpush3.bf16.msra.mxu1 %v2786_v7  ;;  %2519 = vmatprep.subr.bf16.mxu0 %v3117_v8  ;;  %s3770_s24 = smov 96   ;;  %s3121_s25 = smov 88   ;;  %v2397_v45 = vld [vmem:[%s608_s3] ss:$0 sm:$0xff]  ;;  %vm886_vm6 = vcmask 1043456   ;;  %vm1046_vm7 = vcmask 130112  }
  0xa2   : > { %s2394_s7 = sshll.u32 %s3422_s6, 3  ;;  %2507 = vmatprep.subr.bf16.mxu1 %v3117_v8  ;;  %2521 = vmatprep.mubr.msk.bf16.mxu0 %vm3118_vm1, %v3117_v8  ;;  %s3768_s17 = smov 80   ;;  %vm708_vm5 = vcmp.gt.s32.totalorder %v707_v43, %v705_v42  ;;  %vm1163_vm8 = vcmask 195712   ;;  %vm1280_vm9 = vcmask 261312   ;;  %vm1551_vm12 = vcmask 80896  }
  0xa3   : > { %s3769_s29 = smov 72   ;;  %s3125_s20 = smov 104   ;;  %v709_v44 = vsel %vm708_vm5, -1e+09, %v3117_v8  ;;  %vm1570_vm13 = vcmask 1044480  }
  0xa4   : > { %s696_s19 = scalar_lea.vmem %s3809_s22, %s2394_s7  ;;  %s3123_s7 = smov 112   ;;  %v717_v46 = vadd.f32 %v2397_v45, %v709_v44 }
  0xa5   : > { %v3428_v0 = vld [vmem:[%s696_s19] sm:$0xff]  ;;  %2508 = vmatpush3.bf16.msra.mxu1 %v2787_v9  ;;  %s3126_s3 = smov 64   ;;  %s3127_s22 = smov 56  }
  0xa6   : > { %v721_v1 = vsel %vm720_vm0, %v3428_v0, 0.0  ;;  %2513 = vmatprep.subr.bf16.mxu1 %v3117_v8  ;;  %s3128_s19 = smov 48   ;;  %s3129_s26 = smov 40  }
  0xa7   : > { %722 = vadd.xlane.f32.xlu0 %v721_v1  ;;  %s3767_s21 = smov 8   ;;  %s2449_s4 = sshll.u32 %s3422_s6, 4 }
  0xa8   : > { %s3816_s23 = smov 24   ;;  %p3819_p5 = scmp.ne.s32.totalorder %s3797_s0, 0 }
 0x130   : > { %v723_v2 = vpop.xlane.xlu0 %722 }
 0x131   : > { %v725_v3 = vmul.f32 0.03125, %v723_v2 }
 0x133   : > { %v726_v4 = vsub.f32 %v3428_v0, %v725_v3 }
 0x135   : > { %v727_v5 = vmul.f32 %v726_v4, %v726_v4  ;;  %v748_v19 = vmul.f32 %v2398_v18, %v726_v4 }
 0x137   : > { %v728_v6 = vsel %vm720_vm0, %v727_v5, 0.0 }
 0x138   : > { %729 = vadd.xlane.f32.xlu0 %v728_v6 }
 0x1c1   : > { %v730_v10 = vpop.xlane.xlu0 %729 }
 0x1c2   : > { %v732_v11 = vmul.f32 0.032258064, %v730_v10 }
 0x1c4   : > { %2802 = vrsqrt.f32 %v732_v11  ;;  %vm735_vm2 = vcmp.eq.f32.partialorder %v732_v11, inf  ;;  %v738_v14 = vand.u32 2147483648, %v732_v11  ;;  %vm737_vm3 = vcmp.eq.f32.partialorder %v732_v11, 0.0 }
 0x1d1   : > { %v2803_v12 = vpop.eup %2802 }
 0x1d2   : > { %v734_v13 = vmul.f32 %v2803_v12, %v732_v11 }
 0x1d4   : > { %v736_v15 = vsel %vm735_vm2, %v732_v11, %v734_v13 }
 0x1d5   : > { %v739_v16 = vsel %vm737_vm3, %v738_v14, %v736_v15 }
 0x1d6   : > { %v740_v17 = vadd.f32 1e-06, %v739_v16 }
 0x1d8   : > { %2804 = vrcp.f32 %v740_v17 }
 0x1e5   : > { %v2805_v20 = vpop.eup %2804 }
 0x1e6   : > { %v749_v22 = vmul.f32 %v2805_v20, %v748_v19 }
 0x1e8   : > { %v756_v23 = vadd.f32 %v2399_v21, %v749_v22 }
 0x1ea   : > { %v757_v24 = vpack.c.bf16 %v756_v23, %v756_v23 }
 0x1ec   : > { %2510 = vmatmul.mubr.msk.bf16.vlgmr.msra.gmra.mxu1 %vm720_vm0, %v757_v24 }
 0x1ed   : > { %2515 = vmatprep.mubr.msk.bf16.mxu1 %vm3118_vm1, %v3117_v8 }
 0x2ac   : > { %v811_v25 = vpop.f32.mrf.mxu1 }
 0x2ad   : > { %v3451_v26 = vpack.c.bf16 %v811_v25, %v811_v25 }
 0x2ae   : > { %v2511_v27 = vpop.f32.mrf.mxu1 }
 0x2af   : > { %931 = vrot.lane.b32.xlu0 %v3451_v26, %s3119_s2  ;;  %819 = vrot.lane.b32.xlu1 %v3451_v26, %s3770_s24  ;;  %s3812_s24 = smov 72  }
 0x2b0   : > { %v814_v28 = vpop.f32.mrf.mxu1 }
 0x2b2   : > { %v2512_v29 = vpop.f32.mrf.mxu1 }
 0x2b3   : > { %933 = vrot.lane.b32.xlu1 %v3451_v26, %s3121_s25 }
 0x2b7   : > { %1050 = vrot.lane.b32.xlu1 %v3451_v26, %s3768_s17  ;;  %s3813_s17 = smov 80  }
 0x2bb   : > { %1048 = vrot.lane.b32.xlu1 %v3451_v26, %s3123_s7 }
 0x2bf   : > { %1167 = vrot.lane.b32.xlu1 %v3451_v26, %s3769_s29 }
 0x2c3   : > { %1165 = vrot.lane.b32.xlu1 %v3451_v26, %s3125_s20 }
 0x321   : > { %v820_v30 = vpop.permute.xlu1 %819  ;;  %v932_v35 = vpop.permute.xlu0 %931 }
 0x322   : > { %v826_v31 = vsel %vm821_vm4, %v820_v30, 0 }
 0x323   : > { %2514 = vmatpush3.bf16.xpose.msra.mxu1 %v826_v31 }
 0x324   : > { %2525 = vmatprep.subr.bf16.mxu1 %v3117_v8 }
 0x325   : > { %v934_v32 = vpop.permute.xlu1 %933 }
 0x326   : > { %v939_v33 = vsel %vm821_vm4, %v934_v32, 0 }
 0x329   : > { %v1051_v34 = vpop.permute.xlu1 %1050 }
 0x32a   : > { %2516 = vmatmul.mubr.msk.bf16.vlgmr.msra.gmra.mxu1 %vm821_vm4, %v3451_v26  ;;  %v1056_v37 = vsel %vm821_vm4, %v1051_v34, 0 }
 0x32b   : > { %2526 = vmatpush3.bf16.xpose.msra.mxu1 %v939_v33  ;;  %2527 = vmatprep.mubr.msk.bf16.mxu1 %vm3118_vm1, %v3117_v8 }
 0x32c   : > { %2537 = vmatprep.subr.bf16.mxu1 %v3117_v8 }
 0x32d   : > { %v1049_v36 = vpop.permute.xlu1 %1048 }
 0x331   : > { %v1168_v38 = vpop.permute.xlu1 %1167 }
 0x332   : > { %2528 = vmatmul.mubr.msk.bf16.vlgmr.msra.gmra.mxu1 %vm821_vm4, %v932_v35  ;;  %v1173_v39 = vsel %vm821_vm4, %v1168_v38, 0 }
 0x333   : > { %2538 = vmatpush3.bf16.xpose.msra.mxu1 %v1056_v37  ;;  %2539 = vmatprep.mubr.msk.bf16.mxu1 %vm3118_vm1, %v3117_v8 }
 0x334   : > { %2549 = vmatprep.subr.bf16.mxu1 %v3117_v8 }
 0x335   : > { %v1166_v40 = vpop.permute.xlu1 %1165 }
 0x33a   : > { %2540 = vmatmul.mubr.msk.bf16.vlgmr.msra.gmra.mxu1 %vm821_vm4, %v1049_v36 }
 0x33b   : > { %2550 = vmatpush3.bf16.xpose.msra.mxu1 %v1173_v39  ;;  %2551 = vmatprep.mubr.msk.bf16.mxu1 %vm3118_vm1, %v3117_v8 }
 0x33c   : > { %2561 = vmatprep.subr.bf16.mxu1 %v3117_v8 }
 0x342   : > { %2552 = vmatmul.mubr.msk.bf16.vlgmr.msra.gmra.mxu1 %vm821_vm4, %v1166_v40 }
 0x343   : > { %2565 = vmatprep.mubr.msk.bf16.mxu1 %vm3118_vm1, %v3117_v8 }
 0x3ea   : > { %v862_v47 = vpop.f32.mrf.mxu1 }
 0x3eb   : > { %v868_v48 = vadd.f32 %v862_v47, %v717_v46 }
 0x3ec   : > { %v2517_v49 = vpop.f32.mrf.mxu1 }
 0x3ed   : > { %v869_v50 = vsel %vm821_vm4, %v868_v48, -inf }
 0x3ee   : > { %870 = vmax.xlane.f32.xlu1 %v869_v50  ;;  %v865_v51 = vpop.f32.mrf.mxu1 }
 0x3f0   : > { %v2518_v52 = vpop.f32.mrf.mxu1 }
 0x3f2   : > { %v975_v53 = vpop.f32.mrf.mxu1 }
 0x3f3   : > { %v981_v54 = vadd.f32 %v975_v53, %v717_v46 }
 0x3f4   : > { %v2529_v55 = vpop.f32.mrf.mxu1 }
 0x3f5   : > { %v982_v56 = vsel %vm821_vm4, %v981_v54, -inf }
 0x3f6   : > { %983 = vmax.xlane.f32.xlu0 %v982_v56  ;;  %v978_v57 = vpop.f32.mrf.mxu1 }
 0x3f8   : > { %v2530_v58 = vpop.f32.mrf.mxu1 }
 0x3fa   : > { %v1092_v59 = vpop.f32.mrf.mxu1 }
 0x3fb   : > { %v1098_v60 = vadd.f32 %v1092_v59, %v717_v46 }
 0x3fc   : > { %v2541_v61 = vpop.f32.mrf.mxu1 }
 0x3fd   : > { %v1099_v62 = vsel %vm821_vm4, %v1098_v60, -inf  ;;  %v2788_v61 = vld [vmem:[%s3747_s10 + $0x8] sm:$0xff]  }
 0x3fe   : > { %1100 = vmax.xlane.f32.xlu1 %v1099_v62  ;;  %v1095_v63 = vpop.f32.mrf.mxu1  ;;  %2562 = vmatpush3.bf16.msra.mxu1 %v2788_v61  ;;  %v2789_v62 = vld [vmem:[%s3747_s10] sm:$0xff]  }
 0x3ff   : > { %2563 = vmatprep.subr.bf16.mxu1 %v3117_v8 }
 0x400   : > { %v2542_v1 = vpop.f32.mrf.mxu1 }
 0x402   : > { %v1209_v2 = vpop.f32.mrf.mxu1  ;;  %2564 = vmatpush3.bf16.msra.mxu1 %v2789_v62 }
 0x403   : > { %v1215_v3 = vadd.f32 %v1209_v2, %v717_v46  ;;  %2577 = vmatprep.subr.bf16.mxu1 %v3117_v8 }
 0x404   : > { %v2553_v4 = vpop.f32.mrf.mxu1 }
 0x405   : > { %v1216_v5 = vsel %vm821_vm4, %v1215_v3, -inf }
 0x406   : > { %1217 = vmax.xlane.f32.xlu0 %v1216_v5  ;;  %v1212_v6 = vpop.f32.mrf.mxu1 }
 0x408   : > { %v2554_v7 = vpop.f32.mrf.mxu1 }
 0x477   : > { %v871_v9 = vpop.xlane.xlu1 %870 }
 0x478   : > { %v872_v10 = vsub.f32 %v868_v48, %v871_v9 }
 0x47a   : > { %v873_v11 = vmul.f32 1.442695, %v872_v10 }
 0x47c   : > { %2806 = vpow2.f32 %v873_v11 }
 0x47f   : > { %v984_v12 = vpop.xlane.xlu0 %983 }
 0x480   : > { %v985_v13 = vsub.f32 %v981_v54, %v984_v12 }
 0x482   : > { %v986_v14 = vmul.f32 1.442695, %v985_v13 }
 0x484   : > { %2808 = vpow2.f32 %v986_v14 }
 0x487   : > { %v1101_v24 = vpop.xlane.xlu1 %1100 }
 0x488   : > { %v1102_v25 = vsub.f32 %v1098_v60, %v1101_v24 }
 0x489   : > { %v2807_v15 = vpop.eup %2806 }
 0x48a   : > { %v875_v16 = vsel %vm821_vm4, %v2807_v15, 0.0  ;;  %v1103_v27 = vmul.f32 1.442695, %v1102_v25 }
 0x48b   : > { %876 = vadd.xlane.f32.xlu1 %v875_v16 }
 0x48f   : > { %v1218_v17 = vpop.xlane.xlu0 %1217 }
 0x490   : > { %v1219_v18 = vsub.f32 %v1215_v3, %v1218_v17 }
 0x491   : > { %v2809_v19 = vpop.eup %2808 }
 0x492   : > { %v1220_v20 = vmul.f32 1.442695, %v1219_v18  ;;  %v988_v21 = vsel %vm821_vm4, %v2809_v19, 0.0 }
 0x493   : > { %989 = vadd.xlane.f32.xlu0 %v988_v21 }
 0x494   : > { %2810 = vpow2.f32 %v1220_v20 }
 0x495   : > { %2812 = vpow2.f32 %v1103_v27 }
 0x49c   : > { %881 = vrot.lane.b32.xlu1 %v3451_v26, %s3126_s3  ;;  %s3817_s3 = sld [smem:[#allocation33_spill]] }
 0x4a1   : > { %v2811_v22 = vpop.eup %2810 }
 0x4a2   : > { %v1222_v23 = vsel %vm821_vm4, %v2811_v22, 0.0  ;;  %v2813_v28 = vpop.eup %2812 }
 0x4a3   : > { %1223 = vadd.xlane.f32.xlu0 %v1222_v23  ;;  %v1105_v29 = vsel %vm821_vm4, %v2813_v28, 0.0 }
 0x4b9   : > { %994 = vrot.lane.b32.xlu0 %v3451_v26, %s3127_s22  ;;  %s3810_s22 = sld [smem:[#allocation25_spill]] }
 0x4c0   : > { %1106 = vadd.xlane.f32.xlu1 %v1105_v29 }
 0x4d1   : > { %1111 = vrot.lane.b32.xlu1 %v3451_v26, %s3128_s19  ;;  %s3766_s19 = smov 16  }
 0x4d5   : > { %1228 = vrot.lane.b32.xlu1 %v3451_v26, %s3129_s26  ;;  %s3765_s26 = smov 24  }
 0x514   : > { %v877_v30 = vpop.xlane.xlu1 %876 }
 0x515   : > { %2814 = vrcp.f32 %v877_v30  ;;  %v2792_v30 = vld [vmem:[%s3748_s11 + $0x8] sm:$0xff]  }
 0x518   : > { %v882_v31 = vpop.permute.xlu1 %881 }
 0x519   : > { %v888_v32 = vsel %vm886_vm6, %v882_v31, 0  ;;  %v2793_v31 = vld [vmem:[%s3748_s11] sm:$0xff]  }
 0x51a   : > { %2520 = vmatpush3.bf16.msra.mxu0 %v888_v32 }
 0x51b   : > { %2531 = vmatprep.subr.bf16.mxu0 %v3117_v8 }
 0x51c   : > { %v990_v33 = vpop.xlane.xlu0 %989 }
 0x51d   : > { %2816 = vrcp.f32 %v990_v33 }
 0x522   : > { %v2815_v34 = vpop.eup %2814 }
 0x523   : > { %v879_v35 = vmul.f32 %v2815_v34, %v2807_v15 }
 0x525   : > { %v880_v36 = vpack.c.bf16 %v879_v35, %v879_v35 }
 0x527   : > { %2522 = vmatmul.mubr.msk.bf16.vlgmr.msra.gmra.mxu0 %vm821_vm4, %v880_v36 }
 0x528   : > { %2533 = vmatprep.mubr.msk.bf16.mxu0 %vm3118_vm1, %v3117_v8 }
 0x52a   : > { %v2817_v26 = vpop.eup %2816 }
 0x52b   : > { %v992_v38 = vmul.f32 %v2817_v26, %v2809_v19 }
 0x52c   : > { %v1224_v37 = vpop.xlane.xlu0 %1223 }
 0x52d   : > { %v993_v41 = vpack.c.bf16 %v992_v38, %v992_v38 }
 0x530   : > { %v995_v39 = vpop.permute.xlu0 %994 }
 0x531   : > { %v1000_v40 = vsel %vm886_vm6, %v995_v39, 0  ;;  %v2414_v39 = vld [vmem:[#allocation9] ss:$0 sm:$0xff] }
 0x532   : > { %2532 = vmatpush3.bf16.msra.mxu0 %v1000_v40 }
 0x533   : > { %2543 = vmatprep.subr.bf16.mxu0 %v3117_v8 }
 0x535   : > { %2534 = vmatmul.mubr.msk.bf16.vlgmr.msra.gmra.mxu0 %vm821_vm4, %v993_v41 }
 0x536   : > { %2545 = vmatprep.mubr.msk.bf16.mxu0 %vm3118_vm1, %v3117_v8 }
 0x549   : > { %v1107_v42 = vpop.xlane.xlu1 %1106 }
 0x54a   : > { %2818 = vrcp.f32 %v1107_v42  ;;  %v2415_v42 = vld [vmem:[#allocation11] ss:$0 sm:$0xff] }
 0x54b   : > { %2820 = vrcp.f32 %v1224_v37 }
 0x54d   : > { %v1112_v43 = vpop.permute.xlu1 %1111 }
 0x54e   : > { %v1117_v44 = vsel %vm886_vm6, %v1112_v43, 0 }
 0x54f   : > { %2544 = vmatpush3.bf16.msra.mxu0 %v1117_v44 }
 0x550   : > { %2555 = vmatprep.subr.bf16.mxu0 %v3117_v8 }
 0x551   : > { %v1229_v47 = vpop.permute.xlu1 %1228 }
 0x552   : > { %v1234_v50 = vsel %vm886_vm6, %v1229_v47, 0 }
 0x557   : > { %v2819_v45 = vpop.eup %2818 }
 0x558   : > { %v1109_v46 = vmul.f32 %v2819_v45, %v2813_v28  ;;  %v2821_v49 = vpop.eup %2820  ;;  %v2791_v28 = vld [vmem:[%s3749_s12] sm:$0xff]  }
 0x559   : > { %v1226_v51 = vmul.f32 %v2821_v49, %v2811_v22 }
 0x55a   : > { %v1110_v48 = vpack.c.bf16 %v1109_v46, %v1109_v46 }
 0x55b   : > { %v1227_v52 = vpack.c.bf16 %v1226_v51, %v1226_v51 }
 0x55c   : > { %2546 = vmatmul.mubr.msk.bf16.vlgmr.msra.gmra.mxu0 %vm821_vm4, %v1110_v48 }
 0x55d   : > { %2556 = vmatpush3.bf16.msra.mxu0 %v1234_v50  ;;  %2557 = vmatprep.mubr.msk.bf16.mxu0 %vm3118_vm1, %v3117_v8 }
 0x55e   : > { %2569 = vmatprep.subr.bf16.mxu0 %v3117_v8 }
 0x564   : > { %2558 = vmatmul.mubr.msk.bf16.vlgmr.msra.gmra.mxu0 %vm821_vm4, %v1227_v52 }
 0x565   : > { %2573 = vmatprep.mubr.msk.bf16.mxu0 %vm3118_vm1, %v3117_v8  ;;  %2570 = vmatpush3.bf16.msra.mxu0 %v2792_v30 }
 0x566   : > { %2571 = vmatprep.subr.bf16.mxu0 %v3117_v8 }
 0x569   : > { %2572 = vmatpush3.bf16.msra.mxu0 %v2793_v31 }
 0x56a   : > { %2585 = vmatprep.subr.bf16.mxu0 %v3117_v8 }
 0x5e7   : > { %v924_v53 = vpop.f32.mrf.mxu0 }
 0x5e8   : > { %930 = vst.msk [vmem:[#allocation2] sm:$0xff] %vm821_vm4, %v924_v53 }
 0x5e9   : > { %v2523_v54 = vpop.f32.mrf.mxu0 }
 0x5eb   : > { %v927_v55 = vpop.f32.mrf.mxu0 }
 0x5ed   : > { %v2524_v56 = vpop.f32.mrf.mxu0 }
 0x5f5   : > { %v1036_v57 = vpop.f32.mrf.mxu0 }
 0x5f6   : > { %1043 = vrot.lane.b32.xlu0 %v1036_v57, %s3767_s21 }
 0x5f7   : > { %v2535_v58 = vpop.f32.mrf.mxu0 }
 0x5f9   : > { %v1039_v59 = vpop.f32.mrf.mxu0 }
 0x5fb   : > { %v2536_v60 = vpop.f32.mrf.mxu0 }
 0x61c   : > { %v1153_v63 = vpop.f32.mrf.mxu0 }
 0x61d   : > { %1160 = vrot.lane.b32.xlu1 %v1153_v63, %s3766_s19 }
 0x61e   : > { %v2547_v1 = vpop.f32.mrf.mxu0 }
 0x620   : > { %v1156_v2 = vpop.f32.mrf.mxu0 }
 0x622   : > { %v2548_v3 = vpop.f32.mrf.mxu0 }
 0x624   : > { %v1270_v4 = vpop.f32.mrf.mxu0 }
 0x625   : > { %1277 = vrot.lane.b32.xlu0 %v1270_v4, %s3765_s26  ;;  %s701_s26 = scalar_lea.vmem %s3810_s22, %s2449_s4  ;;  %s3815_s4 = smov 16  }
 0x626   : > { %v2559_v5 = vpop.f32.mrf.mxu0  ;;  %v1440_v25 = vld [vmem:[%s701_s26] sm:$0xff]  ;;  %v1441_v27 = vld [vmem:[%s701_s26 + $0x8] sm:$0x3]  ;;  %s2393_s26 = sshll.u32 %s3400_s14, 3  ;;  %s2446_s22 = sshll.u32 %s3250_s1, 7 }
 0x627   : > { %v1442_v29 = vpack.c.bf16 %v1441_v27, %v1440_v25  ;;  %s692_s6 = scalar_lea.vmem [#allocation15], %s2393_s26  ;;  %s3133_s1 = smov [#allocation15]  }
 0x628   : > { %v1273_v6 = vpop.f32.mrf.mxu0  ;;  %s2228_s21 = sshll.u32 %s692_s6, 4  ;;  %s3034_s29 = sshll.u32 %s3133_s1, 4  ;;  %s2229_s21 = int_to_ptr.vmem [resolvable:$true] %s2228_s21  ;;  %s3035_s29 = int_to_ptr.vmem [resolvable:$false] %s3034_s29 }
 0x629   : > { %p3037_p11 = scmp.lt.s32.totalorder %s2229_s21, %s3035_s29 }
 0x62a   : > { %v2560_v7 = vpop.f32.mrf.mxu0 }
 0x668   : > { %v1044_v9 = vpop.permute.xlu0 %1043 }
 0x669   : > { %1047 = vst.msk [vmem:[#allocation2] sm:$0xff] %vm1046_vm7, %v1044_v9 }
 0x68f   : > { %v1161_v10 = vpop.permute.xlu1 %1160 }
 0x690   : > { %1164 = vst.msk [vmem:[#allocation2] sm:$0xff] %vm1163_vm8, %v1161_v10 }
 0x697   : > { %v1278_v11 = vpop.permute.xlu0 %1277 }
 0x698   : > { %1281 = vst.msk [vmem:[#allocation2] sm:$0xff] %vm1280_vm9, %v1278_v11 }
 0x69f   : > { %v1282_v12 = vld [vmem:[#allocation2] sm:$0xff] }
 0x6a0   : > { %v1283_v13 = vpack.c.bf16 %v1282_v12, %v1282_v12 }
 0x6a2   : > { %2566 = vmatmul.mubr.msk.bf16.vlgmr.msra.gmra.mxu1 %vm720_vm0, %v1283_v13 }
 0x6a3   : > { %2581 = vmatprep.mubr.msk.bf16.mxu1 %vm3118_vm1, %v3117_v8 }
 0x762   : > { %v1337_v14 = vpop.f32.mrf.mxu1 }
 0x763   : > { %v3542_v15 = vadd.f32 %v1337_v14, %v3428_v0  ;;  %v2790_v0 = vld [vmem:[%s3749_s12 + $0x8] sm:$0xff]  }
 0x764   : > { %v2567_v16 = vpop.f32.mrf.mxu1  ;;  %2578 = vmatpush3.bf16.msra.mxu1 %v2790_v0 }
 0x765   : > { %v1346_v17 = vsel %vm720_vm0, %v3542_v15, 0.0  ;;  %2579 = vmatprep.subr.bf16.mxu1 %v3117_v8 }
 0x766   : > { %1347 = vadd.xlane.f32.xlu1 %v1346_v17  ;;  %v1340_v18 = vpop.f32.mrf.mxu1 }
 0x768   : > { %v2568_v19 = vpop.f32.mrf.mxu1  ;;  %2580 = vmatpush3.bf16.msra.mxu1 %v2791_v28 }
 0x769   : > { %2591 = vmatprep.subr.bf16.mxu1 %v3117_v8 }
 0x76b   : > { %2582 = vmatmul.mubr.msk.bf16.vlgmr.msra.gmra.mxu1 %vm720_vm0, %v1442_v29 }
 0x76c   : > { %2593 = vmatprep.mubr.msk.bf16.mxu1 %vm3118_vm1, %v3117_v8 }
 0x7ef   : > { %v1348_v20 = vpop.xlane.xlu1 %1347 }
 0x7f0   : > { %v1349_v21 = vmul.f32 0.03125, %v1348_v20 }
 0x7f2   : > { %v1350_v22 = vsub.f32 %v3542_v15, %v1349_v21 }
 0x7f4   : > { %v1351_v23 = vmul.f32 %v1350_v22, %v1350_v22  ;;  %v1371_v40 = vmul.f32 %v2414_v39, %v1350_v22 }
 0x7f6   : > { %v1352_v24 = vsel %vm720_vm0, %v1351_v23, 0.0 }
 0x7f7   : > { %1353 = vadd.xlane.f32.xlu0 %v1352_v24 }
 0x82b   : > { %v1496_v46 = vpop.f32.mrf.mxu1 }
 0x82d   : > { %v2583_v47 = vpop.f32.mrf.mxu1 }
 0x82f   : > { %v1499_v48 = vpop.f32.mrf.mxu1 }
 0x830   : > { %v3574_v49 = vpack.c.bf16 %v1499_v48, %v1496_v46 }
 0x831   : > { %v2584_v50 = vpop.f32.mrf.mxu1 }
 0x832   : > { %1618 = vrot.lane.b32.xlu0 %v3574_v49, %s3119_s2  ;;  %v1509_v51 = vsel %vm821_vm4, %v3574_v49, 0 }
 0x880   : > { %v1354_v32 = vpop.xlane.xlu0 %1353 }
 0x881   : > { %v1355_v33 = vmul.f32 0.032258064, %v1354_v32 }
 0x883   : > { %2822 = vrsqrt.f32 %v1355_v33  ;;  %vm1358_vm10 = vcmp.eq.f32.partialorder %v1355_v33, inf  ;;  %v1361_v36 = vand.u32 2147483648, %v1355_v33  ;;  %vm1360_vm11 = vcmp.eq.f32.partialorder %v1355_v33, 0.0 }
 0x890   : > { %v2823_v34 = vpop.eup %2822 }
 0x891   : > { %v1357_v35 = vmul.f32 %v2823_v34, %v1355_v33 }
 0x893   : > { %v1359_v26 = vsel %vm1358_vm10, %v1355_v33, %v1357_v35 }
 0x894   : > { %v1362_v37 = vsel %vm1360_vm11, %v1361_v36, %v1359_v26 }
 0x895   : > { %v1363_v38 = vadd.f32 1e-06, %v1362_v37 }
 0x897   : > { %2824 = vrcp.f32 %v1363_v38 }
 0x8a4   : > { %v2825_v41 = vpop.eup %2824  ;;  %v1619_v52 = vpop.permute.xlu0 %1618 }
 0x8a5   : > { %v1372_v43 = vmul.f32 %v2825_v41, %v1371_v40  ;;  %v1624_v56 = vsel %vm821_vm4, %v1619_v52, 0 }
 0x8a7   : > { %v1379_v44 = vadd.f32 %v2415_v42, %v1372_v43 }
 0x8a9   : > { %v1380_v45 = vpack.c.bf16 %v1379_v44, %v1379_v44 }
 0x8ab   : > { %2574 = vmatmul.mubr.msk.bf16.vlgmr.msra.gmra.mxu0 %vm720_vm0, %v1380_v45 }
 0x8ac   : > { %2587 = vmatprep.mubr.msk.bf16.mxu0 %vm3118_vm1, %v3117_v8  ;;  %2586 = vmatpush3.bf16.xpose.msra.mxu0 %v1509_v51 }
 0x8ad   : > { %2597 = vmatprep.subr.bf16.mxu0 %v3117_v8 }
 0x96b   : > { %v1434_v53 = vpop.f32.mrf.mxu0 }
 0x96c   : > { %v1503_v54 = vpack.c.bf16 %v1434_v53, %v1434_v53 }
 0x96d   : > { %v2575_v55 = vpop.f32.mrf.mxu0 }
 0x96e   : > { %1616 = vrot.lane.b32.xlu1 %v1503_v54, %s3119_s2  ;;  %1731 = vrot.lane.b32.xlu0 %v1503_v54, %s3123_s7  ;;  %s3811_s2 = smov 96  }
 0x96f   : > { %2588 = vmatmul.mubr.msk.bf16.vlgmr.msra.gmra.mxu0 %vm821_vm4, %v1503_v54  ;;  %v1437_v57 = vpop.f32.mrf.mxu0 }
 0x970   : > { %2598 = vmatpush3.bf16.xpose.msra.mxu0 %v1624_v56  ;;  %2599 = vmatprep.mubr.msk.bf16.mxu0 %vm3118_vm1, %v3117_v8 }
 0x971   : > { %v2576_v58 = vpop.f32.mrf.mxu0  ;;  %2609 = vmatprep.subr.bf16.mxu0 %v3117_v8 }
 0x972   : > { %1733 = vrot.lane.b32.xlu1 %v3574_v49, %s3123_s7  ;;  %1846 = vrot.lane.b32.xlu0 %v1503_v54, %s3125_s20  ;;  %s3030_s7 = scalar_lea.vmem %s2229_s21, 128 }
 0x973   : > { %p3031_p2 = scmp.ne.s32.totalorder %s2229_s21, %s3030_s7 }
 0x975   : > { %p3032_p8 = pnand %p3031_p2, %p3819_p5 }
 0x976   : > { %1848 = vrot.lane.b32.xlu1 %v3574_v49, %s3125_s20  ;;  %s3036_s20 = scalar_lea.vmem %s3035_s29, 256 }
 0x977   : > { %p3033_p7 = pneg %p3032_p8  ;;  %p3038_p12 = scmp.lt.s32.totalorder %s3036_s20, %s3030_s7 }
 0x979   : > { %p3039_p4 = por %p3038_p12, %p3037_p11 }
 0x97b   : > { %p3040_p3 = pnand %p3039_p4, %p3033_p7 }
 0x9e0   : > { %v1617_v59 = vpop.permute.xlu1 %1616  ;;  %v1732_v63 = vpop.permute.xlu0 %1731 }
 0x9e1   : > { %2600 = vmatmul.mubr.msk.bf16.vlgmr.msra.gmra.mxu0 %vm821_vm4, %v1617_v59 }
 0x9e2   : > { %2611 = vmatprep.mubr.msk.bf16.mxu0 %vm3118_vm1, %v3117_v8 }
 0x9e4   : > { %v1734_v60 = vpop.permute.xlu1 %1733  ;;  %v1847_v2 = vpop.permute.xlu0 %1846 }
 0x9e5   : > { %v1739_v61 = vsel %vm821_vm4, %v1734_v60, 0 }
 0x9e6   : > { %2610 = vmatpush3.bf16.xpose.msra.mxu0 %v1739_v61 }
 0x9e7   : > { %2621 = vmatprep.subr.bf16.mxu0 %v3117_v8 }
 0x9e8   : > { %v1849_v62 = vpop.permute.xlu1 %1848 }
 0x9e9   : > { %v1854_v1 = vsel %vm821_vm4, %v1849_v62, 0 }
 0x9ed   : > { %2612 = vmatmul.mubr.msk.bf16.vlgmr.msra.gmra.mxu0 %vm821_vm4, %v1732_v63 }
 0x9ee   : > { %2622 = vmatpush3.bf16.xpose.msra.mxu0 %v1854_v1  ;;  %2623 = vmatprep.mubr.msk.bf16.mxu0 %vm3118_vm1, %v3117_v8 }
 0x9ef   : > { %2633 = vmatprep.subr.bf16.mxu0 %v3117_v8 }
 0x9f5   : > { %2624 = vmatmul.mubr.msk.bf16.vlgmr.msra.gmra.mxu0 %vm821_vm4, %v1847_v2 }
 0x9f6   : > { %2637 = vmatprep.mubr.msk.bf16.mxu0 %vm3118_vm1, %v3117_v8 }
 0xa2f   : > { %v1545_v3 = vpop.f32.mrf.mxu0 }
 0xa30   : > { %v1552_v4 = vsel %vm1551_vm12, %v1545_v3, -inf }
 0xa31   : > { %1553 = vmax.xlane.f32.xlu1 %v1552_v4  ;;  %v2589_v5 = vpop.f32.mrf.mxu0 }
 0xa33   : > { %v1548_v6 = vpop.f32.mrf.mxu0 }
 0xa35   : > { %v2590_v7 = vpop.f32.mrf.mxu0 }
 0xaa1   : > { %v1660_v9 = vpop.f32.mrf.mxu0 }
 0xaa2   : > { %v1666_v10 = vsel %vm1551_vm12, %v1660_v9, -inf }
 0xaa3   : > { %1667 = vmax.xlane.f32.xlu0 %v1666_v10  ;;  %v2601_v11 = vpop.f32.mrf.mxu0 }
 0xaa5   : > { %v1663_v12 = vpop.f32.mrf.mxu0 }
 0xaa7   : > { %v2602_v13 = vpop.f32.mrf.mxu0 }
 0xaad   : > { %v1775_v14 = vpop.f32.mrf.mxu0 }
 0xaae   : > { %v1781_v16 = vsel %vm1551_vm12, %v1775_v14, -inf }
 0xaaf   : > { %1782 = vmax.xlane.f32.xlu0 %v1781_v16  ;;  %v2613_v17 = vpop.f32.mrf.mxu0 }
 0xab0   : > { %v2795_v17 = vld [vmem:[%s3750_s13] sm:$0xff]  }
 0xab1   : > { %v1778_v18 = vpop.f32.mrf.mxu0 }
 0xab3   : > { %v2614_v19 = vpop.f32.mrf.mxu0 }
 0xab5   : > { %v1890_v20 = vpop.f32.mrf.mxu0 }
 0xab6   : > { %v1896_v21 = vsel %vm1551_vm12, %v1890_v20, -inf }
 0xab7   : > { %1897 = vmax.xlane.f32.xlu1 %v1896_v21  ;;  %v2625_v22 = vpop.f32.mrf.mxu0 }
 0xab9   : > { %v1893_v23 = vpop.f32.mrf.mxu0 }
 0xaba   : > { %v1554_v24 = vpop.xlane.xlu1 %1553 }
 0xabb   : > { %v1555_v0 = vsub.f32 %v1545_v3, %v1554_v24  ;;  %v2626_v25 = vpop.f32.mrf.mxu0 }
 0xabd   : > { %v1556_v27 = vmul.f32 1.442695, %v1555_v0 }
 0xabf   : > { %2826 = vpow2.f32 %v1556_v27 }
 0xacc   : > { %v2827_v28 = vpop.eup %2826 }
 0xacd   : > { %v1558_v29 = vsel %vm1551_vm12, %v2827_v28, 0.0 }
 0xace   : > { %1559 = vadd.xlane.f32.xlu0 %v1558_v29 }
 0xb2c   : > { %v1668_v30 = vpop.xlane.xlu0 %1667 }
 0xb2d   : > { %v1669_v31 = vsub.f32 %v1660_v9, %v1668_v30 }
 0xb2f   : > { %v1670_v32 = vmul.f32 1.442695, %v1669_v31 }
 0xb31   : > { %2828 = vpow2.f32 %v1670_v32 }
 0xb38   : > { %v1783_v33 = vpop.xlane.xlu0 %1782 }
 0xb39   : > { %v1784_v34 = vsub.f32 %v1775_v14, %v1783_v33  ;;  %v2794_v14 = vld [vmem:[%s3750_s13 + $0x8] sm:$0xff]  }
 0xb3a   : > { %2634 = vmatpush3.bf16.msra.mxu0 %v2794_v14 }
 0xb3b   : > { %v1785_v35 = vmul.f32 1.442695, %v1784_v34  ;;  %2635 = vmatprep.subr.bf16.mxu0 %v3117_v8 }
 0xb3d   : > { %2830 = vpow2.f32 %v1785_v35 }
 0xb3e   : > { %v2829_v36 = vpop.eup %2828  ;;  %2636 = vmatpush3.bf16.msra.mxu0 %v2795_v17 }
 0xb3f   : > { %v1672_v26 = vsel %vm1551_vm12, %v2829_v36, 0.0  ;;  %2649 = vmatprep.subr.bf16.mxu0 %v3117_v8 }
 0xb40   : > { %1673 = vadd.xlane.f32.xlu1 %v1672_v26  ;;  %v1898_v39 = vpop.xlane.xlu1 %1897 }
 0xb41   : > { %v1899_v40 = vsub.f32 %v1890_v20, %v1898_v39 }
 0xb43   : > { %v1900_v41 = vmul.f32 1.442695, %v1899_v40  ;;  %v2796_v40 = vld [vmem:[#allocation14 + $0x8] sm:$0xff]  }
 0xb45   : > { %2832 = vpow2.f32 %v1900_v41  ;;  %v2797_v41 = vld [vmem:[#allocation14] sm:$0xff]  }
 0xb4a   : > { %v2831_v37 = vpop.eup %2830 }
 0xb4b   : > { %v1787_v38 = vsel %vm1551_vm12, %v2831_v37, 0.0 }
 0xb4c   : > { %1788 = vadd.xlane.f32.xlu0 %v1787_v38 }
 0xb51   : > { %1678 = vrot.lane.b32.xlu1 %v3574_v49, %s3121_s25  ;;  %s3814_s25 = smov 8  }
 0xb52   : > { %v2833_v42 = vpop.eup %2832 }
 0xb53   : > { %v1902_v43 = vsel %vm1551_vm12, %v2833_v42, 0.0 }
 0xb57   : > { %v1560_v44 = vpop.xlane.xlu0 %1559 }
 0xb58   : > { %2834 = vrcp.f32 %v1560_v44 }
 0xb62   : > { %1565 = vrot.lane.b32.xlu0 %v3574_v49, %s3811_s2 }
 0xb65   : > { %v2835_v46 = vpop.eup %2834 }
 0xb66   : > { %1908 = vrot.lane.b32.xlu0 %v3574_v49, %s3812_s24  ;;  %v1562_v48 = vmul.f32 %v2835_v46, %v2827_v28  ;;  %s3818_s24 = sld [smem:[#allocation34_spill]] }
 0xb68   : > { %v1563_v53 = vpack.c.bf16 %v1562_v48, %v1562_v48 }
 0xb75   : > { %1903 = vadd.xlane.f32.xlu1 %v1902_v43 }
 0xb86   : > { %1793 = vrot.lane.b32.xlu1 %v3574_v49, %s3813_s17  ;;  %s3699_s17 = scalar_lea.hbm %s3818_s24, %s2446_s22 }
 0xbc9   : > { %v1674_v45 = vpop.xlane.xlu1 %1673 }
 0xbca   : > { %2836 = vrcp.f32 %v1674_v45 }
 0xbcd   : > { %v1679_v52 = vpop.permute.xlu1 %1678 }
 0xbce   : > { %v1684_v55 = vsel %vm1570_vm13, %v1679_v52, 0  ;;  %v2433_v52 = vld [vmem:[#allocation12] ss:$0 sm:$0xff] }
 0xbd5   : > { %v1789_v47 = vpop.xlane.xlu0 %1788 }
 0xbd6   : > { %2838 = vrcp.f32 %v1789_v47 }
 0xbd7   : > { %v2837_v54 = vpop.eup %2836 }
 0xbd8   : > { %v1676_v49 = vmul.f32 %v2837_v54, %v2829_v36 }
 0xbd9   : > { %v1566_v50 = vpop.permute.xlu0 %1565 }
 0xbda   : > { %v1572_v51 = vsel %vm1570_vm13, %v1566_v50, 0  ;;  %v1677_v56 = vpack.c.bf16 %v1676_v49, %v1676_v49 }
 0xbdb   : > { %2592 = vmatpush3.bf16.msra.mxu1 %v1572_v51 }
 0xbdc   : > { %2603 = vmatprep.subr.bf16.mxu1 %v3117_v8 }
 0xbdd   : > { %v1909_v62 = vpop.permute.xlu0 %1908 }
 0xbde   : > { %2594 = vmatmul.mubr.msk.bf16.vlgmr.msra.gmra.mxu1 %vm1551_vm12, %v1563_v53  ;;  %v1914_v1 = vsel %vm1570_vm13, %v1909_v62, 0 }
 0xbdf   : > { %2604 = vmatpush3.bf16.msra.mxu1 %v1684_v55  ;;  %2605 = vmatprep.mubr.msk.bf16.mxu1 %vm3118_vm1, %v3117_v8  ;;  %v2434_v55 = vld [vmem:[%s3745_s8] ss:$0 sm:$0xff] }
 0xbe0   : > { %2615 = vmatprep.subr.bf16.mxu1 %v3117_v8 }
 0xbe3   : > { %v2839_v57 = vpop.eup %2838 }
 0xbe4   : > { %v1791_v59 = vmul.f32 %v2839_v57, %v2831_v37 }
 0xbe6   : > { %2606 = vmatmul.mubr.msk.bf16.vlgmr.msra.gmra.mxu1 %vm1551_vm12, %v1677_v56  ;;  %v1792_v63 = vpack.c.bf16 %v1791_v59, %v1791_v59  ;;  %v2801_v59 = vld [vmem:[%s3753_s16] sm:$0xff]  }
 0xbe7   : > { %2617 = vmatprep.mubr.msk.bf16.mxu1 %vm3118_vm1, %v3117_v8 }
 0xbfe   : > { %v1904_v58 = vpop.xlane.xlu1 %1903 }
 0xbff   : > { %2840 = vrcp.f32 %v1904_v58  ;;  %v2800_v58 = vld [vmem:[%s3753_s16 + $0x8] sm:$0xff]  }
 0xc02   : > { %v1794_v60 = vpop.permute.xlu1 %1793 }
 0xc03   : > { %v1799_v61 = vsel %vm1570_vm13, %v1794_v60, 0  ;;  %v2435_v60 = vld [vmem:[%s3752_s15] ss:$0 sm:$0xff] }
 0xc04   : > { %2616 = vmatpush3.bf16.msra.mxu1 %v1799_v61 }
 0xc05   : > { %2627 = vmatprep.subr.bf16.mxu1 %v3117_v8 }
 0xc07   : > { %2618 = vmatmul.mubr.msk.bf16.vlgmr.msra.gmra.mxu1 %vm1551_vm12, %v1792_v63 }
 0xc08   : > { %2628 = vmatpush3.bf16.msra.mxu1 %v1914_v1  ;;  %2629 = vmatprep.mubr.msk.bf16.mxu1 %vm3118_vm1, %v3117_v8 }
 0xc09   : > { %2641 = vmatprep.subr.bf16.mxu1 %v3117_v8 }
 0xc0c   : > { %v2841_v2 = vpop.eup %2840 }
 0xc0d   : > { %v1906_v3 = vmul.f32 %v2841_v2, %v2833_v42  ;;  %v2799_v42 = vld [vmem:[%s3753_s16 + $0x10] sm:$0xff]  }
 0xc0f   : > { %v1907_v4 = vpack.c.bf16 %v1906_v3, %v1906_v3 }
 0xc11   : > { %2630 = vmatmul.mubr.msk.bf16.vlgmr.msra.gmra.mxu1 %vm1551_vm12, %v1907_v4 }
 0xc12   : > { %2645 = vmatprep.mubr.msk.bf16.mxu1 %vm3118_vm1, %v3117_v8  ;;  %2642 = vmatpush3.bf16.msra.mxu1 %v2796_v40 }
 0xc13   : > { %2643 = vmatprep.subr.bf16.mxu1 %v3117_v8 }
 0xc16   : > { %2644 = vmatpush3.bf16.msra.mxu1 %v2797_v41 }
 0xc9e   : > { %v1608_v5 = vpop.f32.mrf.mxu1 }
 0xc9f   : > { %1614 = vst.msk [vmem:[#allocation2] sm:$0xff] %vm821_vm4, %v1608_v5 }
 0xca0   : > { %v2595_v6 = vpop.f32.mrf.mxu1 }
 0xca2   : > { %v1611_v7 = vpop.f32.mrf.mxu1 }
 0xca4   : > { %v2596_v9 = vpop.f32.mrf.mxu1 }
 0xca6   : > { %v1720_v10 = vpop.f32.mrf.mxu1 }
 0xca7   : > { %1727 = vrot.lane.b32.xlu1 %v1720_v10, %s3814_s25  ;;  %s2215_s25 = scalar_lea.sflag [#allocation5], %s3400_s14 }
 0xca8   : > { %v2607_v11 = vpop.f32.mrf.mxu1 }
 0xcaa   : > { %v1723_v12 = vpop.f32.mrf.mxu1 }
 0xcac   : > { %v2608_v13 = vpop.f32.mrf.mxu1 }
 0xcc7   : > { %v1835_v16 = vpop.f32.mrf.mxu1 }
 0xcc8   : > { %1842 = vrot.lane.b32.xlu0 %v1835_v16, %s3815_s4 }
 0xcc9   : > { %v2619_v18 = vpop.f32.mrf.mxu1 }
 0xccb   : > { %v1838_v19 = vpop.f32.mrf.mxu1 }
 0xccd   : > { %v2620_v20 = vpop.f32.mrf.mxu1 }
 0xcd1   : > { %v1950_v21 = vpop.f32.mrf.mxu1 }
 0xcd2   : > { %1957 = vrot.lane.b32.xlu1 %v1950_v21, %s3816_s23 }
 0xcd3   : > { %v2631_v22 = vpop.f32.mrf.mxu1 }
 0xcd5   : > { %v1953_v23 = vpop.f32.mrf.mxu1 }
 0xcd7   : > { %v2632_v24 = vpop.f32.mrf.mxu1 }
 0xd19   : > { %v1728_v0 = vpop.permute.xlu1 %1727 }
 0xd1a   : > { %1730 = vst.msk [vmem:[#allocation2] sm:$0xff] %vm1046_vm7, %v1728_v0 }
 0xd3a   : > { %v1843_v25 = vpop.permute.xlu0 %1842 }
 0xd3b   : > { %1845 = vst.msk [vmem:[#allocation2] sm:$0xff] %vm1163_vm8, %v1843_v25 }
 0xd44   : > { %v1958_v27 = vpop.permute.xlu1 %1957 }
 0xd45   : > { %1960 = vst.msk [vmem:[#allocation2] sm:$0xff] %vm1280_vm9, %v1958_v27 }
 0xd4c   : > { %v1961_v28 = vld [vmem:[#allocation2] sm:$0xff] }
 0xd4d   : > { %v1962_v29 = vpack.c.bf16 %v1961_v28, %v1961_v28 }
 0xd4f   : > { %2638 = vmatmul.mubr.msk.bf16.vlgmr.msra.gmra.mxu0 %vm720_vm0, %v1962_v29 }
 0xd50   : > { %2657 = vmatprep.mubr.msk.bf16.mxu0 %vm3118_vm1, %v3117_v8  ;;  %vm2167_vm1 = vcmask 523264  }
 0xe0f   : > { %v2016_v30 = vpop.f32.mrf.mxu0 }
 0xe10   : > { %v3661_v31 = vadd.f32 %v2016_v30, %v3542_v15  ;;  %v2798_v15 = vld [vmem:[%s3753_s16 + $0x18] sm:$0xff]  }
 0xe11   : > { %v2639_v32 = vpop.f32.mrf.mxu0  ;;  %2650 = vmatpush3.bf16.msra.mxu0 %v2798_v15 }
 0xe12   : > { %v2025_v33 = vsel %vm720_vm0, %v3661_v31, 0.0  ;;  %2651 = vmatprep.subr.bf16.mxu0 %v3117_v8 }
 0xe13   : > { %2026 = vadd.xlane.f32.xlu0 %v2025_v33  ;;  %v2019_v34 = vpop.f32.mrf.mxu0 }
 0xe15   : > { %v2640_v35 = vpop.f32.mrf.mxu0  ;;  %2652 = vmatpush3.bf16.msra.mxu0 %v2799_v42 }
 0xe16   : > { %2653 = vmatprep.subr.bf16.mxu0 %v3117_v8 }
 0xe19   : > { %2654 = vmatpush3.bf16.msra.mxu0 %v2800_v58 }
 0xe1a   : > { %2655 = vmatprep.subr.bf16.mxu0 %v3117_v8  ;;  %v2439_v8 = vld [vmem:[%s3817_s3] ss:$0 sm:$0xff] }
 0xe1d   : > { %2656 = vmatpush3.bf16.msra.mxu0 %v2801_v59 }
 0xe9c   : > { %v2027_v36 = vpop.xlane.xlu0 %2026 }
 0xe9d   : > { %v2028_v26 = vmul.f32 0.03125, %v2027_v36 }
 0xe9f   : > { %v2029_v37 = vsub.f32 %v3661_v31, %v2028_v26 }
 0xea1   : > { %v2030_v38 = vmul.f32 %v2029_v37, %v2029_v37  ;;  %v2050_v53 = vmul.f32 %v2433_v52, %v2029_v37 }
 0xea3   : > { %v2031_v39 = vsel %vm720_vm0, %v2030_v38, 0.0 }
 0xea4   : > { %2032 = vadd.xlane.f32.xlu1 %v2031_v39 }
 0xf2d   : > { %v2033_v43 = vpop.xlane.xlu1 %2032 }
 0xf2e   : > { %v2034_v44 = vmul.f32 0.032258064, %v2033_v43 }
 0xf30   : > { %2842 = vrsqrt.f32 %v2034_v44  ;;  %vm2037_vm14 = vcmp.eq.f32.partialorder %v2034_v44, inf  ;;  %v2040_v47 = vand.u32 2147483648, %v2034_v44  ;;  %vm2039_vm15 = vcmp.eq.f32.partialorder %v2034_v44, 0.0 }
 0xf3d   : > { %v2843_v45 = vpop.eup %2842 }
 0xf3e   : > { %v2036_v46 = vmul.f32 %v2843_v45, %v2034_v44 }
 0xf40   : > { %v2038_v48 = vsel %vm2037_vm14, %v2034_v44, %v2036_v46 }
 0xf41   : > { %v2041_v50 = vsel %vm2039_vm15, %v2040_v47, %v2038_v48 }
 0xf42   : > { %v2042_v51 = vadd.f32 1e-06, %v2041_v50 }
 0xf44   : > { %2844 = vrcp.f32 %v2042_v51 }
 0xf51   : > { %v2845_v54 = vpop.eup %2844 }
 0xf52   : > { %v2051_v49 = vmul.f32 %v2845_v54, %v2050_v53 }
 0xf54   : > { %v2058_v56 = vadd.f32 %v2434_v55, %v2051_v49 }
 0xf56   : > { %v2059_v57 = vpack.c.bf16 %v2058_v56, %v2058_v56 }
 0xf58   : > { %2646 = vmatmul.mubr.msk.bf16.vlgmr.msra.gmra.mxu1 %vm720_vm0, %v2059_v57 }
0x1018   : > { %v2120_v61 = vpop.f32.mrf.mxu1 }
0x1019   : > { %v2121_v62 = vadd.f32 %v2435_v60, %v2120_v61 }
0x101a   : > { %v2647_v63 = vpop.f32.mrf.mxu1 }
0x101b   : > { %v2126_v1 = vmax.f32 %v2121_v62, 0.0 }
0x101c   : > { %v2123_v2 = vpop.f32.mrf.mxu1 }
0x101d   : > { %v2127_v3 = vpack.c.bf16 %v2126_v1, %v2126_v1 }
0x101e   : > { %v2648_v4 = vpop.f32.mrf.mxu1 }
0x101f   : > { %2658 = vmatmul.mubr.msk.bf16.vlgmr.msra.gmra.mxu0 %vm2167_vm1, %v2127_v3 }
0x10df   : > { %v2205_v5 = vpop.f32.mrf.mxu0 }
0x10e0   : > { %v2206_v6 = vadd.f32 %v2439_v8, %v2205_v5 }
0x10e1   : > { %v2659_v7 = vpop.f32.mrf.mxu0 }
0x10e2   : > { %v2211_v9 = vmax.f32 %v2206_v6, 0.0 }
0x10e3   : > { %v2208_v10 = vpop.f32.mrf.mxu0 }
0x10e4   : > { %v2212_v11 = vadd.f32 %v2211_v9, %v3661_v31 }
0x10e5   : > { %v2660_v12 = vpop.f32.mrf.mxu0 }
0x10e6   : > { %2213 = vst.msk [vmem:[%s692_s6] sm:$0xff] %vm720_vm0, %v2212_v11 }
0x10e7   : > { %3043 = shalt.err (!%p3040_p3)
}
0x10e8   : > { %s3044_s26 = scalar_lea.hbm %s3699_s17, 128  ;;  %s3048_s23 = scalar_lea.hbm %s3818_s24, 256 }
0x10e9   : > { %p3045_p6 = scmp.ne.s32.totalorder %s3699_s17, %s3044_s26  ;;  %p3049_p10 = scmp.lt.s32.totalorder %s3699_s17, %s3818_s24 }
0x10ea   : > { %p3050_p13 = scmp.lt.s32.totalorder %s3048_s23, %s3044_s26 }
0x10eb   : > { %p3046_p9 = pnand %p3045_p6, %p3819_p5 }
0x10ec   : > { %p3051_p0 = por %p3050_p13, %p3049_p10 }
0x10ed   : > { %p3047_p1 = pneg %p3046_p9 }
0x10ef   : > { %p3052_p2 = pnand %p3051_p0, %p3047_p1 }
0x10f1   : > { %3055 = shalt.err (!%p3052_p2)
}
0x10f2   : > { %2687 = dma.vmem_to_hbm [thread:$0]  (%p3819_p5), %s2229_s21, 128, %s3699_s17, %s2215_s25  }
0x10f3 PF: > { %s2240_s6 = sand.u32 1, %s3094_s27   ;;  %p3820_p8 = scmp.ne.s32.totalorder %s3798_s18, 0 }
0x10f4   : > { %p3821_p7 = scmp.ge.s32.totalorder %s3106_s30, 2  ;;  %s2241_s19 = scalar_lea.sflag [#allocation5], %s2240_s6 }
0x10f6   : > { %p2713_p11 = pnand %p3821_p7, %p3820_p8 }
0x10f8   : > { %p2714_p12 = pneg %p2713_p11 }
0x10fa   : > { %3089 = dma.done.wait (%p2714_p12), %s2241_s19, 128  }
0x10fb   : > { %3091 = vsyncadd (%p2714_p12), %s2241_s19, 4294967168  ;;  %s3822_s30 = sld [smem:[#allocation22_spill]]  ;;  %s3825_s27 = smov %s3098_s28 }
0x10fc   : > { %s3823_s2 = sld [smem:[#allocation21_spill]] }
0x10fd   : > { %s3824_s29 = sld [smem:[#allocation23_spill]] }
0x1101   : > { %p34_p4 = scmp.ge.s32.totalorder %s3822_s30, 4  }
0x1102   : > { %s3826_s28 = smov %s3823_s2 }
0x1103   :  { %36 = sbr.rel (!%p34_p4) target bundleno = 20 (0x14), region = 167 }
0x1108   :  { %2246 = vsyncpa [#allocation4], 1 }
0x1109   :  { %2248 = vsyncpa [#allocation4 + $0x1], 1 }
0x110a   :  { %2249 = vsyncpa [#allocation7], 1 }
0x110b   :  { %2250 = vsyncpa [#allocation10], 1 }
0x110c   :  { %2251 = vsyncpa [#allocation13], 1 }
0x110d   :  { %2252 = vsyncpa [#allocation5], 1 }
0x110e   :  { %2254 = vsyncpa [#allocation5 + $0x1], 1 }

// kernel: tpu_custom_call.1
= control target key start
LH: loop header
LB: loop body
LE: loop exit
PB: predicated region body
PF: predicated region fallthrough
CT: control target
= control target key end

     0   :  { %s3737_s0 = inlined_call_operand.vmem [shape: f32[2,8,32], index: 0, kind: input, shape index: {}]   ;;  %s3738_s1 = inlined_call_operand.vmem [shape: f32[2,10,32], index: 1, kind: input, shape index: {}]   ;;  %s3739_s2 = inlined_call_operand.hbm [shape: f32[2,1,8], index: 2, kind: input, shape index: {}]   ;;  %s3740_s3 = inlined_call_operand.hbm [shape: f32[1,32], index: 3, kind: input, shape index: {}]   ;;  %s3741_s4 = inlined_call_operand.hbm [shape: f32[1,32], index: 4, kind: input, shape index: {}]   ;;  %s3742_s5 = inlined_call_operand.hbm [shape: f32[1,32], index: 5, kind: input, shape index: {}]   ;;  %s3743_s6 = inlined_call_operand.hbm [shape: f32[1,32], index: 6, kind: input, shape index: {}]   ;;  %s3744_s7 = inlined_call_operand.hbm [shape: f32[1,32], index: 7, kind: input, shape index: {}]   ;;  %s3745_s8 = inlined_call_operand.vmem [shape: f32[1,32], index: 8, kind: input, shape index: {}]   ;;  %s3746_s9 = inlined_call_operand.vmem [shape: bf16[32,96], index: 9, kind: input, shape index: {}]   ;;  %s3747_s10 = inlined_call_operand.vmem [shape: bf16[32,32], index: 10, kind: input, shape index: {}]   ;;  %s3748_s11 = inlined_call_operand.vmem [shape: bf16[32,32], index: 11, kind: input, shape index: {}]   ;;  %s3749_s12 = inlined_call_operand.vmem [shape: bf16[32,64], index: 12, kind: input, shape index: {}]   ;;  %s3750_s13 = inlined_call_operand.vmem [shape: bf16[32,32], index: 13, kind: input, shape index: {}]   ;;  %s3751_s14 = inlined_call_operand.hbm [shape: bf16[32,64], index: 14, kind: input, shape index: {}]   ;;  %s3752_s15 = inlined_call_operand.vmem [shape: f32[1,64], index: 15, kind: input, shape index: {}]   ;;  %s3753_s16 = inlined_call_operand.vmem [shape: bf16[64,32], index: 16, kind: input, shape index: {}]   ;;  %s3754_s17 = inlined_call_operand.vmem [shape: f32[1,32], index: 17, kind: input, shape index: {}]   ;;  %s3755_s18 = inlined_call_operand.hbm [shape: f32[2,8,32], index: 18, kind: output, shape index: {}]  }
   0x1   :  { %3771 = sst [smem:[#allocation24_spill]] %s3737_s0 }
   0x2   :  { %3772 = sst [smem:[#allocation25_spill]] %s3738_s1 }
   0x3   :  { %3773 = sst [smem:[#allocation26_spill]] %s3739_s2 }
   0x4   :  { %3774 = sst [smem:[#allocation27_spill]] %s3740_s3 }
   0x5   :  { %3775 = sst [smem:[#allocation28_spill]] %s3741_s4 }
   0x6   :  { %3776 = sst [smem:[#allocation29_spill]] %s3742_s5 }
   0x7   :  { %3777 = sst [smem:[#allocation30_spill]] %s3743_s6 }
   0x8   :  { %3778 = sst [smem:[#allocation31_spill]] %s3744_s7 }
   0x9   :  { %3779 = sst [smem:[#allocation32_spill]] %s3751_s14 }
   0xa   :  { %3780 = sst [smem:[#allocation33_spill]] %s3754_s17 }
   0xb   :  { %3781 = sst [smem:[#allocation34_spill]] %s3755_s18 }
   0xc   :  { %23 = vsyncpa [#allocation4], 0 }
   0xd   :  { %25 = vsyncpa [#allocation4 + $0x1], 0 }
   0xe   :  { %26 = vsyncpa [#allocation7], 0 }
   0xf   :  { %27 = vsyncpa [#allocation10], 0 }
  0x10   :  { %28 = vsyncpa [#allocation13], 0 }
  0x11   :  { %29 = vsyncpa [#allocation5], 0 }
  0x12   :  { %31 = vsyncpa [#allocation5 + $0x1], 0  ;;  %s3229_s27 = smov 0   ;;  %s3231_s28 = smov 0  }
  0x13   :  { %s3233_s29 = smov 0   ;;  %s3235_s30 = smov 0  }
  0x14 LB: > { %3782 = sst [smem:[#allocation21_spill]] %s3102_s29  ;;  %s3108_s0 = smov [#allocation6]   ;;  %s3106_s30 = sphi %s3235_s30, %s3822_s30   ;;  %s3102_s29 = sphi %s3233_s29, %s3824_s29   ;;  %s3098_s28 = sphi %s3231_s28, %s3826_s28   ;;  %s3094_s27 = sphi %s3229_s27, %s3825_s27  }
  0x15   : > { %s474_s19 = sshll.u32 %s3108_s0, 4  ;;  %s3250_s1 = sadd.s32 4294967295, %s3106_s30   ;;  %s475_s19 = int_to_ptr.vmem [resolvable:$true] %s474_s19 }
  0x16   : > { %p2377_p0 = scmp.ge.s32.totalorder %s3106_s30, 1  ;;  %p3758_p1 = scmp.eq.s32.totalorder %s3250_s1, 0 }
  0x17   : > { %p461_p2 = scmp.lt.s32.totalorder %s3106_s30, 3  ;;  %s3109_s21 = smov [#allocation9]  }
  0x18   : > { %s496_s22 = sshll.u32 %s3109_s21, 4  ;;  %s3110_s2 = smov [#allocation12]   ;;  %s3262_s22 = int_to_ptr.vmem [resolvable:$true] %s496_s22 }
  0x19   : > { %p3255_p3 = pnand %p2377_p0, %p461_p2  ;;  %s518_s23 = sshll.u32 %s3110_s2, 4  ;;  %s3270_s23 = int_to_ptr.vmem [resolvable:$true] %s518_s23 }
  0x1a   : > { %s3111_s25 = smov [#allocation8]   ;;  %s2857_s21 = scalar_lea.vmem %s475_s19, 16 }
  0x1b   : > { %s3783_s20 = scalar_select %p3255_p3, 1, 0 }
  0x1c   : > { %p2689_p5 = pneg %p3255_p3  ;;  %s3272_s26 = sshll.u32 %s3111_s25, 4  ;;  %s486_s26 = int_to_ptr.vmem [resolvable:$true] %s3272_s26 }
  0x1d   : > { %p2858_p8 = scmp.ne.s32.totalorder %s475_s19, %s2857_s21  ;;  %s2864_s2 = scalar_lea.vmem %s475_s19, 32 }
  0x1e   : > { %p3266_p6 = pnand %p2689_p5, %p3758_p1  ;;  %p2865_p11 = scmp.lt.s32.totalorder %s475_s19, %s475_s19 }
  0x1f   : > { %p2866_p12 = scmp.lt.s32.totalorder %s2864_s2, %s2857_s21 }
  0x20   : > { %p3276_p7 = pneg %p3266_p6 }
  0x21   : > { %p2867_p13 = por %p2866_p12, %p2865_p11 }
  0x22   : > { %p2860_p9 = pnand %p2858_p8, %p3276_p7 }
  0x24   : > { %p2861_p10 = pneg %p2860_p9 }
  0x26   : > { %p2868_p0 = pnand %p2867_p13, %p2861_p10 }
  0x28   : > { %2871 = shalt.err (!%p2868_p0)
}
  0x29   : > { %s3786_s3 = sld [smem:[#allocation27_spill]]  ;;  %s2883_s17 = scalar_lea.vmem %s3262_s22, 16 }
  0x2a   : > { %p2884_p2 = scmp.ne.s32.totalorder %s3262_s22, %s2883_s17  ;;  %s2890_s21 = scalar_lea.vmem %s3262_s22, 32 }
  0x2b   : > { %p2891_p9 = scmp.lt.s32.totalorder %s3262_s22, %s3262_s22  ;;  %p2892_p10 = scmp.lt.s32.totalorder %s2890_s21, %s2883_s17 }
  0x2c   : > { %p2886_p5 = pnand %p2884_p2, %p3276_p7 }
  0x2d   : > { %p2893_p11 = por %p2892_p10, %p2891_p9 }
  0x2e   : > { %p2887_p8 = pneg %p2886_p5 }
  0x2f   : > { %2692 = dma.hbm_to_vmem [thread:$0]  (!%p3266_p6), %s3786_s3, 16, %s475_s19, [#allocation7]  }
  0x30   : > { %p2894_p12 = pnand %p2893_p11, %p2887_p8 }
  0x32   : > { %2897 = shalt.err (!%p2894_p12)
}
  0x33   : > { %s3787_s5 = sld [smem:[#allocation29_spill]]  ;;  %s2909_s19 = scalar_lea.vmem %s3270_s23, 16 }
  0x34   : > { %p2910_p13 = scmp.ne.s32.totalorder %s3270_s23, %s2909_s19  ;;  %s2916_s17 = scalar_lea.vmem %s3270_s23, 32 }
  0x35   : > { %p2917_p5 = scmp.lt.s32.totalorder %s3270_s23, %s3270_s23  ;;  %p2918_p8 = scmp.lt.s32.totalorder %s2916_s17, %s2909_s19 }
  0x36   : > { %p2912_p0 = pnand %p2910_p13, %p3276_p7 }
  0x37   : > { %p2919_p9 = por %p2918_p8, %p2917_p5 }
  0x38   : > { %p2913_p2 = pneg %p2912_p0 }
  0x39   : > { %2698 = dma.hbm_to_vmem [thread:$0]  (!%p3266_p6), %s3787_s5, 16, %s3262_s22, [#allocation10]  }
  0x3a   : > { %p2920_p10 = pnand %p2919_p9, %p2913_p2 }
  0x3c   : > { %2923 = shalt.err (!%p2920_p10)
}
  0x3d   : > { %s3788_s7 = sld [smem:[#allocation31_spill]]  ;;  %s3112_s22 = smov [#allocation11]  }
  0x3e   : > { %s507_s18 = sshll.u32 %s3112_s22, 4  ;;  %s2935_s2 = scalar_lea.vmem %s486_s26, 16  ;;  %s508_s18 = int_to_ptr.vmem [resolvable:$true] %s507_s18 }
  0x3f   : > { %p2936_p11 = scmp.ne.s32.totalorder %s486_s26, %s2935_s2  ;;  %s2942_s19 = scalar_lea.vmem %s486_s26, 32 }
  0x40   : > { %p2943_p0 = scmp.lt.s32.totalorder %s486_s26, %s486_s26  ;;  %p2944_p2 = scmp.lt.s32.totalorder %s2942_s19, %s2935_s2 }
  0x41   : > { %p2938_p12 = pnand %p2936_p11, %p3276_p7 }
  0x42   : > { %p2945_p5 = por %p2944_p2, %p2943_p0 }
  0x43   : > { %2704 = dma.hbm_to_vmem [thread:$0]  (!%p3266_p6), %s3788_s7, 16, %s3270_s23, [#allocation13]  }
  0x44   : > { %p2939_p13 = pneg %p2938_p12 }
  0x46   : > { %p2946_p8 = pnand %p2945_p5, %p2939_p13 }
  0x48   : > { %2949 = shalt.err (!%p2946_p8)
}
  0x49   : > { %s3789_s4 = sld [smem:[#allocation28_spill]]  ;;  %s2961_s23 = scalar_lea.vmem %s508_s18, 16 }
  0x4a   : > { %p2962_p9 = scmp.ne.s32.totalorder %s508_s18, %s2961_s23  ;;  %s2968_s21 = scalar_lea.vmem %s508_s18, 32 }
  0x4b   : > { %p2969_p12 = scmp.lt.s32.totalorder %s508_s18, %s508_s18  ;;  %p2970_p4 = scmp.lt.s32.totalorder %s2968_s21, %s2961_s23 }
  0x4c   : > { %p2964_p10 = pnand %p2962_p9, %p3276_p7 }
  0x4d   : > { %p2971_p1 = por %p2970_p4, %p2969_p12 }
  0x4e   : > { %p2965_p11 = pneg %p2964_p10 }
  0x4f   : > { %2695 = dma.hbm_to_vmem [thread:$0]  (!%p3266_p6), %s3789_s4, 16, %s486_s26, [#allocation7]  }
  0x50   : > { %p2972_p0 = pnand %p2971_p1, %p2965_p11 }
  0x52   : > { %2975 = shalt.err (!%p2972_p0)
}
  0x53   : > { %s3790_s6 = sld [smem:[#allocation30_spill]]  ;;  %s3113_s26 = smov [#allocation14]  }
  0x54   : > { %s546_s19 = sshll.u32 %s3113_s26, 4  ;;  %s547_s19 = int_to_ptr.vmem [resolvable:$true] %s546_s19 }
  0x55   : > { %s2987_s17 = scalar_lea.vmem %s547_s19, 256  ;;  %p2995_p8 = scmp.lt.s32.totalorder %s547_s19, %s547_s19 }
  0x56   : > { %p2988_p13 = scmp.ne.s32.totalorder %s547_s19, %s2987_s17  ;;  %p2996_p9 = scmp.lt.s32.totalorder %s2987_s17, %s2987_s17 }
  0x58   : > { %p2990_p2 = pnand %p2988_p13, %p3276_p7  ;;  %p2997_p4 = por %p2996_p9, %p2995_p8 }
  0x59   : > { %2701 = dma.hbm_to_vmem [thread:$0]  (!%p3266_p6), %s3790_s6, 16, %s508_s18, [#allocation10]  }
  0x5a   : > { %p2991_p5 = pneg %p2990_p2 }
  0x5c   : > { %p2998_p1 = pnand %p2997_p4, %p2991_p5 }
  0x5e   : > { %3001 = shalt.err (!%p2998_p1)
}
  0x5f   : > { %s3114_s25 = smov 64   ;;  %s3115_s0 = smov 4  }
  0x60   : > { %s3791_s14 = sld [smem:[#allocation32_spill]]  ;;  %s2376_s21 = sadd.s32 4294967294, %s3106_s30  }
  0x61   : > { %s3337_s22 = sadd.s32 1, %s3106_s30   ;;  %s96_s26 = sadd.s32 1, %s3102_s29 }
  0x62   : > { %3792 = sst [smem:[#allocation22_spill]] %s3337_s22  ;;  %s93_s2 = ssub.s32 %s3106_s30, %s3337_s22 }
  0x63   : > { %p94_p7 = scmp.eq.s32.totalorder %s93_s2, 0  ;;  %p103_p10 = scmp.ne.s32.totalorder %s3102_s29, %s3098_s28 }
  0x64   : > { %p104_p11 = scmp.eq.s32.totalorder %s3106_s30, 0  ;;  %p109_p12 = scmp.ne.s32.totalorder %s3098_s28, %s3094_s27 }
  0x65   : > { %s3348_s17 = scalar_select %p94_p7, %s3102_s29, %s96_s26  }
  0x66   : > { %2707 = dma.hbm_to_vmem [thread:$0]  (!%p3266_p6), %s3791_s14, 256, %s547_s19, [#allocation13], %s3114_s25, %s3114_s25, %s3115_s0  }
  0x67   : > { %3793 = sst [smem:[#allocation23_spill]] %s3348_s17  ;;  %p3350_p0 = por %p104_p11, %p103_p10 }
  0x68   : > { %p3795_p13 = scmp.eq.s32.totalorder %s3250_s1, 0  ;;  %p448_p2 = scmp.eq.s32.totalorder %s3250_s1, 1 }
  0x69   : > { %p454_p5 = scmp.eq.s32.totalorder %s2376_s21, 1  ;;  %p2722_p8 = scmp.lt.s32.totalorder %s3106_s30, 2 }
  0x6a   : > { %p3356_p6 = por %p3795_p13, %p109_p12  ;;  %s584_s25 = sand.u32 1, %s3102_s29  }
  0x6b   : > { %p3363_p9 = por %p448_p2, %p103_p10  ;;  %p3367_p4 = por %p454_p5, %p109_p12 }
  0x6c   : > { %s3796_s19 = scalar_select %p3356_p6, 1, 0 }
  0x6d   : > { %s3797_s0 = scalar_select %p3363_p9, 1, 0 }
  0x6e   : > { %s3798_s18 = scalar_select %p3367_p4, 1, 0 }
  0x6f   : > { %s2385_s23 = sshll.u32 %s3106_s30, 4  ;;  %s587_s2 = scalar_lea.vmem [#allocation3], %s584_s25 }
  0x70   : > { %s594_s26 = sshll.u32 %s587_s2, 4  ;;  %s3799_s5 = sld [smem:[#allocation26_spill]]  ;;  %s595_s26 = int_to_ptr.vmem [resolvable:$true] %s594_s26 }
  0x71   : > { %p3379_p1 = pnand %p2722_p8, %p3350_p0  ;;  %s585_s7 = scalar_lea.sflag [#allocation4], %s584_s25 }
  0x73   : > { %p3004_p10 = pneg %p3379_p1 }
  0x76   : > { %s3375_s6 = scalar_lea.hbm %s3799_s5, %s2385_s23  ;;  %s3007_s23 = scalar_lea.hbm %s3799_s5, 32 }
  0x77   : > { %s3002_s14 = scalar_lea.hbm %s3375_s6, 16  ;;  %p3008_p13 = scmp.lt.s32.totalorder %s3375_s6, %s3799_s5 }
  0x78   : > { %p3003_p7 = scmp.ne.s32.totalorder %s3375_s6, %s3002_s14  ;;  %p3009_p0 = scmp.lt.s32.totalorder %s3007_s23, %s3002_s14 }
  0x7a   : > { %p3005_p11 = pnand %p3004_p10, %p3003_p7  ;;  %p3010_p2 = por %p3009_p0, %p3008_p13 }
  0x7c   : > { %p3006_p12 = pneg %p3005_p11 }
  0x7e   : > { %p3011_p5 = pnand %p3010_p2, %p3006_p12 }
  0x80   : > { %3014 = shalt.err (!%p3011_p5)
}
  0x81   : > { %s3015_s24 = scalar_lea.vmem %s595_s26, 16  ;;  %s3116_s25 = smov [#allocation3]  }
  0x82   : > { %p3016_p8 = scmp.ne.s32.totalorder %s595_s26, %s3015_s24  ;;  %s3020_s29 = sshll.u32 %s3116_s25, 4  ;;  %s3021_s29 = int_to_ptr.vmem [resolvable:$false] %s3020_s29 }
  0x83   : > { %s3022_s22 = scalar_lea.vmem %s3021_s29, 32  ;;  %p3023_p7 = scmp.lt.s32.totalorder %s595_s26, %s3021_s29 }
  0x84   : > { %p3018_p4 = pnand %p3016_p8, %p3004_p10  ;;  %p3024_p11 = scmp.lt.s32.totalorder %s3022_s22, %s3015_s24 }
  0x86   : > { %p3019_p9 = pneg %p3018_p4  ;;  %p3025_p6 = por %p3024_p11, %p3023_p7 }
  0x88   : > { %p3026_p3 = pnand %p3025_p6, %p3019_p9 }
  0x8a   : > { %3029 = shalt.err (!%p3026_p3)
}
  0x8b   : > { %2711 = dma.hbm_to_vmem [thread:$0]  (!%p3379_p1), %s3375_s6, 16, %s595_s26, %s585_s7  }
  0x8c   : > { %p3801_p12 = scmp.ne.s32.totalorder %s3783_s20, 0 }
  0x8d   : > { %s3400_s14 = sand.u32 (!%p3801_p12), 1, %s3098_s28   ;;  %p3802_p4 = scmp.ne.s32.totalorder (!%p3801_p12), %s3796_s19, 0 }
  0x8e   : > { %603 = sbr.rel (%p3801_p12) target bundleno = 4339 (0x10f3), region = 92  ;;  %s606_s17 = scalar_lea.sflag (!%p3801_p12), [#allocation4], %s3400_s14 }
  0x8f   : > { %s608_s3 = scalar_lea.vmem (!%p3801_p12), [#allocation3], %s3400_s14 }
  0x93   : > { %3073 = dma.done.wait (%p3802_p4), %s606_s17, 16  }
  0x94   : > { %3075 = vsyncadd (%p3802_p4), %s606_s17, 4294967280  ;;  %p3803_p3 = scmp.eq.s32.totalorder %s3250_s1, 0 }
  0x96   : > { %3077 = dma.done.wait (%p3803_p3), [#allocation7], 32   ;;  %p3804_p6 = pmov %p3803_p3 }
  0x97   : > { %p3805_p9 = pmov %p3803_p3 }
  0x98   : > { %3079 = vsyncadd (%p3804_p6), [#allocation7], 4294967264 }
  0x99   : > { %3081 = dma.done.wait (%p3805_p9), [#allocation10], 32   ;;  %p3806_p1 = pmov %p3803_p3 }
  0x9b   : > { %3083 = vsyncadd (%p3806_p1), [#allocation10], 4294967264  ;;  %p3807_p10 = pmov %p3806_p1 }
  0x9c   : > { %p3808_p13 = pmov %p3806_p1 }
  0x9d   : > { %3085 = dma.done.wait (%p3807_p10), [#allocation13], 272  }
  0x9e   : > { %3087 = vsyncadd (%p3808_p13), [#allocation13], 4294967024  ;;  %p693_p0 = scmp.lt.s32.totalorder %s3250_s1, 1  ;;  %s3809_s22 = sld [smem:[#allocation24_spill]]  ;;  %vm720_vm0 = vcmask 261120   ;;  %v2786_v7 = vld [vmem:[%s3746_s9 + $0x8] sm:$0xff]   ;;  %v704_v41 = vlaneseq }
  0x9f   : > { %v3117_v8 = vmov 0.0   ;;  %vm3118_vm1 = vmmov 0   ;;  %v2787_v9 = vld [vmem:[%s3746_s9] sm:$0xff]   ;;  %v2398_v18 = vld [vmem:[#allocation6] ss:$0 sm:$0xff]  ;;  %s3119_s2 = smov 120  }
  0xa0   : > { %s3422_s6 = scalar_select %p693_p0, %s3250_s1, 1  ;;  %2505 = vmatprep.subr.bf16.mxu1 %v3117_v8  ;;  %2509 = vmatprep.mubr.msk.bf16.mxu1 %vm3118_vm1, %v3117_v8  ;;  %v2399_v21 = vld [vmem:[#allocation8] ss:$0 sm:$0xff]  ;;  %vm821_vm4 = vcmask 64512   ;;  %v705_v42 = vshrl.u32 %v704_v41, 7  ;;  %v707_v43 = vand.u32 127, %v704_v41 }
  0xa1   : > { %2506 = vmatpush3.bf16.msra.mxu1 %v2786_v7  ;;  %2519 = vmatprep.subr.bf16.mxu0 %v3117_v8  ;;  %s3770_s24 = smov 96   ;;  %s3121_s25 = smov 88   ;;  %v2397_v45 = vld [vmem:[%s608_s3] ss:$0 sm:$0xff]  ;;  %vm886_vm6 = vcmask 1043456   ;;  %vm1046_vm7 = vcmask 130112  }
  0xa2   : > { %s2394_s7 = sshll.u32 %s3422_s6, 3  ;;  %2507 = vmatprep.subr.bf16.mxu1 %v3117_v8  ;;  %2521 = vmatprep.mubr.msk.bf16.mxu0 %vm3118_vm1, %v3117_v8  ;;  %s3768_s17 = smov 80   ;;  %vm708_vm5 = vcmp.gt.s32.totalorder %v707_v43, %v705_v42  ;;  %vm1163_vm8 = vcmask 195712   ;;  %vm1280_vm9 = vcmask 261312   ;;  %vm1551_vm12 = vcmask 80896  }
  0xa3   : > { %s3769_s29 = smov 72   ;;  %s3125_s20 = smov 104   ;;  %v709_v44 = vsel %vm708_vm5, -1e+09, %v3117_v8  ;;  %vm1570_vm13 = vcmask 1044480  }
  0xa4   : > { %s696_s19 = scalar_lea.vmem %s3809_s22, %s2394_s7  ;;  %s3123_s7 = smov 112   ;;  %v717_v46 = vadd.f32 %v2397_v45, %v709_v44 }
  0xa5   : > { %v3428_v0 = vld [vmem:[%s696_s19] sm:$0xff]  ;;  %2508 = vmatpush3.bf16.msra.mxu1 %v2787_v9  ;;  %s3126_s3 = smov 64   ;;  %s3127_s22 = smov 56  }
  0xa6   : > { %v721_v1 = vsel %vm720_vm0, %v3428_v0, 0.0  ;;  %2513 = vmatprep.subr.bf16.mxu1 %v3117_v8  ;;  %s3128_s19 = smov 48   ;;  %s3129_s26 = smov 40  }
  0xa7   : > { %722 = vadd.xlane.f32.xlu0 %v721_v1  ;;  %s3767_s21 = smov 8   ;;  %s2449_s4 = sshll.u32 %s3422_s6, 4 }
  0xa8   : > { %s3816_s23 = smov 24   ;;  %p3819_p5 = scmp.ne.s32.totalorder %s3797_s0, 0 }
 0x130   : > { %v723_v2 = vpop.xlane.xlu0 %722 }
 0x131   : > { %v725_v3 = vmul.f32 0.03125, %v723_v2 }
 0x133   : > { %v726_v4 = vsub.f32 %v3428_v0, %v725_v3 }
 0x135   : > { %v727_v5 = vmul.f32 %v726_v4, %v726_v4  ;;  %v748_v19 = vmul.f32 %v2398_v18, %v726_v4 }
 0x137   : > { %v728_v6 = vsel %vm720_vm0, %v727_v5, 0.0 }
 0x138   : > { %729 = vadd.xlane.f32.xlu0 %v728_v6 }
 0x1c1   : > { %v730_v10 = vpop.xlane.xlu0 %729 }
 0x1c2   : > { %v732_v11 = vmul.f32 0.032258064, %v730_v10 }
 0x1c4   : > { %2802 = vrsqrt.f32 %v732_v11  ;;  %vm735_vm2 = vcmp.eq.f32.partialorder %v732_v11, inf  ;;  %v738_v14 = vand.u32 2147483648, %v732_v11  ;;  %vm737_vm3 = vcmp.eq.f32.partialorder %v732_v11, 0.0 }
 0x1d1   : > { %v2803_v12 = vpop.eup %2802 }
 0x1d2   : > { %v734_v13 = vmul.f32 %v2803_v12, %v732_v11 }
 0x1d4   : > { %v736_v15 = vsel %vm735_vm2, %v732_v11, %v734_v13 }
 0x1d5   : > { %v739_v16 = vsel %vm737_vm3, %v738_v14, %v736_v15 }
 0x1d6   : > { %v740_v17 = vadd.f32 1e-06, %v739_v16 }
 0x1d8   : > { %2804 = vrcp.f32 %v740_v17 }
 0x1e5   : > { %v2805_v20 = vpop.eup %2804 }
 0x1e6   : > { %v749_v22 = vmul.f32 %v2805_v20, %v748_v19 }
 0x1e8   : > { %v756_v23 = vadd.f32 %v2399_v21, %v749_v22 }
 0x1ea   : > { %v757_v24 = vpack.c.bf16 %v756_v23, %v756_v23 }
 0x1ec   : > { %2510 = vmatmul.mubr.msk.bf16.vlgmr.msra.gmra.mxu1 %vm720_vm0, %v757_v24 }
 0x1ed   : > { %2515 = vmatprep.mubr.msk.bf16.mxu1 %vm3118_vm1, %v3117_v8 }
 0x2ac   : > { %v811_v25 = vpop.f32.mrf.mxu1 }
 0x2ad   : > { %v3451_v26 = vpack.c.bf16 %v811_v25, %v811_v25 }
 0x2ae   : > { %v2511_v27 = vpop.f32.mrf.mxu1 }
 0x2af   : > { %931 = vrot.lane.b32.xlu0 %v3451_v26, %s3119_s2  ;;  %819 = vrot.lane.b32.xlu1 %v3451_v26, %s3770_s24  ;;  %s3812_s24 = smov 72  }
 0x2b0   : > { %v814_v28 = vpop.f32.mrf.mxu1 }
 0x2b2   : > { %v2512_v29 = vpop.f32.mrf.mxu1 }
 0x2b3   : > { %933 = vrot.lane.b32.xlu1 %v3451_v26, %s3121_s25 }
 0x2b7   : > { %1050 = vrot.lane.b32.xlu1 %v3451_v26, %s3768_s17  ;;  %s3813_s17 = smov 80  }
 0x2bb   : > { %1048 = vrot.lane.b32.xlu1 %v3451_v26, %s3123_s7 }
 0x2bf   : > { %1167 = vrot.lane.b32.xlu1 %v3451_v26, %s3769_s29 }
 0x2c3   : > { %1165 = vrot.lane.b32.xlu1 %v3451_v26, %s3125_s20 }
 0x321   : > { %v820_v30 = vpop.permute.xlu1 %819  ;;  %v932_v35 = vpop.permute.xlu0 %931 }
 0x322   : > { %v826_v31 = vsel %vm821_vm4, %v820_v30, 0 }
 0x323   : > { %2514 = vmatpush3.bf16.xpose.msra.mxu1 %v826_v31 }
 0x324   : > { %2525 = vmatprep.subr.bf16.mxu1 %v3117_v8 }
 0x325   : > { %v934_v32 = vpop.permute.xlu1 %933 }
 0x326   : > { %v939_v33 = vsel %vm821_vm4, %v934_v32, 0 }
 0x329   : > { %v1051_v34 = vpop.permute.xlu1 %1050 }
 0x32a   : > { %2516 = vmatmul.mubr.msk.bf16.vlgmr.msra.gmra.mxu1 %vm821_vm4, %v3451_v26  ;;  %v1056_v37 = vsel %vm821_vm4, %v1051_v34, 0 }
 0x32b   : > { %2526 = vmatpush3.bf16.xpose.msra.mxu1 %v939_v33  ;;  %2527 = vmatprep.mubr.msk.bf16.mxu1 %vm3118_vm1, %v3117_v8 }
 0x32c   : > { %2537 = vmatprep.subr.bf16.mxu1 %v3117_v8 }
 0x32d   : > { %v1049_v36 = vpop.permute.xlu1 %1048 }
 0x331   : > { %v1168_v38 = vpop.permute.xlu1 %1167 }
 0x332   : > { %2528 = vmatmul.mubr.msk.bf16.vlgmr.msra.gmra.mxu1 %vm821_vm4, %v932_v35  ;;  %v1173_v39 = vsel %vm821_vm4, %v1168_v38, 0 }
 0x333   : > { %2538 = vmatpush3.bf16.xpose.msra.mxu1 %v1056_v37  ;;  %2539 = vmatprep.mubr.msk.bf16.mxu1 %vm3118_vm1, %v3117_v8 }
 0x334   : > { %2549 = vmatprep.subr.bf16.mxu1 %v3117_v8 }
 0x335   : > { %v1166_v40 = vpop.permute.xlu1 %1165 }
 0x33a   : > { %2540 = vmatmul.mubr.msk.bf16.vlgmr.msra.gmra.mxu1 %vm821_vm4, %v1049_v36 }
 0x33b   : > { %2550 = vmatpush3.bf16.xpose.msra.mxu1 %v1173_v39  ;;  %2551 = vmatprep.mubr.msk.bf16.mxu1 %vm3118_vm1, %v3117_v8 }
 0x33c   : > { %2561 = vmatprep.subr.bf16.mxu1 %v3117_v8 }
 0x342   : > { %2552 = vmatmul.mubr.msk.bf16.vlgmr.msra.gmra.mxu1 %vm821_vm4, %v1166_v40 }
 0x343   : > { %2565 = vmatprep.mubr.msk.bf16.mxu1 %vm3118_vm1, %v3117_v8 }
 0x3ea   : > { %v862_v47 = vpop.f32.mrf.mxu1 }
 0x3eb   : > { %v868_v48 = vadd.f32 %v862_v47, %v717_v46 }
 0x3ec   : > { %v2517_v49 = vpop.f32.mrf.mxu1 }
 0x3ed   : > { %v869_v50 = vsel %vm821_vm4, %v868_v48, -inf }
 0x3ee   : > { %870 = vmax.xlane.f32.xlu1 %v869_v50  ;;  %v865_v51 = vpop.f32.mrf.mxu1 }
 0x3f0   : > { %v2518_v52 = vpop.f32.mrf.mxu1 }
 0x3f2   : > { %v975_v53 = vpop.f32.mrf.mxu1 }
 0x3f3   : > { %v981_v54 = vadd.f32 %v975_v53, %v717_v46 }
 0x3f4   : > { %v2529_v55 = vpop.f32.mrf.mxu1 }
 0x3f5   : > { %v982_v56 = vsel %vm821_vm4, %v981_v54, -inf }
 0x3f6   : > { %983 = vmax.xlane.f32.xlu0 %v982_v56  ;;  %v978_v57 = vpop.f32.mrf.mxu1 }
 0x3f8   : > { %v2530_v58 = vpop.f32.mrf.mxu1 }
 0x3fa   : > { %v1092_v59 = vpop.f32.mrf.mxu1 }
 0x3fb   : > { %v1098_v60 = vadd.f32 %v1092_v59, %v717_v46 }
 0x3fc   : > { %v2541_v61 = vpop.f32.mrf.mxu1 }
 0x3fd   : > { %v1099_v62 = vsel %vm821_vm4, %v1098_v60, -inf  ;;  %v2788_v61 = vld [vmem:[%s3747_s10 + $0x8] sm:$0xff]  }
 0x3fe   : > { %1100 = vmax.xlane.f32.xlu1 %v1099_v62  ;;  %v1095_v63 = vpop.f32.mrf.mxu1  ;;  %2562 = vmatpush3.bf16.msra.mxu1 %v2788_v61  ;;  %v2789_v62 = vld [vmem:[%s3747_s10] sm:$0xff]  }
 0x3ff   : > { %2563 = vmatprep.subr.bf16.mxu1 %v3117_v8 }
 0x400   : > { %v2542_v1 = vpop.f32.mrf.mxu1 }
 0x402   : > { %v1209_v2 = vpop.f32.mrf.mxu1  ;;  %2564 = vmatpush3.bf16.msra.mxu1 %v2789_v62 }
 0x403   : > { %v1215_v3 = vadd.f32 %v1209_v2, %v717_v46  ;;  %2577 = vmatprep.subr.bf16.mxu1 %v3117_v8 }
 0x404   : > { %v2553_v4 = vpop.f32.mrf.mxu1 }
 0x405   : > { %v1216_v5 = vsel %vm821_vm4, %v1215_v3, -inf }
 0x406   : > { %1217 = vmax.xlane.f32.xlu0 %v1216_v5  ;;  %v1212_v6 = vpop.f32.mrf.mxu1 }
 0x408   : > { %v2554_v7 = vpop.f32.mrf.mxu1 }
 0x477   : > { %v871_v9 = vpop.xlane.xlu1 %870 }
 0x478   : > { %v872_v10 = vsub.f32 %v868_v48, %v871_v9 }
 0x47a   : > { %v873_v11 = vmul.f32 1.442695, %v872_v10 }
 0x47c   : > { %2806 = vpow2.f32 %v873_v11 }
 0x47f   : > { %v984_v12 = vpop.xlane.xlu0 %983 }
 0x480   : > { %v985_v13 = vsub.f32 %v981_v54, %v984_v12 }
 0x482   : > { %v986_v14 = vmul.f32 1.442695, %v985_v13 }
 0x484   : > { %2808 = vpow2.f32 %v986_v14 }
 0x487   : > { %v1101_v24 = vpop.xlane.xlu1 %1100 }
 0x488   : > { %v1102_v25 = vsub.f32 %v1098_v60, %v1101_v24 }
 0x489   : > { %v2807_v15 = vpop.eup %2806 }
 0x48a   : > { %v875_v16 = vsel %vm821_vm4, %v2807_v15, 0.0  ;;  %v1103_v27 = vmul.f32 1.442695, %v1102_v25 }
 0x48b   : > { %876 = vadd.xlane.f32.xlu1 %v875_v16 }
 0x48f   : > { %v1218_v17 = vpop.xlane.xlu0 %1217 }
 0x490   : > { %v1219_v18 = vsub.f32 %v1215_v3, %v1218_v17 }
 0x491   : > { %v2809_v19 = vpop.eup %2808 }
 0x492   : > { %v1220_v20 = vmul.f32 1.442695, %v1219_v18  ;;  %v988_v21 = vsel %vm821_vm4, %v2809_v19, 0.0 }
 0x493   : > { %989 = vadd.xlane.f32.xlu0 %v988_v21 }
 0x494   : > { %2810 = vpow2.f32 %v1220_v20 }
 0x495   : > { %2812 = vpow2.f32 %v1103_v27 }
 0x49c   : > { %881 = vrot.lane.b32.xlu1 %v3451_v26, %s3126_s3  ;;  %s3817_s3 = sld [smem:[#allocation33_spill]] }
 0x4a1   : > { %v2811_v22 = vpop.eup %2810 }
 0x4a2   : > { %v1222_v23 = vsel %vm821_vm4, %v2811_v22, 0.0  ;;  %v2813_v28 = vpop.eup %2812 }
 0x4a3   : > { %1223 = vadd.xlane.f32.xlu0 %v1222_v23  ;;  %v1105_v29 = vsel %vm821_vm4, %v2813_v28, 0.0 }
 0x4b9   : > { %994 = vrot.lane.b32.xlu0 %v3451_v26, %s3127_s22  ;;  %s3810_s22 = sld [smem:[#allocation25_spill]] }
 0x4c0   : > { %1106 = vadd.xlane.f32.xlu1 %v1105_v29 }
 0x4d1   : > { %1111 = vrot.lane.b32.xlu1 %v3451_v26, %s3128_s19  ;;  %s3766_s19 = smov 16  }
 0x4d5   : > { %1228 = vrot.lane.b32.xlu1 %v3451_v26, %s3129_s26  ;;  %s3765_s26 = smov 24  }
 0x514   : > { %v877_v30 = vpop.xlane.xlu1 %876 }
 0x515   : > { %2814 = vrcp.f32 %v877_v30  ;;  %v2792_v30 = vld [vmem:[%s3748_s11 + $0x8] sm:$0xff]  }
 0x518   : > { %v882_v31 = vpop.permute.xlu1 %881 }
 0x519   : > { %v888_v32 = vsel %vm886_vm6, %v882_v31, 0  ;;  %v2793_v31 = vld [vmem:[%s3748_s11] sm:$0xff]  }
 0x51a   : > { %2520 = vmatpush3.bf16.msra.mxu0 %v888_v32 }
 0x51b   : > { %2531 = vmatprep.subr.bf16.mxu0 %v3117_v8 }
 0x51c   : > { %v990_v33 = vpop.xlane.xlu0 %989 }
 0x51d   : > { %2816 = vrcp.f32 %v990_v33 }
 0x522   : > { %v2815_v34 = vpop.eup %2814 }
 0x523   : > { %v879_v35 = vmul.f32 %v2815_v34, %v2807_v15 }
 0x525   : > { %v880_v36 = vpack.c.bf16 %v879_v35, %v879_v35 }
 0x527   : > { %2522 = vmatmul.mubr.msk.bf16.vlgmr.msra.gmra.mxu0 %vm821_vm4, %v880_v36 }
 0x528   : > { %2533 = vmatprep.mubr.msk.bf16.mxu0 %vm3118_vm1, %v3117_v8 }
 0x52a   : > { %v2817_v26 = vpop.eup %2816 }
 0x52b   : > { %v992_v38 = vmul.f32 %v2817_v26, %v2809_v19 }
 0x52c   : > { %v1224_v37 = vpop.xlane.xlu0 %1223 }
 0x52d   : > { %v993_v41 = vpack.c.bf16 %v992_v38, %v992_v38 }
 0x530   : > { %v995_v39 = vpop.permute.xlu0 %994 }
 0x531   : > { %v1000_v40 = vsel %vm886_vm6, %v995_v39, 0  ;;  %v2414_v39 = vld [vmem:[#allocation9] ss:$0 sm:$0xff] }
 0x532   : > { %2532 = vmatpush3.bf16.msra.mxu0 %v1000_v40 }
 0x533   : > { %2543 = vmatprep.subr.bf16.mxu0 %v3117_v8 }
 0x535   : > { %2534 = vmatmul.mubr.msk.bf16.vlgmr.msra.gmra.mxu0 %vm821_vm4, %v993_v41 }
 0x536   : > { %2545 = vmatprep.mubr.msk.bf16.mxu0 %vm3118_vm1, %v3117_v8 }
 0x549   : > { %v1107_v42 = vpop.xlane.xlu1 %1106 }
 0x54a   : > { %2818 = vrcp.f32 %v1107_v42  ;;  %v2415_v42 = vld [vmem:[#allocation11] ss:$0 sm:$0xff] }
 0x54b   : > { %2820 = vrcp.f32 %v1224_v37 }
 0x54d   : > { %v1112_v43 = vpop.permute.xlu1 %1111 }
 0x54e   : > { %v1117_v44 = vsel %vm886_vm6, %v1112_v43, 0 }
 0x54f   : > { %2544 = vmatpush3.bf16.msra.mxu0 %v1117_v44 }
 0x550   : > { %2555 = vmatprep.subr.bf16.mxu0 %v3117_v8 }
 0x551   : > { %v1229_v47 = vpop.permute.xlu1 %1228 }
 0x552   : > { %v1234_v50 = vsel %vm886_vm6, %v1229_v47, 0 }
 0x557   : > { %v2819_v45 = vpop.eup %2818 }
 0x558   : > { %v1109_v46 = vmul.f32 %v2819_v45, %v2813_v28  ;;  %v2821_v49 = vpop.eup %2820  ;;  %v2791_v28 = vld [vmem:[%s3749_s12] sm:$0xff]  }
 0x559   : > { %v1226_v51 = vmul.f32 %v2821_v49, %v2811_v22 }
 0x55a   : > { %v1110_v48 = vpack.c.bf16 %v1109_v46, %v1109_v46 }
 0x55b   : > { %v1227_v52 = vpack.c.bf16 %v1226_v51, %v1226_v51 }
 0x55c   : > { %2546 = vmatmul.mubr.msk.bf16.vlgmr.msra.gmra.mxu0 %vm821_vm4, %v1110_v48 }
 0x55d   : > { %2556 = vmatpush3.bf16.msra.mxu0 %v1234_v50  ;;  %2557 = vmatprep.mubr.msk.bf16.mxu0 %vm3118_vm1, %v3117_v8 }
 0x55e   : > { %2569 = vmatprep.subr.bf16.mxu0 %v3117_v8 }
 0x564   : > { %2558 = vmatmul.mubr.msk.bf16.vlgmr.msra.gmra.mxu0 %vm821_vm4, %v1227_v52 }
 0x565   : > { %2573 = vmatprep.mubr.msk.bf16.mxu0 %vm3118_vm1, %v3117_v8  ;;  %2570 = vmatpush3.bf16.msra.mxu0 %v2792_v30 }
 0x566   : > { %2571 = vmatprep.subr.bf16.mxu0 %v3117_v8 }
 0x569   : > { %2572 = vmatpush3.bf16.msra.mxu0 %v2793_v31 }
 0x56a   : > { %2585 = vmatprep.subr.bf16.mxu0 %v3117_v8 }
 0x5e7   : > { %v924_v53 = vpop.f32.mrf.mxu0 }
 0x5e8   : > { %930 = vst.msk [vmem:[#allocation2] sm:$0xff] %vm821_vm4, %v924_v53 }
 0x5e9   : > { %v2523_v54 = vpop.f32.mrf.mxu0 }
 0x5eb   : > { %v927_v55 = vpop.f32.mrf.mxu0 }
 0x5ed   : > { %v2524_v56 = vpop.f32.mrf.mxu0 }
 0x5f5   : > { %v1036_v57 = vpop.f32.mrf.mxu0 }
 0x5f6   : > { %1043 = vrot.lane.b32.xlu0 %v1036_v57, %s3767_s21 }
 0x5f7   : > { %v2535_v58 = vpop.f32.mrf.mxu0 }
 0x5f9   : > { %v1039_v59 = vpop.f32.mrf.mxu0 }
 0x5fb   : > { %v2536_v60 = vpop.f32.mrf.mxu0 }
 0x61c   : > { %v1153_v63 = vpop.f32.mrf.mxu0 }
 0x61d   : > { %1160 = vrot.lane.b32.xlu1 %v1153_v63, %s3766_s19 }
 0x61e   : > { %v2547_v1 = vpop.f32.mrf.mxu0 }
 0x620   : > { %v1156_v2 = vpop.f32.mrf.mxu0 }
 0x622   : > { %v2548_v3 = vpop.f32.mrf.mxu0 }
 0x624   : > { %v1270_v4 = vpop.f32.mrf.mxu0 }
 0x625   : > { %1277 = vrot.lane.b32.xlu0 %v1270_v4, %s3765_s26  ;;  %s701_s26 = scalar_lea.vmem %s3810_s22, %s2449_s4  ;;  %s3815_s4 = smov 16  }
 0x626   : > { %v2559_v5 = vpop.f32.mrf.mxu0  ;;  %v1440_v25 = vld [vmem:[%s701_s26] sm:$0xff]  ;;  %v1441_v27 = vld [vmem:[%s701_s26 + $0x8] sm:$0x3]  ;;  %s2393_s26 = sshll.u32 %s3400_s14, 3  ;;  %s2446_s22 = sshll.u32 %s3250_s1, 7 }
 0x627   : > { %v1442_v29 = vpack.c.bf16 %v1441_v27, %v1440_v25  ;;  %s692_s6 = scalar_lea.vmem [#allocation15], %s2393_s26  ;;  %s3133_s1 = smov [#allocation15]  }
 0x628   : > { %v1273_v6 = vpop.f32.mrf.mxu0  ;;  %s2228_s21 = sshll.u32 %s692_s6, 4  ;;  %s3034_s29 = sshll.u32 %s3133_s1, 4  ;;  %s2229_s21 = int_to_ptr.vmem [resolvable:$true] %s2228_s21  ;;  %s3035_s29 = int_to_ptr.vmem [resolvable:$false] %s3034_s29 }
 0x629   : > { %p3037_p11 = scmp.lt.s32.totalorder %s2229_s21, %s3035_s29 }
 0x62a   : > { %v2560_v7 = vpop.f32.mrf.mxu0 }
 0x668   : > { %v1044_v9 = vpop.permute.xlu0 %1043 }
 0x669   : > { %1047 = vst.msk [vmem:[#allocation2] sm:$0xff] %vm1046_vm7, %v1044_v9 }
 0x68f   : > { %v1161_v10 = vpop.permute.xlu1 %1160 }
 0x690   : > { %1164 = vst.msk [vmem:[#allocation2] sm:$0xff] %vm1163_vm8, %v1161_v10 }
 0x697   : > { %v1278_v11 = vpop.permute.xlu0 %1277 }
 0x698   : > { %1281 = vst.msk [vmem:[#allocation2] sm:$0xff] %vm1280_vm9, %v1278_v11 }
 0x69f   : > { %v1282_v12 = vld [vmem:[#allocation2] sm:$0xff] }
 0x6a0   : > { %v1283_v13 = vpack.c.bf16 %v1282_v12, %v1282_v12 }
 0x6a2   : > { %2566 = vmatmul.mubr.msk.bf16.vlgmr.msra.gmra.mxu1 %vm720_vm0, %v1283_v13 }
 0x6a3   : > { %2581 = vmatprep.mubr.msk.bf16.mxu1 %vm3118_vm1, %v3117_v8 }
 0x762   : > { %v1337_v14 = vpop.f32.mrf.mxu1 }
 0x763   : > { %v3542_v15 = vadd.f32 %v1337_v14, %v3428_v0  ;;  %v2790_v0 = vld [vmem:[%s3749_s12 + $0x8] sm:$0xff]  }
 0x764   : > { %v2567_v16 = vpop.f32.mrf.mxu1  ;;  %2578 = vmatpush3.bf16.msra.mxu1 %v2790_v0 }
 0x765   : > { %v1346_v17 = vsel %vm720_vm0, %v3542_v15, 0.0  ;;  %2579 = vmatprep.subr.bf16.mxu1 %v3117_v8 }
 0x766   : > { %1347 = vadd.xlane.f32.xlu1 %v1346_v17  ;;  %v1340_v18 = vpop.f32.mrf.mxu1 }
 0x768   : > { %v2568_v19 = vpop.f32.mrf.mxu1  ;;  %2580 = vmatpush3.bf16.msra.mxu1 %v2791_v28 }
 0x769   : > { %2591 = vmatprep.subr.bf16.mxu1 %v3117_v8 }
 0x76b   : > { %2582 = vmatmul.mubr.msk.bf16.vlgmr.msra.gmra.mxu1 %vm720_vm0, %v1442_v29 }
 0x76c   : > { %2593 = vmatprep.mubr.msk.bf16.mxu1 %vm3118_vm1, %v3117_v8 }
 0x7ef   : > { %v1348_v20 = vpop.xlane.xlu1 %1347 }
 0x7f0   : > { %v1349_v21 = vmul.f32 0.03125, %v1348_v20 }
 0x7f2   : > { %v1350_v22 = vsub.f32 %v3542_v15, %v1349_v21 }
 0x7f4   : > { %v1351_v23 = vmul.f32 %v1350_v22, %v1350_v22  ;;  %v1371_v40 = vmul.f32 %v2414_v39, %v1350_v22 }
 0x7f6   : > { %v1352_v24 = vsel %vm720_vm0, %v1351_v23, 0.0 }
 0x7f7   : > { %1353 = vadd.xlane.f32.xlu0 %v1352_v24 }
 0x82b   : > { %v1496_v46 = vpop.f32.mrf.mxu1 }
 0x82d   : > { %v2583_v47 = vpop.f32.mrf.mxu1 }
 0x82f   : > { %v1499_v48 = vpop.f32.mrf.mxu1 }
 0x830   : > { %v3574_v49 = vpack.c.bf16 %v1499_v48, %v1496_v46 }
 0x831   : > { %v2584_v50 = vpop.f32.mrf.mxu1 }
 0x832   : > { %1618 = vrot.lane.b32.xlu0 %v3574_v49, %s3119_s2  ;;  %v1509_v51 = vsel %vm821_vm4, %v3574_v49, 0 }
 0x880   : > { %v1354_v32 = vpop.xlane.xlu0 %1353 }
 0x881   : > { %v1355_v33 = vmul.f32 0.032258064, %v1354_v32 }
 0x883   : > { %2822 = vrsqrt.f32 %v1355_v33  ;;  %vm1358_vm10 = vcmp.eq.f32.partialorder %v1355_v33, inf  ;;  %v1361_v36 = vand.u32 2147483648, %v1355_v33  ;;  %vm1360_vm11 = vcmp.eq.f32.partialorder %v1355_v33, 0.0 }
 0x890   : > { %v2823_v34 = vpop.eup %2822 }
 0x891   : > { %v1357_v35 = vmul.f32 %v2823_v34, %v1355_v33 }
 0x893   : > { %v1359_v26 = vsel %vm1358_vm10, %v1355_v33, %v1357_v35 }
 0x894   : > { %v1362_v37 = vsel %vm1360_vm11, %v1361_v36, %v1359_v26 }
 0x895   : > { %v1363_v38 = vadd.f32 1e-06, %v1362_v37 }
 0x897   : > { %2824 = vrcp.f32 %v1363_v38 }
 0x8a4   : > { %v2825_v41 = vpop.eup %2824  ;;  %v1619_v52 = vpop.permute.xlu0 %1618 }
 0x8a5   : > { %v1372_v43 = vmul.f32 %v2825_v41, %v1371_v40  ;;  %v1624_v56 = vsel %vm821_vm4, %v1619_v52, 0 }
 0x8a7   : > { %v1379_v44 = vadd.f32 %v2415_v42, %v1372_v43 }
 0x8a9   : > { %v1380_v45 = vpack.c.bf16 %v1379_v44, %v1379_v44 }
 0x8ab   : > { %2574 = vmatmul.mubr.msk.bf16.vlgmr.msra.gmra.mxu0 %vm720_vm0, %v1380_v45 }
 0x8ac   : > { %2587 = vmatprep.mubr.msk.bf16.mxu0 %vm3118_vm1, %v3117_v8  ;;  %2586 = vmatpush3.bf16.xpose.msra.mxu0 %v1509_v51 }
 0x8ad   : > { %2597 = vmatprep.subr.bf16.mxu0 %v3117_v8 }
 0x96b   : > { %v1434_v53 = vpop.f32.mrf.mxu0 }
 0x96c   : > { %v1503_v54 = vpack.c.bf16 %v1434_v53, %v1434_v53 }
 0x96d   : > { %v2575_v55 = vpop.f32.mrf.mxu0 }
 0x96e   : > { %1616 = vrot.lane.b32.xlu1 %v1503_v54, %s3119_s2  ;;  %1731 = vrot.lane.b32.xlu0 %v1503_v54, %s3123_s7  ;;  %s3811_s2 = smov 96  }
 0x96f   : > { %2588 = vmatmul.mubr.msk.bf16.vlgmr.msra.gmra.mxu0 %vm821_vm4, %v1503_v54  ;;  %v1437_v57 = vpop.f32.mrf.mxu0 }
 0x970   : > { %2598 = vmatpush3.bf16.xpose.msra.mxu0 %v1624_v56  ;;  %2599 = vmatprep.mubr.msk.bf16.mxu0 %vm3118_vm1, %v3117_v8 }
 0x971   : > { %v2576_v58 = vpop.f32.mrf.mxu0  ;;  %2609 = vmatprep.subr.bf16.mxu0 %v3117_v8 }
 0x972   : > { %1733 = vrot.lane.b32.xlu1 %v3574_v49, %s3123_s7  ;;  %1846 = vrot.lane.b32.xlu0 %v1503_v54, %s3125_s20  ;;  %s3030_s7 = scalar_lea.vmem %s2229_s21, 128 }
 0x973   : > { %p3031_p2 = scmp.ne.s32.totalorder %s2229_s21, %s3030_s7 }
 0x975   : > { %p3032_p8 = pnand %p3031_p2, %p3819_p5 }
 0x976   : > { %1848 = vrot.lane.b32.xlu1 %v3574_v49, %s3125_s20  ;;  %s3036_s20 = scalar_lea.vmem %s3035_s29, 256 }
 0x977   : > { %p3033_p7 = pneg %p3032_p8  ;;  %p3038_p12 = scmp.lt.s32.totalorder %s3036_s20, %s3030_s7 }
 0x979   : > { %p3039_p4 = por %p3038_p12, %p3037_p11 }
 0x97b   : > { %p3040_p3 = pnand %p3039_p4, %p3033_p7 }
 0x9e0   : > { %v1617_v59 = vpop.permute.xlu1 %1616  ;;  %v1732_v63 = vpop.permute.xlu0 %1731 }
 0x9e1   : > { %2600 = vmatmul.mubr.msk.bf16.vlgmr.msra.gmra.mxu0 %vm821_vm4, %v1617_v59 }
 0x9e2   : > { %2611 = vmatprep.mubr.msk.bf16.mxu0 %vm3118_vm1, %v3117_v8 }
 0x9e4   : > { %v1734_v60 = vpop.permute.xlu1 %1733  ;;  %v1847_v2 = vpop.permute.xlu0 %1846 }
 0x9e5   : > { %v1739_v61 = vsel %vm821_vm4, %v1734_v60, 0 }
 0x9e6   : > { %2610 = vmatpush3.bf16.xpose.msra.mxu0 %v1739_v61 }
 0x9e7   : > { %2621 = vmatprep.subr.bf16.mxu0 %v3117_v8 }
 0x9e8   : > { %v1849_v62 = vpop.permute.xlu1 %1848 }
 0x9e9   : > { %v1854_v1 = vsel %vm821_vm4, %v1849_v62, 0 }
 0x9ed   : > { %2612 = vmatmul.mubr.msk.bf16.vlgmr.msra.gmra.mxu0 %vm821_vm4, %v1732_v63 }
 0x9ee   : > { %2622 = vmatpush3.bf16.xpose.msra.mxu0 %v1854_v1  ;;  %2623 = vmatprep.mubr.msk.bf16.mxu0 %vm3118_vm1, %v3117_v8 }
 0x9ef   : > { %2633 = vmatprep.subr.bf16.mxu0 %v3117_v8 }
 0x9f5   : > { %2624 = vmatmul.mubr.msk.bf16.vlgmr.msra.gmra.mxu0 %vm821_vm4, %v1847_v2 }
 0x9f6   : > { %2637 = vmatprep.mubr.msk.bf16.mxu0 %vm3118_vm1, %v3117_v8 }
 0xa2f   : > { %v1545_v3 = vpop.f32.mrf.mxu0 }
 0xa30   : > { %v1552_v4 = vsel %vm1551_vm12, %v1545_v3, -inf }
 0xa31   : > { %1553 = vmax.xlane.f32.xlu1 %v1552_v4  ;;  %v2589_v5 = vpop.f32.mrf.mxu0 }
 0xa33   : > { %v1548_v6 = vpop.f32.mrf.mxu0 }
 0xa35   : > { %v2590_v7 = vpop.f32.mrf.mxu0 }
 0xaa1   : > { %v1660_v9 = vpop.f32.mrf.mxu0 }
 0xaa2   : > { %v1666_v10 = vsel %vm1551_vm12, %v1660_v9, -inf }
 0xaa3   : > { %1667 = vmax.xlane.f32.xlu0 %v1666_v10  ;;  %v2601_v11 = vpop.f32.mrf.mxu0 }
 0xaa5   : > { %v1663_v12 = vpop.f32.mrf.mxu0 }
 0xaa7   : > { %v2602_v13 = vpop.f32.mrf.mxu0 }
 0xaad   : > { %v1775_v14 = vpop.f32.mrf.mxu0 }
 0xaae   : > { %v1781_v16 = vsel %vm1551_vm12, %v1775_v14, -inf }
 0xaaf   : > { %1782 = vmax.xlane.f32.xlu0 %v1781_v16  ;;  %v2613_v17 = vpop.f32.mrf.mxu0 }
 0xab0   : > { %v2795_v17 = vld [vmem:[%s3750_s13] sm:$0xff]  }
 0xab1   : > { %v1778_v18 = vpop.f32.mrf.mxu0 }
 0xab3   : > { %v2614_v19 = vpop.f32.mrf.mxu0 }
 0xab5   : > { %v1890_v20 = vpop.f32.mrf.mxu0 }
 0xab6   : > { %v1896_v21 = vsel %vm1551_vm12, %v1890_v20, -inf }
 0xab7   : > { %1897 = vmax.xlane.f32.xlu1 %v1896_v21  ;;  %v2625_v22 = vpop.f32.mrf.mxu0 }
 0xab9   : > { %v1893_v23 = vpop.f32.mrf.mxu0 }
 0xaba   : > { %v1554_v24 = vpop.xlane.xlu1 %1553 }
 0xabb   : > { %v1555_v0 = vsub.f32 %v1545_v3, %v1554_v24  ;;  %v2626_v25 = vpop.f32.mrf.mxu0 }
 0xabd   : > { %v1556_v27 = vmul.f32 1.442695, %v1555_v0 }
 0xabf   : > { %2826 = vpow2.f32 %v1556_v27 }
 0xacc   : > { %v2827_v28 = vpop.eup %2826 }
 0xacd   : > { %v1558_v29 = vsel %vm1551_vm12, %v2827_v28, 0.0 }
 0xace   : > { %1559 = vadd.xlane.f32.xlu0 %v1558_v29 }
 0xb2c   : > { %v1668_v30 = vpop.xlane.xlu0 %1667 }
 0xb2d   : > { %v1669_v31 = vsub.f32 %v1660_v9, %v1668_v30 }
 0xb2f   : > { %v1670_v32 = vmul.f32 1.442695, %v1669_v31 }
 0xb31   : > { %2828 = vpow2.f32 %v1670_v32 }
 0xb38   : > { %v1783_v33 = vpop.xlane.xlu0 %1782 }
 0xb39   : > { %v1784_v34 = vsub.f32 %v1775_v14, %v1783_v33  ;;  %v2794_v14 = vld [vmem:[%s3750_s13 + $0x8] sm:$0xff]  }
 0xb3a   : > { %2634 = vmatpush3.bf16.msra.mxu0 %v2794_v14 }
 0xb3b   : > { %v1785_v35 = vmul.f32 1.442695, %v1784_v34  ;;  %2635 = vmatprep.subr.bf16.mxu0 %v3117_v8 }
 0xb3d   : > { %2830 = vpow2.f32 %v1785_v35 }
 0xb3e   : > { %v2829_v36 = vpop.eup %2828  ;;  %2636 = vmatpush3.bf16.msra.mxu0 %v2795_v17 }
 0xb3f   : > { %v1672_v26 = vsel %vm1551_vm12, %v2829_v36, 0.0  ;;  %2649 = vmatprep.subr.bf16.mxu0 %v3117_v8 }
 0xb40   : > { %1673 = vadd.xlane.f32.xlu1 %v1672_v26  ;;  %v1898_v39 = vpop.xlane.xlu1 %1897 }
 0xb41   : > { %v1899_v40 = vsub.f32 %v1890_v20, %v1898_v39 }
 0xb43   : > { %v1900_v41 = vmul.f32 1.442695, %v1899_v40  ;;  %v2796_v40 = vld [vmem:[#allocation14 + $0x8] sm:$0xff]  }
 0xb45   : > { %2832 = vpow2.f32 %v1900_v41  ;;  %v2797_v41 = vld [vmem:[#allocation14] sm:$0xff]  }
 0xb4a   : > { %v2831_v37 = vpop.eup %2830 }
 0xb4b   : > { %v1787_v38 = vsel %vm1551_vm12, %v2831_v37, 0.0 }
 0xb4c   : > { %1788 = vadd.xlane.f32.xlu0 %v1787_v38 }
 0xb51   : > { %1678 = vrot.lane.b32.xlu1 %v3574_v49, %s3121_s25  ;;  %s3814_s25 = smov 8  }
 0xb52   : > { %v2833_v42 = vpop.eup %2832 }
 0xb53   : > { %v1902_v43 = vsel %vm1551_vm12, %v2833_v42, 0.0 }
 0xb57   : > { %v1560_v44 = vpop.xlane.xlu0 %1559 }
 0xb58   : > { %2834 = vrcp.f32 %v1560_v44 }
 0xb62   : > { %1565 = vrot.lane.b32.xlu0 %v3574_v49, %s3811_s2 }
 0xb65   : > { %v2835_v46 = vpop.eup %2834 }
 0xb66   : > { %1908 = vrot.lane.b32.xlu0 %v3574_v49, %s3812_s24  ;;  %v1562_v48 = vmul.f32 %v2835_v46, %v2827_v28  ;;  %s3818_s24 = sld [smem:[#allocation34_spill]] }
 0xb68   : > { %v1563_v53 = vpack.c.bf16 %v1562_v48, %v1562_v48 }
 0xb75   : > { %1903 = vadd.xlane.f32.xlu1 %v1902_v43 }
 0xb86   : > { %1793 = vrot.lane.b32.xlu1 %v3574_v49, %s3813_s17  ;;  %s3699_s17 = scalar_lea.hbm %s3818_s24, %s2446_s22 }
 0xbc9   : > { %v1674_v45 = vpop.xlane.xlu1 %1673 }
 0xbca   : > { %2836 = vrcp.f32 %v1674_v45 }
 0xbcd   : > { %v1679_v52 = vpop.permute.xlu1 %1678 }
 0xbce   : > { %v1684_v55 = vsel %vm1570_vm13, %v1679_v52, 0  ;;  %v2433_v52 = vld [vmem:[#allocation12] ss:$0 sm:$0xff] }
 0xbd5   : > { %v1789_v47 = vpop.xlane.xlu0 %1788 }
 0xbd6   : > { %2838 = vrcp.f32 %v1789_v47 }
 0xbd7   : > { %v2837_v54 = vpop.eup %2836 }
 0xbd8   : > { %v1676_v49 = vmul.f32 %v2837_v54, %v2829_v36 }
 0xbd9   : > { %v1566_v50 = vpop.permute.xlu0 %1565 }
 0xbda   : > { %v1572_v51 = vsel %vm1570_vm13, %v1566_v50, 0  ;;  %v1677_v56 = vpack.c.bf16 %v1676_v49, %v1676_v49 }
 0xbdb   : > { %2592 = vmatpush3.bf16.msra.mxu1 %v1572_v51 }
 0xbdc   : > { %2603 = vmatprep.subr.bf16.mxu1 %v3117_v8 }
 0xbdd   : > { %v1909_v62 = vpop.permute.xlu0 %1908 }
 0xbde   : > { %2594 = vmatmul.mubr.msk.bf16.vlgmr.msra.gmra.mxu1 %vm1551_vm12, %v1563_v53  ;;  %v1914_v1 = vsel %vm1570_vm13, %v1909_v62, 0 }
 0xbdf   : > { %2604 = vmatpush3.bf16.msra.mxu1 %v1684_v55  ;;  %2605 = vmatprep.mubr.msk.bf16.mxu1 %vm3118_vm1, %v3117_v8  ;;  %v2434_v55 = vld [vmem:[%s3745_s8] ss:$0 sm:$0xff] }
 0xbe0   : > { %2615 = vmatprep.subr.bf16.mxu1 %v3117_v8 }
 0xbe3   : > { %v2839_v57 = vpop.eup %2838 }
 0xbe4   : > { %v1791_v59 = vmul.f32 %v2839_v57, %v2831_v37 }
 0xbe6   : > { %2606 = vmatmul.mubr.msk.bf16.vlgmr.msra.gmra.mxu1 %vm1551_vm12, %v1677_v56  ;;  %v1792_v63 = vpack.c.bf16 %v1791_v59, %v1791_v59  ;;  %v2801_v59 = vld [vmem:[%s3753_s16] sm:$0xff]  }
 0xbe7   : > { %2617 = vmatprep.mubr.msk.bf16.mxu1 %vm3118_vm1, %v3117_v8 }
 0xbfe   : > { %v1904_v58 = vpop.xlane.xlu1 %1903 }
 0xbff   : > { %2840 = vrcp.f32 %v1904_v58  ;;  %v2800_v58 = vld [vmem:[%s3753_s16 + $0x8] sm:$0xff]  }
 0xc02   : > { %v1794_v60 = vpop.permute.xlu1 %1793 }
 0xc03   : > { %v1799_v61 = vsel %vm1570_vm13, %v1794_v60, 0  ;;  %v2435_v60 = vld [vmem:[%s3752_s15] ss:$0 sm:$0xff] }
 0xc04   : > { %2616 = vmatpush3.bf16.msra.mxu1 %v1799_v61 }
 0xc05   : > { %2627 = vmatprep.subr.bf16.mxu1 %v3117_v8 }
 0xc07   : > { %2618 = vmatmul.mubr.msk.bf16.vlgmr.msra.gmra.mxu1 %vm1551_vm12, %v1792_v63 }
 0xc08   : > { %2628 = vmatpush3.bf16.msra.mxu1 %v1914_v1  ;;  %2629 = vmatprep.mubr.msk.bf16.mxu1 %vm3118_vm1, %v3117_v8 }
 0xc09   : > { %2641 = vmatprep.subr.bf16.mxu1 %v3117_v8 }
 0xc0c   : > { %v2841_v2 = vpop.eup %2840 }
 0xc0d   : > { %v1906_v3 = vmul.f32 %v2841_v2, %v2833_v42  ;;  %v2799_v42 = vld [vmem:[%s3753_s16 + $0x10] sm:$0xff]  }
 0xc0f   : > { %v1907_v4 = vpack.c.bf16 %v1906_v3, %v1906_v3 }
 0xc11   : > { %2630 = vmatmul.mubr.msk.bf16.vlgmr.msra.gmra.mxu1 %vm1551_vm12, %v1907_v4 }
 0xc12   : > { %2645 = vmatprep.mubr.msk.bf16.mxu1 %vm3118_vm1, %v3117_v8  ;;  %2642 = vmatpush3.bf16.msra.mxu1 %v2796_v40 }
 0xc13   : > { %2643 = vmatprep.subr.bf16.mxu1 %v3117_v8 }
 0xc16   : > { %2644 = vmatpush3.bf16.msra.mxu1 %v2797_v41 }
 0xc9e   : > { %v1608_v5 = vpop.f32.mrf.mxu1 }
 0xc9f   : > { %1614 = vst.msk [vmem:[#allocation2] sm:$0xff] %vm821_vm4, %v1608_v5 }
 0xca0   : > { %v2595_v6 = vpop.f32.mrf.mxu1 }
 0xca2   : > { %v1611_v7 = vpop.f32.mrf.mxu1 }
 0xca4   : > { %v2596_v9 = vpop.f32.mrf.mxu1 }
 0xca6   : > { %v1720_v10 = vpop.f32.mrf.mxu1 }
 0xca7   : > { %1727 = vrot.lane.b32.xlu1 %v1720_v10, %s3814_s25  ;;  %s2215_s25 = scalar_lea.sflag [#allocation5], %s3400_s14 }
 0xca8   : > { %v2607_v11 = vpop.f32.mrf.mxu1 }
 0xcaa   : > { %v1723_v12 = vpop.f32.mrf.mxu1 }
 0xcac   : > { %v2608_v13 = vpop.f32.mrf.mxu1 }
 0xcc7   : > { %v1835_v16 = vpop.f32.mrf.mxu1 }
 0xcc8   : > { %1842 = vrot.lane.b32.xlu0 %v1835_v16, %s3815_s4 }
 0xcc9   : > { %v2619_v18 = vpop.f32.mrf.mxu1 }
 0xccb   : > { %v1838_v19 = vpop.f32.mrf.mxu1 }
 0xccd   : > { %v2620_v20 = vpop.f32.mrf.mxu1 }
 0xcd1   : > { %v1950_v21 = vpop.f32.mrf.mxu1 }
 0xcd2   : > { %1957 = vrot.lane.b32.xlu1 %v1950_v21, %s3816_s23 }
 0xcd3   : > { %v2631_v22 = vpop.f32.mrf.mxu1 }
 0xcd5   : > { %v1953_v23 = vpop.f32.mrf.mxu1 }
 0xcd7   : > { %v2632_v24 = vpop.f32.mrf.mxu1 }
 0xd19   : > { %v1728_v0 = vpop.permute.xlu1 %1727 }
 0xd1a   : > { %1730 = vst.msk [vmem:[#allocation2] sm:$0xff] %vm1046_vm7, %v1728_v0 }
 0xd3a   : > { %v1843_v25 = vpop.permute.xlu0 %1842 }
 0xd3b   : > { %1845 = vst.msk [vmem:[#allocation2] sm:$0xff] %vm1163_vm8, %v1843_v25 }
 0xd44   : > { %v1958_v27 = vpop.permute.xlu1 %1957 }
 0xd45   : > { %1960 = vst.msk [vmem:[#allocation2] sm:$0xff] %vm1280_vm9, %v1958_v27 }
 0xd4c   : > { %v1961_v28 = vld [vmem:[#allocation2] sm:$0xff] }
 0xd4d   : > { %v1962_v29 = vpack.c.bf16 %v1961_v28, %v1961_v28 }
 0xd4f   : > { %2638 = vmatmul.mubr.msk.bf16.vlgmr.msra.gmra.mxu0 %vm720_vm0, %v1962_v29 }
 0xd50   : > { %2657 = vmatprep.mubr.msk.bf16.mxu0 %vm3118_vm1, %v3117_v8  ;;  %vm2167_vm1 = vcmask 523264  }
 0xe0f   : > { %v2016_v30 = vpop.f32.mrf.mxu0 }
 0xe10   : > { %v3661_v31 = vadd.f32 %v2016_v30, %v3542_v15  ;;  %v2798_v15 = vld [vmem:[%s3753_s16 + $0x18] sm:$0xff]  }
 0xe11   : > { %v2639_v32 = vpop.f32.mrf.mxu0  ;;  %2650 = vmatpush3.bf16.msra.mxu0 %v2798_v15 }
 0xe12   : > { %v2025_v33 = vsel %vm720_vm0, %v3661_v31, 0.0  ;;  %2651 = vmatprep.subr.bf16.mxu0 %v3117_v8 }
 0xe13   : > { %2026 = vadd.xlane.f32.xlu0 %v2025_v33  ;;  %v2019_v34 = vpop.f32.mrf.mxu0 }
 0xe15   : > { %v2640_v35 = vpop.f32.mrf.mxu0  ;;  %2652 = vmatpush3.bf16.msra.mxu0 %v2799_v42 }
 0xe16   : > { %2653 = vmatprep.subr.bf16.mxu0 %v3117_v8 }
 0xe19   : > { %2654 = vmatpush3.bf16.msra.mxu0 %v2800_v58 }
 0xe1a   : > { %2655 = vmatprep.subr.bf16.mxu0 %v3117_v8  ;;  %v2439_v8 = vld [vmem:[%s3817_s3] ss:$0 sm:$0xff] }
 0xe1d   : > { %2656 = vmatpush3.bf16.msra.mxu0 %v2801_v59 }
 0xe9c   : > { %v2027_v36 = vpop.xlane.xlu0 %2026 }
 0xe9d   : > { %v2028_v26 = vmul.f32 0.03125, %v2027_v36 }
 0xe9f   : > { %v2029_v37 = vsub.f32 %v3661_v31, %v2028_v26 }
 0xea1   : > { %v2030_v38 = vmul.f32 %v2029_v37, %v2029_v37  ;;  %v2050_v53 = vmul.f32 %v2433_v52, %v2029_v37 }
 0xea3   : > { %v2031_v39 = vsel %vm720_vm0, %v2030_v38, 0.0 }
 0xea4   : > { %2032 = vadd.xlane.f32.xlu1 %v2031_v39 }
 0xf2d   : > { %v2033_v43 = vpop.xlane.xlu1 %2032 }
 0xf2e   : > { %v2034_v44 = vmul.f32 0.032258064, %v2033_v43 }
 0xf30   : > { %2842 = vrsqrt.f32 %v2034_v44  ;;  %vm2037_vm14 = vcmp.eq.f32.partialorder %v2034_v44, inf  ;;  %v2040_v47 = vand.u32 2147483648, %v2034_v44  ;;  %vm2039_vm15 = vcmp.eq.f32.partialorder %v2034_v44, 0.0 }
 0xf3d   : > { %v2843_v45 = vpop.eup %2842 }
 0xf3e   : > { %v2036_v46 = vmul.f32 %v2843_v45, %v2034_v44 }
 0xf40   : > { %v2038_v48 = vsel %vm2037_vm14, %v2034_v44, %v2036_v46 }
 0xf41   : > { %v2041_v50 = vsel %vm2039_vm15, %v2040_v47, %v2038_v48 }
 0xf42   : > { %v2042_v51 = vadd.f32 1e-06, %v2041_v50 }
 0xf44   : > { %2844 = vrcp.f32 %v2042_v51 }
 0xf51   : > { %v2845_v54 = vpop.eup %2844 }
 0xf52   : > { %v2051_v49 = vmul.f32 %v2845_v54, %v2050_v53 }
 0xf54   : > { %v2058_v56 = vadd.f32 %v2434_v55, %v2051_v49 }
 0xf56   : > { %v2059_v57 = vpack.c.bf16 %v2058_v56, %v2058_v56 }
 0xf58   : > { %2646 = vmatmul.mubr.msk.bf16.vlgmr.msra.gmra.mxu1 %vm720_vm0, %v2059_v57 }
0x1018   : > { %v2120_v61 = vpop.f32.mrf.mxu1 }
0x1019   : > { %v2121_v62 = vadd.f32 %v2435_v60, %v2120_v61 }
0x101a   : > { %v2647_v63 = vpop.f32.mrf.mxu1 }
0x101b   : > { %v2126_v1 = vmax.f32 %v2121_v62, 0.0 }
0x101c   : > { %v2123_v2 = vpop.f32.mrf.mxu1 }
0x101d   : > { %v2127_v3 = vpack.c.bf16 %v2126_v1, %v2126_v1 }
0x101e   : > { %v2648_v4 = vpop.f32.mrf.mxu1 }
0x101f   : > { %2658 = vmatmul.mubr.msk.bf16.vlgmr.msra.gmra.mxu0 %vm2167_vm1, %v2127_v3 }
0x10df   : > { %v2205_v5 = vpop.f32.mrf.mxu0 }
0x10e0   : > { %v2206_v6 = vadd.f32 %v2439_v8, %v2205_v5 }
0x10e1   : > { %v2659_v7 = vpop.f32.mrf.mxu0 }
0x10e2   : > { %v2211_v9 = vmax.f32 %v2206_v6, 0.0 }
0x10e3   : > { %v2208_v10 = vpop.f32.mrf.mxu0 }
0x10e4   : > { %v2212_v11 = vadd.f32 %v2211_v9, %v3661_v31 }
0x10e5   : > { %v2660_v12 = vpop.f32.mrf.mxu0 }
0x10e6   : > { %2213 = vst.msk [vmem:[%s692_s6] sm:$0xff] %vm720_vm0, %v2212_v11 }
0x10e7   : > { %3043 = shalt.err (!%p3040_p3)
}
0x10e8   : > { %s3044_s26 = scalar_lea.hbm %s3699_s17, 128  ;;  %s3048_s23 = scalar_lea.hbm %s3818_s24, 256 }
0x10e9   : > { %p3045_p6 = scmp.ne.s32.totalorder %s3699_s17, %s3044_s26  ;;  %p3049_p10 = scmp.lt.s32.totalorder %s3699_s17, %s3818_s24 }
0x10ea   : > { %p3050_p13 = scmp.lt.s32.totalorder %s3048_s23, %s3044_s26 }
0x10eb   : > { %p3046_p9 = pnand %p3045_p6, %p3819_p5 }
0x10ec   : > { %p3051_p0 = por %p3050_p13, %p3049_p10 }
0x10ed   : > { %p3047_p1 = pneg %p3046_p9 }
0x10ef   : > { %p3052_p2 = pnand %p3051_p0, %p3047_p1 }
0x10f1   : > { %3055 = shalt.err (!%p3052_p2)
}
0x10f2   : > { %2687 = dma.vmem_to_hbm [thread:$0]  (%p3819_p5), %s2229_s21, 128, %s3699_s17, %s2215_s25  }
0x10f3 PF: > { %s2240_s6 = sand.u32 1, %s3094_s27   ;;  %p3820_p8 = scmp.ne.s32.totalorder %s3798_s18, 0 }
0x10f4   : > { %p3821_p7 = scmp.ge.s32.totalorder %s3106_s30, 2  ;;  %s2241_s19 = scalar_lea.sflag [#allocation5], %s2240_s6 }
0x10f6   : > { %p2713_p11 = pnand %p3821_p7, %p3820_p8 }
0x10f8   : > { %p2714_p12 = pneg %p2713_p11 }
0x10fa   : > { %3089 = dma.done.wait (%p2714_p12), %s2241_s19, 128  }
0x10fb   : > { %3091 = vsyncadd (%p2714_p12), %s2241_s19, 4294967168  ;;  %s3822_s30 = sld [smem:[#allocation22_spill]]  ;;  %s3825_s27 = smov %s3098_s28 }
0x10fc   : > { %s3823_s2 = sld [smem:[#allocation21_spill]] }
0x10fd   : > { %s3824_s29 = sld [smem:[#allocation23_spill]] }
0x1101   : > { %p34_p4 = scmp.ge.s32.totalorder %s3822_s30, 4  }
0x1102   : > { %s3826_s28 = smov %s3823_s2 }
0x1103   :  { %36 = sbr.rel (!%p34_p4) target bundleno = 20 (0x14), region = 167 }
0x1108   :  { %2246 = vsyncpa [#allocation4], 1 }
0x1109   :  { %2248 = vsyncpa [#allocation4 + $0x1], 1 }
0x110a   :  { %2249 = vsyncpa [#allocation7], 1 }
0x110b   :  { %2250 = vsyncpa [#allocation10], 1 }
0x110c   :  { %2251 = vsyncpa [#allocation13], 1 }
0x110d   :  { %2252 = vsyncpa [#allocation5], 1 }
0x110e   :  { %2254 = vsyncpa [#allocation5 + $0x1], 1 }

</bundles_post_ra>
